<compile_context>
chip_gen: v5e
topology: v5e:2x2
jax: 0.10.0
libtpu: 0.0.40
codegen_flags: <defaults>
</compile_context>

<pallas_src>
import functools

import jax
import jax.numpy as jnp
from jax.experimental import pallas as pl
from jax.experimental.pallas import tpu as pltpu


# ---------------------------------------------------------------------------
# Fused Pallas kernel: conv1 -> conv2 -> conv3 -> flatten -> {cls, discr, reco}
# ---------------------------------------------------------------------------
def tempcnn_wp_kernel(
    # inputs
    x_ref,                       # (B*L, nch)  f32, batch folded into rows, channels on lanes
    w1_ref, s1_ref, b1_ref,      # conv1: (K*nch, H) bf16, (1, H) f32, (1, H) f32
    w2_ref, s2_ref, b2_ref,      # conv2: (K*H, H)  bf16, ...
    w3_ref, s3_ref, b3_ref,      # conv3: (K*H, H)  bf16, ...
    wr_ref, br_ref,              # reco:  (H*L, nch*L) bf16, (1, nch*L) f32
    wf1_ref, sf_ref, bf_ref,     # fused FC hidden of both heads: (H*L, 2*FC) bf16, (1, 2*FC) f32 x2
    wc2_ref, bc2_ref,            # classifier output:    (FC, n_classes) bf16, (1, n_classes) f32
    wd2_ref, bd2_ref,            # discriminator output: (FC, 2) bf16, (1, 2) f32
    # outputs
    cls_ref,                     # (B, n_classes) f32
    dis_ref,                     # (B, 2) f32
    reco_ref,                    # (B, nch*L) f32
    emb_ref,                     # (B, H*L) f32
    # scratch
    hp_ref,                      # (B*L + 2*pad, max(nch, H)) f32 padded-activation buffer
    *, B, L, K, fc_hidden,
):
    M = B * L
    pad = K // 2
    # time index of every row within its own sequence (rows are batch-major: r = b*L + t)
    t_pos = jax.lax.broadcasted_iota(jnp.int32, (M, 1), 0) % L

    # zero once; the `pad` boundary rows stay zero across all three conv layers
    hp_ref[...] = jnp.zeros_like(hp_ref)

    def conv_bn_relu(h, w_ref, s_ref, b_ref):
        """'same' Conv1d as one im2col matmul + folded BatchNorm (eval) + ReLU.

        Batch is folded into the matmul M dimension; the K taps are shifted
        windows of a padded VMEM scratch, with a row-validity mask that zeroes
        both the padding rows and rows that would bleed across batch boundaries.
        """
        cin = h.shape[1]
        hp_ref[pad:pad + M, :cin] = h
        taps = []
        for k in range(K):                       # K is small & static -> unrolled
            d = k - pad
            tap = hp_ref[k:k + M, :cin]          # row r -> h[r + d]
            if d != 0:
                valid = (t_pos + d >= 0) & (t_pos + d < L)
                tap = jnp.where(valid, tap, 0.0)
            taps.append(tap)
        cols = jnp.concatenate(taps, axis=1)     # (M, K*cin) im2col operand
        acc = jnp.dot(cols.astype(jnp.bfloat16), w_ref[...],     # one MXU matmul
                      preferred_element_type=jnp.float32)
        return jnp.maximum(acc * s_ref[...] + b_ref[...], 0.0)
        # Dropout (p=0.3) is identity at inference time.

    h = conv_bn_relu(x_ref[...], w1_ref, s1_ref, b1_ref)   # (M, H)
    h = conv_bn_relu(h, w2_ref, s2_ref, b2_ref)            # (M, H)
    h = conv_bn_relu(h, w3_ref, s3_ref, b3_ref)            # (M, H)
    hidden = h.shape[1]

    # ---- channel-major flatten (== torch nn.Flatten on the (B, H, L) activation) ----
    ht = h.T                                               # (H, B*L): time moves onto lanes
    emb = jnp.concatenate(
        [jnp.concatenate([ht[c:c + 1, b * L:(b + 1) * L] for c in range(hidden)],
                         axis=1)
         for b in range(B)],
        axis=0)                                            # (B, H*L), lane-dense store
    emb_ref[...] = emb
    emb_bf = emb.astype(jnp.bfloat16)

    # ---- reconstruction head ----
    reco_ref[...] = (jnp.dot(emb_bf, wr_ref[...], preferred_element_type=jnp.float32)
                     + br_ref[...])

    # ---- both FC heads share one lane-dense hidden matmul (emb -> 2*fc_hidden) ----
    hfc = jnp.dot(emb_bf, wf1_ref[...], preferred_element_type=jnp.float32)
    hfc = jnp.maximum(hfc * sf_ref[...] + bf_ref[...], 0.0)   # folded BN + ReLU
    hfc = hfc.astype(jnp.bfloat16)                            # Dropout(0.5): identity (eval)
    cls_ref[...] = (jnp.dot(hfc[:, :fc_hidden], wc2_ref[...],
                            preferred_element_type=jnp.float32) + bc2_ref[...])
    # grad_reverse(emb, 1.0) is the identity in the forward pass.
    # TODO(synk): gradient reversal only affects backward; not representable here.
    dis_ref[...] = (jnp.dot(hfc[:, fc_hidden:], wd2_ref[...],
                            preferred_element_type=jnp.float32) + bd2_ref[...])


# ---------------------------------------------------------------------------
# Wrapper (glue: weight layout prep + single pallas_call)
# ---------------------------------------------------------------------------
def tempcnn_wp_forward(x_ncw, params, *, K):
    B, nch, L = x_ncw.shape
    hidden = params["conv1"][0].shape[-1]
    emb_dim = hidden * L
    fc_hidden = params["cls"]["w1"].shape[-1]
    num_classes = params["cls"]["w2"].shape[-1]
    pad = K // 2
    to_bf16 = lambda a: a.astype(jnp.bfloat16)

    # NCW -> (B*L, C): channels on the TPU lane axis, batch folded into matmul rows.
    x2d = jnp.transpose(x_ncw, (0, 2, 1)).reshape(B * L, nch)

    def conv_args(p):
        w, scale, bias = p                      # w: (K, Cin, Cout)
        kk, cin, cout = w.shape
        return to_bf16(w.reshape(kk * cin, cout)), scale, bias

    # Fuse both FC heads' first layers into one lane-dense (emb_dim, 2*fc_hidden) matmul.
    wf1 = to_bf16(jnp.concatenate([params["cls"]["w1"], params["discr"]["w1"]], axis=1))
    sf = jnp.concatenate([params["cls"]["scale"], params["discr"]["scale"]], axis=1)
    bfc = jnp.concatenate([params["cls"]["bias"], params["discr"]["bias"]], axis=1)

    kern = functools.partial(tempcnn_wp_kernel, B=B, L=L, K=K, fc_hidden=fc_hidden)
    cls_logits, dis_logits, reco_flat, emb = pl.pallas_call(
        kern,
        out_shape=(
            jax.ShapeDtypeStruct((B, num_classes), jnp.float32),
            jax.ShapeDtypeStruct((B, 2), jnp.float32),
            jax.ShapeDtypeStruct((B, nch * L), jnp.float32),
            jax.ShapeDtypeStruct((B, emb_dim), jnp.float32),
        ),
        scratch_shapes=[
            pltpu.VMEM((B * L + 2 * pad, max(nch, hidden)), jnp.float32),
        ],
    )(
        x2d,
        *conv_args(params["conv1"]),
        *conv_args(params["conv2"]),
        *conv_args(params["conv3"]),
        to_bf16(params["reco_w"]), params["reco_b"].reshape(1, -1),
        wf1, sf, bfc,
        to_bf16(params["cls"]["w2"]), params["cls"]["b2"].reshape(1, -1),
        to_bf16(params["discr"]["w2"]), params["discr"]["b2"].reshape(1, -1),
    )
    reco = reco_flat.reshape(B, nch, L)   # torch .view(-1, nch, nts): free row-major reshape
    return cls_logits, dis_logits, reco, emb


# ---------------------------------------------------------------------------
# Parameter construction (deterministic, synthetic)
# ---------------------------------------------------------------------------
def fold_bn(lin_bias, gamma, beta, mean, var, eps=1e-5):
    scale = gamma / jnp.sqrt(var + eps)
    bias = (lin_bias - mean) * scale + beta
    return scale.reshape(1, -1), bias.reshape(1, -1)


def init_bn(key, dim):
    k1, k2, k3 = jax.random.split(key, 3)
    gamma = 1.0 + 0.1 * jax.random.normal(k1, (dim,), jnp.float32)
    beta = 0.1 * jax.random.normal(k2, (dim,), jnp.float32)
    mean = 0.05 * jax.random.normal(k3, (dim,), jnp.float32)
    var = jnp.ones((dim,), jnp.float32)
    return gamma, beta, mean, var


def init_conv_block(key, cin, cout, K):
    kw, kb, kbn = jax.random.split(key, 3)
    w = 0.1 * jax.random.normal(kw, (K, cin, cout), jnp.float32)
    b = 0.05 * jax.random.normal(kb, (cout,), jnp.float32)
    scale, bias = fold_bn(b, *init_bn(kbn, cout))
    return w, scale, bias


def init_linear(key, din, dout):
    kw, kb = jax.random.split(key)
    w = 0.05 * jax.random.normal(kw, (din, dout), jnp.float32)
    b = 0.05 * jax.random.normal(kb, (dout,), jnp.float32)
    return w, b


def init_fc_classifier(key, din, hidden, n_out):
    k1, kbn, k2 = jax.random.split(key, 3)
    w1, b1 = init_linear(k1, din, hidden)
    scale, bias = fold_bn(b1, *init_bn(kbn, hidden))
    w2, b2 = init_linear(k2, hidden, n_out)
    return dict(w1=w1, scale=scale, bias=bias, w2=w2, b2=b2)


# ---------------------------------------------------------------------------
# Main
# ---------------------------------------------------------------------------
if __name__ == "__main__":
    B = 2
    nch, nts = 4, 16          # size = (nchannels, nts)
    hidden = 32               # hidden_dims
    K = 5                     # kernel_size
    num_classes = 8
    fc_hidden = 256
    emb_dim = hidden * nts    # flattened embedding dim

    key = jax.random.PRNGKey(0)
    (kx, kc1, kc2, kc3, kreco, kcls, kdis) = jax.random.split(key, 7)

    x = jax.random.normal(kx, (B, nch, nts), jnp.float32)  # PyTorch NCW input

    params = {
        "conv1": init_conv_block(kc1, nch, hidden, K),
        "conv2": init_conv_block(kc2, hidden, hidden, K),
        "conv3": init_conv_block(kc3, hidden, hidden, K),
        "cls": init_fc_classifier(kcls, emb_dim, fc_hidden, num_classes),
        "discr": init_fc_classifier(kdis, emb_dim, fc_hidden, 2),
    }
    params["reco_w"], params["reco_b"] = init_linear(kreco, emb_dim, nch * nts)

    fwd = jax.jit(functools.partial(tempcnn_wp_forward, K=K))
    cls_logits, discr_logits, reco, emb = fwd(x, params)
    jax.block_until_ready((cls_logits, discr_logits, reco, emb))

    assert cls_logits.shape == (B, num_classes)
    assert discr_logits.shape == (B, 2)
    assert reco.shape == (B, nch, nts)
    assert emb.shape == (B, emb_dim)
    assert bool(jnp.all(jnp.isfinite(cls_logits)))
    assert bool(jnp.all(jnp.isfinite(discr_logits)))
    assert bool(jnp.all(jnp.isfinite(reco)))
    assert bool(jnp.all(jnp.isfinite(emb)))

    print("KERNEL_OK")
</pallas_src>

<mosaic_0001>
module attributes {stable_mosaic.version = 11 : i64} {
  func.func @tempcnn_wp_kernel(%arg0: memref<32x4xf32, #tpu.memory_space<vmem>>, %arg1: memref<20x32xbf16, #tpu.memory_space<vmem>>, %arg2: memref<1x32xf32, #tpu.memory_space<vmem>>, %arg3: memref<1x32xf32, #tpu.memory_space<vmem>>, %arg4: memref<160x32xbf16, #tpu.memory_space<vmem>>, %arg5: memref<1x32xf32, #tpu.memory_space<vmem>>, %arg6: memref<1x32xf32, #tpu.memory_space<vmem>>, %arg7: memref<160x32xbf16, #tpu.memory_space<vmem>>, %arg8: memref<1x32xf32, #tpu.memory_space<vmem>>, %arg9: memref<1x32xf32, #tpu.memory_space<vmem>>, %arg10: memref<512x64xbf16, #tpu.memory_space<vmem>>, %arg11: memref<1x64xf32, #tpu.memory_space<vmem>>, %arg12: memref<512x512xbf16, #tpu.memory_space<vmem>>, %arg13: memref<1x512xf32, #tpu.memory_space<vmem>>, %arg14: memref<1x512xf32, #tpu.memory_space<vmem>>, %arg15: memref<256x8xbf16, #tpu.memory_space<vmem>>, %arg16: memref<1x8xf32, #tpu.memory_space<vmem>>, %arg17: memref<256x2xbf16, #tpu.memory_space<vmem>>, %arg18: memref<1x2xf32, #tpu.memory_space<vmem>>, %arg19: memref<2x8xf32, #tpu.memory_space<vmem>>, %arg20: memref<2x2xf32, #tpu.memory_space<vmem>>, %arg21: memref<2x64xf32, #tpu.memory_space<vmem>>, %arg22: memref<2x512xf32, #tpu.memory_space<vmem>>, %arg23: memref<36x32xf32, #tpu.memory_space<vmem>>) attributes {dimension_semantics = [], scalar_prefetch = 0 : i64, scratch_operands = 1 : i64, tpu.core_type = #tpu.core_type<tc>} {
    %0 = tpu.iota {dimensions = array<i32: 0>} : vector<32x1xi32>
    %c16_i32 = arith.constant 16 : i32
    %c0_i32 = arith.constant 0 : i32
    %1 = arith.cmpi eq, %c16_i32, %c0_i32 : i32
    %c1_i32 = arith.constant 1 : i32
    %2 = arith.select %1, %c1_i32, %c16_i32 : i32
    %3 = vector.broadcast %2 : i32 to vector<32x1xi32>
    %4 = arith.remsi %0, %3 : vector<32x1xi32>
    %c0_i32_0 = arith.constant 0 : i32
    %5 = vector.broadcast %c0_i32_0 : i32 to vector<32x1xi32>
    %6 = arith.cmpi ne, %4, %5 : vector<32x1xi32>
    %c0_i32_1 = arith.constant 0 : i32
    %7 = vector.broadcast %c0_i32_1 : i32 to vector<32x1xi32>
    %8 = arith.cmpi slt, %4, %7 : vector<32x1xi32>
    %c0_i32_2 = arith.constant 0 : i32
    %9 = arith.cmpi slt, %2, %c0_i32_2 : i32
    %10 = vector.broadcast %9 : i1 to vector<32x1xi1>
    %11 = vector.broadcast %10 : vector<32x1xi1> to vector<32x1xi1>
    %12 = arith.xori %8, %11 : vector<32x1xi1>
    %13 = arith.andi %12, %6 : vector<32x1xi1>
    %14 = vector.broadcast %2 : i32 to vector<32x1xi32>
    %15 = arith.addi %4, %14 : vector<32x1xi32>
    %16 = arith.select %13, %15, %4 : vector<32x1xi1>, vector<32x1xi32>
    %cst = arith.constant 0.000000e+00 : f32
    %17 = vector.broadcast %cst : f32 to vector<36x32xf32>
    %c0 = arith.constant 0 : index
    %c0_3 = arith.constant 0 : index
    %18 = vector.load %arg23[%c0, %c0_3] : memref<36x32xf32, #tpu.memory_space<vmem>>, vector<36x32xf32>
    tpu.vector_store %arg23[%c0, %c0_3], %17 {strides = array<i32>} : memref<36x32xf32, #tpu.memory_space<vmem>>, vector<36x32xf32>,
    %c0_4 = arith.constant 0 : index
    %c0_5 = arith.constant 0 : index
    %19 = vector.load %arg0[%c0_4, %c0_5] : memref<32x4xf32, #tpu.memory_space<vmem>>, vector<32x4xf32>
    %c2 = arith.constant 2 : index
    %c0_6 = arith.constant 0 : index
    %20 = vector.load %arg23[%c2, %c0_6] : memref<36x32xf32, #tpu.memory_space<vmem>>, vector<32x4xf32>
    tpu.vector_store %arg23[%c2, %c0_6], %19 {strides = array<i32>} : memref<36x32xf32, #tpu.memory_space<vmem>>, vector<32x4xf32>,
    %c0_7 = arith.constant 0 : index
    %c0_8 = arith.constant 0 : index
    %21 = vector.load %arg23[%c0_7, %c0_8] : memref<36x32xf32, #tpu.memory_space<vmem>>, vector<32x4xf32>
    %c-2_i32 = arith.constant -2 : i32
    %22 = vector.broadcast %c-2_i32 : i32 to vector<32x1xi32>
    %23 = arith.addi %16, %22 : vector<32x1xi32>
    %c0_i32_9 = arith.constant 0 : i32
    %24 = vector.broadcast %c0_i32_9 : i32 to vector<32x1xi32>
    %25 = arith.cmpi sge, %23, %24 : vector<32x1xi32>
    %c-2_i32_10 = arith.constant -2 : i32
    %26 = vector.broadcast %c-2_i32_10 : i32 to vector<32x1xi32>
    %27 = arith.addi %16, %26 : vector<32x1xi32>
    %c16_i32_11 = arith.constant 16 : i32
    %28 = vector.broadcast %c16_i32_11 : i32 to vector<32x1xi32>
    %29 = arith.cmpi slt, %27, %28 : vector<32x1xi32>
    %30 = arith.andi %25, %29 : vector<32x1xi1>
    %cst_12 = arith.constant 0.000000e+00 : f32
    %31 = vector.shape_cast %30 : vector<32x1xi1> to vector<32x1xi1>
    %32 = vector.broadcast %31 : vector<32x1xi1> to vector<32x4xi1>
    %33 = vector.broadcast %cst_12 : f32 to vector<32x4xf32>
    %34 = arith.select %32, %21, %33 : vector<32x4xi1>, vector<32x4xf32>
    %c1 = arith.constant 1 : index
    %c0_13 = arith.constant 0 : index
    %35 = vector.load %arg23[%c1, %c0_13] : memref<36x32xf32, #tpu.memory_space<vmem>>, vector<32x4xf32>
    %c-1_i32 = arith.constant -1 : i32
    %36 = vector.broadcast %c-1_i32 : i32 to vector<32x1xi32>
    %37 = arith.addi %16, %36 : vector<32x1xi32>
    %c0_i32_14 = arith.constant 0 : i32
    %38 = vector.broadcast %c0_i32_14 : i32 to vector<32x1xi32>
    %39 = arith.cmpi sge, %37, %38 : vector<32x1xi32>
    %c-1_i32_15 = arith.constant -1 : i32
    %40 = vector.broadcast %c-1_i32_15 : i32 to vector<32x1xi32>
    %41 = arith.addi %16, %40 : vector<32x1xi32>
    %c16_i32_16 = arith.constant 16 : i32
    %42 = vector.broadcast %c16_i32_16 : i32 to vector<32x1xi32>
    %43 = arith.cmpi slt, %41, %42 : vector<32x1xi32>
    %44 = arith.andi %39, %43 : vector<32x1xi1>
    %cst_17 = arith.constant 0.000000e+00 : f32
    %45 = vector.shape_cast %44 : vector<32x1xi1> to vector<32x1xi1>
    %46 = vector.broadcast %45 : vector<32x1xi1> to vector<32x4xi1>
    %47 = vector.broadcast %cst_17 : f32 to vector<32x4xf32>
    %48 = arith.select %46, %35, %47 : vector<32x4xi1>, vector<32x4xf32>
    %c2_18 = arith.constant 2 : index
    %c0_19 = arith.constant 0 : index
    %49 = vector.load %arg23[%c2_18, %c0_19] : memref<36x32xf32, #tpu.memory_space<vmem>>, vector<32x4xf32>
    %c3 = arith.constant 3 : index
    %c0_20 = arith.constant 0 : index
    %50 = vector.load %arg23[%c3, %c0_20] : memref<36x32xf32, #tpu.memory_space<vmem>>, vector<32x4xf32>
    %c1_i32_21 = arith.constant 1 : i32
    %51 = vector.broadcast %c1_i32_21 : i32 to vector<32x1xi32>
    %52 = arith.addi %16, %51 : vector<32x1xi32>
    %c0_i32_22 = arith.constant 0 : i32
    %53 = vector.broadcast %c0_i32_22 : i32 to vector<32x1xi32>
    %54 = arith.cmpi sge, %52, %53 : vector<32x1xi32>
    %c1_i32_23 = arith.constant 1 : i32
    %55 = vector.broadcast %c1_i32_23 : i32 to vector<32x1xi32>
    %56 = arith.addi %16, %55 : vector<32x1xi32>
    %c16_i32_24 = arith.constant 16 : i32
    %57 = vector.broadcast %c16_i32_24 : i32 to vector<32x1xi32>
    %58 = arith.cmpi slt, %56, %57 : vector<32x1xi32>
    %59 = arith.andi %54, %58 : vector<32x1xi1>
    %cst_25 = arith.constant 0.000000e+00 : f32
    %60 = vector.shape_cast %59 : vector<32x1xi1> to vector<32x1xi1>
    %61 = vector.broadcast %60 : vector<32x1xi1> to vector<32x4xi1>
    %62 = vector.broadcast %cst_25 : f32 to vector<32x4xf32>
    %63 = arith.select %61, %50, %62 : vector<32x4xi1>, vector<32x4xf32>
    %c4 = arith.constant 4 : index
    %c0_26 = arith.constant 0 : index
    %64 = vector.load %arg23[%c4, %c0_26] : memref<36x32xf32, #tpu.memory_space<vmem>>, vector<32x4xf32>
    %c2_i32 = arith.constant 2 : i32
    %65 = vector.broadcast %c2_i32 : i32 to vector<32x1xi32>
    %66 = arith.addi %16, %65 : vector<32x1xi32>
    %c0_i32_27 = arith.constant 0 : i32
    %67 = vector.broadcast %c0_i32_27 : i32 to vector<32x1xi32>
    %68 = arith.cmpi sge, %66, %67 : vector<32x1xi32>
    %c2_i32_28 = arith.constant 2 : i32
    %69 = vector.broadcast %c2_i32_28 : i32 to vector<32x1xi32>
    %70 = arith.addi %16, %69 : vector<32x1xi32>
    %c16_i32_29 = arith.constant 16 : i32
    %71 = vector.broadcast %c16_i32_29 : i32 to vector<32x1xi32>
    %72 = arith.cmpi slt, %70, %71 : vector<32x1xi32>
    %73 = arith.andi %68, %72 : vector<32x1xi1>
    %cst_30 = arith.constant 0.000000e+00 : f32
    %74 = vector.shape_cast %73 : vector<32x1xi1> to vector<32x1xi1>
    %75 = vector.broadcast %74 : vector<32x1xi1> to vector<32x4xi1>
    %76 = vector.broadcast %cst_30 : f32 to vector<32x4xf32>
    %77 = arith.select %75, %64, %76 : vector<32x4xi1>, vector<32x4xf32>
    %78 = tpu.concatenate %34, %48, %49, %63, %77 in 1 : vector<32x4xf32>, vector<32x4xf32>, vector<32x4xf32>, vector<32x4xf32>, vector<32x4xf32> -> vector<32x20xf32>
    %79 = arith.truncf %78 : vector<32x20xf32> to vector<32x20xbf16>
    %c0_31 = arith.constant 0 : index
    %c0_32 = arith.constant 0 : index
    %80 = vector.load %arg1[%c0_31, %c0_32] : memref<20x32xbf16, #tpu.memory_space<vmem>>, vector<20x32xbf16>
    %cst_33 = arith.constant dense<0.000000e+00> : vector<32x32xf32>
    %81 = tpu.matmul %79, %80, %cst_33 {dimension_numbers = #tpu.dot_dimension_numbers<[1], [0], [0], [1], [0, 0, 1, 1], [], []>} : vector<32x20xbf16>, vector<20x32xbf16>, vector<32x32xf32> -> vector<32x32xf32>
    %c0_34 = arith.constant 0 : index
    %c0_35 = arith.constant 0 : index
    %82 = vector.load %arg2[%c0_34, %c0_35] : memref<1x32xf32, #tpu.memory_space<vmem>>, vector<1x32xf32>
    %83 = vector.broadcast %82 : vector<1x32xf32> to vector<32x32xf32>
    %84 = arith.mulf %81, %83 : vector<32x32xf32>
    %c0_36 = arith.constant 0 : index
    %c0_37 = arith.constant 0 : index
    %85 = vector.load %arg3[%c0_36, %c0_37] : memref<1x32xf32, #tpu.memory_space<vmem>>, vector<1x32xf32>
    %86 = vector.broadcast %85 : vector<1x32xf32> to vector<32x32xf32>
    %87 = arith.addf %84, %86 : vector<32x32xf32>
    %cst_38 = arith.constant 0.000000e+00 : f32
    %88 = vector.broadcast %cst_38 : f32 to vector<32x32xf32>
    %89 = arith.maximumf %87, %88 : vector<32x32xf32>
    %c2_39 = arith.constant 2 : index
    %c0_40 = arith.constant 0 : index
    %90 = vector.load %arg23[%c2_39, %c0_40] : memref<36x32xf32, #tpu.memory_space<vmem>>, vector<32x32xf32>
    tpu.vector_store %arg23[%c2_39, %c0_40], %89 {strides = array<i32>} : memref<36x32xf32, #tpu.memory_space<vmem>>, vector<32x32xf32>,
    %c0_41 = arith.constant 0 : index
    %c0_42 = arith.constant 0 : index
    %91 = vector.load %arg23[%c0_41, %c0_42] : memref<36x32xf32, #tpu.memory_space<vmem>>, vector<32x32xf32>
    %c-2_i32_43 = arith.constant -2 : i32
    %92 = vector.broadcast %c-2_i32_43 : i32 to vector<32x1xi32>
    %93 = arith.addi %16, %92 : vector<32x1xi32>
    %c0_i32_44 = arith.constant 0 : i32
    %94 = vector.broadcast %c0_i32_44 : i32 to vector<32x1xi32>
    %95 = arith.cmpi sge, %93, %94 : vector<32x1xi32>
    %c-2_i32_45 = arith.constant -2 : i32
    %96 = vector.broadcast %c-2_i32_45 : i32 to vector<32x1xi32>
    %97 = arith.addi %16, %96 : vector<32x1xi32>
    %c16_i32_46 = arith.constant 16 : i32
    %98 = vector.broadcast %c16_i32_46 : i32 to vector<32x1xi32>
    %99 = arith.cmpi slt, %97, %98 : vector<32x1xi32>
    %100 = arith.andi %95, %99 : vector<32x1xi1>
    %cst_47 = arith.constant 0.000000e+00 : f32
    %101 = vector.shape_cast %100 : vector<32x1xi1> to vector<32x1xi1>
    %102 = vector.broadcast %101 : vector<32x1xi1> to vector<32x32xi1>
    %103 = vector.broadcast %cst_47 : f32 to vector<32x32xf32>
    %104 = arith.select %102, %91, %103 : vector<32x32xi1>, vector<32x32xf32>
    %c1_48 = arith.constant 1 : index
    %c0_49 = arith.constant 0 : index
    %105 = vector.load %arg23[%c1_48, %c0_49] : memref<36x32xf32, #tpu.memory_space<vmem>>, vector<32x32xf32>
    %c-1_i32_50 = arith.constant -1 : i32
    %106 = vector.broadcast %c-1_i32_50 : i32 to vector<32x1xi32>
    %107 = arith.addi %16, %106 : vector<32x1xi32>
    %c0_i32_51 = arith.constant 0 : i32
    %108 = vector.broadcast %c0_i32_51 : i32 to vector<32x1xi32>
    %109 = arith.cmpi sge, %107, %108 : vector<32x1xi32>
    %c-1_i32_52 = arith.constant -1 : i32
    %110 = vector.broadcast %c-1_i32_52 : i32 to vector<32x1xi32>
    %111 = arith.addi %16, %110 : vector<32x1xi32>
    %c16_i32_53 = arith.constant 16 : i32
    %112 = vector.broadcast %c16_i32_53 : i32 to vector<32x1xi32>
    %113 = arith.cmpi slt, %111, %112 : vector<32x1xi32>
    %114 = arith.andi %109, %113 : vector<32x1xi1>
    %cst_54 = arith.constant 0.000000e+00 : f32
    %115 = vector.shape_cast %114 : vector<32x1xi1> to vector<32x1xi1>
    %116 = vector.broadcast %115 : vector<32x1xi1> to vector<32x32xi1>
    %117 = vector.broadcast %cst_54 : f32 to vector<32x32xf32>
    %118 = arith.select %116, %105, %117 : vector<32x32xi1>, vector<32x32xf32>
    %c2_55 = arith.constant 2 : index
    %c0_56 = arith.constant 0 : index
    %119 = vector.load %arg23[%c2_55, %c0_56] : memref<36x32xf32, #tpu.memory_space<vmem>>, vector<32x32xf32>
    %c3_57 = arith.constant 3 : index
    %c0_58 = arith.constant 0 : index
    %120 = vector.load %arg23[%c3_57, %c0_58] : memref<36x32xf32, #tpu.memory_space<vmem>>, vector<32x32xf32>
    %c1_i32_59 = arith.constant 1 : i32
    %121 = vector.broadcast %c1_i32_59 : i32 to vector<32x1xi32>
    %122 = arith.addi %16, %121 : vector<32x1xi32>
    %c0_i32_60 = arith.constant 0 : i32
    %123 = vector.broadcast %c0_i32_60 : i32 to vector<32x1xi32>
    %124 = arith.cmpi sge, %122, %123 : vector<32x1xi32>
    %c1_i32_61 = arith.constant 1 : i32
    %125 = vector.broadcast %c1_i32_61 : i32 to vector<32x1xi32>
    %126 = arith.addi %16, %125 : vector<32x1xi32>
    %c16_i32_62 = arith.constant 16 : i32
    %127 = vector.broadcast %c16_i32_62 : i32 to vector<32x1xi32>
    %128 = arith.cmpi slt, %126, %127 : vector<32x1xi32>
    %129 = arith.andi %124, %128 : vector<32x1xi1>
    %cst_63 = arith.constant 0.000000e+00 : f32
    %130 = vector.shape_cast %129 : vector<32x1xi1> to vector<32x1xi1>
    %131 = vector.broadcast %130 : vector<32x1xi1> to vector<32x32xi1>
    %132 = vector.broadcast %cst_63 : f32 to vector<32x32xf32>
    %133 = arith.select %131, %120, %132 : vector<32x32xi1>, vector<32x32xf32>
    %c4_64 = arith.constant 4 : index
    %c0_65 = arith.constant 0 : index
    %134 = vector.load %arg23[%c4_64, %c0_65] : memref<36x32xf32, #tpu.memory_space<vmem>>, vector<32x32xf32>
    %c2_i32_66 = arith.constant 2 : i32
    %135 = vector.broadcast %c2_i32_66 : i32 to vector<32x1xi32>
    %136 = arith.addi %16, %135 : vector<32x1xi32>
    %c0_i32_67 = arith.constant 0 : i32
    %137 = vector.broadcast %c0_i32_67 : i32 to vector<32x1xi32>
    %138 = arith.cmpi sge, %136, %137 : vector<32x1xi32>
    %c2_i32_68 = arith.constant 2 : i32
    %139 = vector.broadcast %c2_i32_68 : i32 to vector<32x1xi32>
    %140 = arith.addi %16, %139 : vector<32x1xi32>
    %c16_i32_69 = arith.constant 16 : i32
    %141 = vector.broadcast %c16_i32_69 : i32 to vector<32x1xi32>
    %142 = arith.cmpi slt, %140, %141 : vector<32x1xi32>
    %143 = arith.andi %138, %142 : vector<32x1xi1>
    %cst_70 = arith.constant 0.000000e+00 : f32
    %144 = vector.shape_cast %143 : vector<32x1xi1> to vector<32x1xi1>
    %145 = vector.broadcast %144 : vector<32x1xi1> to vector<32x32xi1>
    %146 = vector.broadcast %cst_70 : f32 to vector<32x32xf32>
    %147 = arith.select %145, %134, %146 : vector<32x32xi1>, vector<32x32xf32>
    %148 = tpu.concatenate %104, %118, %119, %133, %147 in 1 : vector<32x32xf32>, vector<32x32xf32>, vector<32x32xf32>, vector<32x32xf32>, vector<32x32xf32> -> vector<32x160xf32>
    %149 = arith.truncf %148 : vector<32x160xf32> to vector<32x160xbf16>
    %c0_71 = arith.constant 0 : index
    %c0_72 = arith.constant 0 : index
    %150 = vector.load %arg4[%c0_71, %c0_72] : memref<160x32xbf16, #tpu.memory_space<vmem>>, vector<160x32xbf16>
    %cst_73 = arith.constant dense<0.000000e+00> : vector<32x32xf32>
    %151 = tpu.matmul %149, %150, %cst_73 {dimension_numbers = #tpu.dot_dimension_numbers<[1], [0], [0], [1], [0, 0, 1, 1], [], []>} : vector<32x160xbf16>, vector<160x32xbf16>, vector<32x32xf32> -> vector<32x32xf32>
    %c0_74 = arith.constant 0 : index
    %c0_75 = arith.constant 0 : index
    %152 = vector.load %arg5[%c0_74, %c0_75] : memref<1x32xf32, #tpu.memory_space<vmem>>, vector<1x32xf32>
    %153 = vector.broadcast %152 : vector<1x32xf32> to vector<32x32xf32>
    %154 = arith.mulf %151, %153 : vector<32x32xf32>
    %c0_76 = arith.constant 0 : index
    %c0_77 = arith.constant 0 : index
    %155 = vector.load %arg6[%c0_76, %c0_77] : memref<1x32xf32, #tpu.memory_space<vmem>>, vector<1x32xf32>
    %156 = vector.broadcast %155 : vector<1x32xf32> to vector<32x32xf32>
    %157 = arith.addf %154, %156 : vector<32x32xf32>
    %cst_78 = arith.constant 0.000000e+00 : f32
    %158 = vector.broadcast %cst_78 : f32 to vector<32x32xf32>
    %159 = arith.maximumf %157, %158 : vector<32x32xf32>
    %c2_79 = arith.constant 2 : index
    %c0_80 = arith.constant 0 : index
    %160 = vector.load %arg23[%c2_79, %c0_80] : memref<36x32xf32, #tpu.memory_space<vmem>>, vector<32x32xf32>
    tpu.vector_store %arg23[%c2_79, %c0_80], %159 {strides = array<i32>} : memref<36x32xf32, #tpu.memory_space<vmem>>, vector<32x32xf32>,
    %c0_81 = arith.constant 0 : index
    %c0_82 = arith.constant 0 : index
    %161 = vector.load %arg23[%c0_81, %c0_82] : memref<36x32xf32, #tpu.memory_space<vmem>>, vector<32x32xf32>
    %c-2_i32_83 = arith.constant -2 : i32
    %162 = vector.broadcast %c-2_i32_83 : i32 to vector<32x1xi32>
    %163 = arith.addi %16, %162 : vector<32x1xi32>
    %c0_i32_84 = arith.constant 0 : i32
    %164 = vector.broadcast %c0_i32_84 : i32 to vector<32x1xi32>
    %165 = arith.cmpi sge, %163, %164 : vector<32x1xi32>
    %c-2_i32_85 = arith.constant -2 : i32
    %166 = vector.broadcast %c-2_i32_85 : i32 to vector<32x1xi32>
    %167 = arith.addi %16, %166 : vector<32x1xi32>
    %c16_i32_86 = arith.constant 16 : i32
    %168 = vector.broadcast %c16_i32_86 : i32 to vector<32x1xi32>
    %169 = arith.cmpi slt, %167, %168 : vector<32x1xi32>
    %170 = arith.andi %165, %169 : vector<32x1xi1>
    %cst_87 = arith.constant 0.000000e+00 : f32
    %171 = vector.shape_cast %170 : vector<32x1xi1> to vector<32x1xi1>
    %172 = vector.broadcast %171 : vector<32x1xi1> to vector<32x32xi1>
    %173 = vector.broadcast %cst_87 : f32 to vector<32x32xf32>
    %174 = arith.select %172, %161, %173 : vector<32x32xi1>, vector<32x32xf32>
    %c1_88 = arith.constant 1 : index
    %c0_89 = arith.constant 0 : index
    %175 = vector.load %arg23[%c1_88, %c0_89] : memref<36x32xf32, #tpu.memory_space<vmem>>, vector<32x32xf32>
    %c-1_i32_90 = arith.constant -1 : i32
    %176 = vector.broadcast %c-1_i32_90 : i32 to vector<32x1xi32>
    %177 = arith.addi %16, %176 : vector<32x1xi32>
    %c0_i32_91 = arith.constant 0 : i32
    %178 = vector.broadcast %c0_i32_91 : i32 to vector<32x1xi32>
    %179 = arith.cmpi sge, %177, %178 : vector<32x1xi32>
    %c-1_i32_92 = arith.constant -1 : i32
    %180 = vector.broadcast %c-1_i32_92 : i32 to vector<32x1xi32>
    %181 = arith.addi %16, %180 : vector<32x1xi32>
    %c16_i32_93 = arith.constant 16 : i32
    %182 = vector.broadcast %c16_i32_93 : i32 to vector<32x1xi32>
    %183 = arith.cmpi slt, %181, %182 : vector<32x1xi32>
    %184 = arith.andi %179, %183 : vector<32x1xi1>
    %cst_94 = arith.constant 0.000000e+00 : f32
    %185 = vector.shape_cast %184 : vector<32x1xi1> to vector<32x1xi1>
    %186 = vector.broadcast %185 : vector<32x1xi1> to vector<32x32xi1>
    %187 = vector.broadcast %cst_94 : f32 to vector<32x32xf32>
    %188 = arith.select %186, %175, %187 : vector<32x32xi1>, vector<32x32xf32>
    %c2_95 = arith.constant 2 : index
    %c0_96 = arith.constant 0 : index
    %189 = vector.load %arg23[%c2_95, %c0_96] : memref<36x32xf32, #tpu.memory_space<vmem>>, vector<32x32xf32>
    %c3_97 = arith.constant 3 : index
    %c0_98 = arith.constant 0 : index
    %190 = vector.load %arg23[%c3_97, %c0_98] : memref<36x32xf32, #tpu.memory_space<vmem>>, vector<32x32xf32>
    %c1_i32_99 = arith.constant 1 : i32
    %191 = vector.broadcast %c1_i32_99 : i32 to vector<32x1xi32>
    %192 = arith.addi %16, %191 : vector<32x1xi32>
    %c0_i32_100 = arith.constant 0 : i32
    %193 = vector.broadcast %c0_i32_100 : i32 to vector<32x1xi32>
    %194 = arith.cmpi sge, %192, %193 : vector<32x1xi32>
    %c1_i32_101 = arith.constant 1 : i32
    %195 = vector.broadcast %c1_i32_101 : i32 to vector<32x1xi32>
    %196 = arith.addi %16, %195 : vector<32x1xi32>
    %c16_i32_102 = arith.constant 16 : i32
    %197 = vector.broadcast %c16_i32_102 : i32 to vector<32x1xi32>
    %198 = arith.cmpi slt, %196, %197 : vector<32x1xi32>
    %199 = arith.andi %194, %198 : vector<32x1xi1>
    %cst_103 = arith.constant 0.000000e+00 : f32
    %200 = vector.shape_cast %199 : vector<32x1xi1> to vector<32x1xi1>
    %201 = vector.broadcast %200 : vector<32x1xi1> to vector<32x32xi1>
    %202 = vector.broadcast %cst_103 : f32 to vector<32x32xf32>
    %203 = arith.select %201, %190, %202 : vector<32x32xi1>, vector<32x32xf32>
    %c4_104 = arith.constant 4 : index
    %c0_105 = arith.constant 0 : index
    %204 = vector.load %arg23[%c4_104, %c0_105] : memref<36x32xf32, #tpu.memory_space<vmem>>, vector<32x32xf32>
    %c2_i32_106 = arith.constant 2 : i32
    %205 = vector.broadcast %c2_i32_106 : i32 to vector<32x1xi32>
    %206 = arith.addi %16, %205 : vector<32x1xi32>
    %c0_i32_107 = arith.constant 0 : i32
    %207 = vector.broadcast %c0_i32_107 : i32 to vector<32x1xi32>
    %208 = arith.cmpi sge, %206, %207 : vector<32x1xi32>
    %c2_i32_108 = arith.constant 2 : i32
    %209 = vector.broadcast %c2_i32_108 : i32 to vector<32x1xi32>
    %210 = arith.addi %16, %209 : vector<32x1xi32>
    %c16_i32_109 = arith.constant 16 : i32
    %211 = vector.broadcast %c16_i32_109 : i32 to vector<32x1xi32>
    %212 = arith.cmpi slt, %210, %211 : vector<32x1xi32>
    %213 = arith.andi %208, %212 : vector<32x1xi1>
    %cst_110 = arith.constant 0.000000e+00 : f32
    %214 = vector.shape_cast %213 : vector<32x1xi1> to vector<32x1xi1>
    %215 = vector.broadcast %214 : vector<32x1xi1> to vector<32x32xi1>
    %216 = vector.broadcast %cst_110 : f32 to vector<32x32xf32>
    %217 = arith.select %215, %204, %216 : vector<32x32xi1>, vector<32x32xf32>
    %218 = tpu.concatenate %174, %188, %189, %203, %217 in 1 : vector<32x32xf32>, vector<32x32xf32>, vector<32x32xf32>, vector<32x32xf32>, vector<32x32xf32> -> vector<32x160xf32>
    %219 = arith.truncf %218 : vector<32x160xf32> to vector<32x160xbf16>
    %c0_111 = arith.constant 0 : index
    %c0_112 = arith.constant 0 : index
    %220 = vector.load %arg7[%c0_111, %c0_112] : memref<160x32xbf16, #tpu.memory_space<vmem>>, vector<160x32xbf16>
    %cst_113 = arith.constant dense<0.000000e+00> : vector<32x32xf32>
    %221 = tpu.matmul %219, %220, %cst_113 {dimension_numbers = #tpu.dot_dimension_numbers<[1], [0], [0], [1], [0, 0, 1, 1], [], []>} : vector<32x160xbf16>, vector<160x32xbf16>, vector<32x32xf32> -> vector<32x32xf32>
    %c0_114 = arith.constant 0 : index
    %c0_115 = arith.constant 0 : index
    %222 = vector.load %arg8[%c0_114, %c0_115] : memref<1x32xf32, #tpu.memory_space<vmem>>, vector<1x32xf32>
    %223 = vector.broadcast %222 : vector<1x32xf32> to vector<32x32xf32>
    %224 = arith.mulf %221, %223 : vector<32x32xf32>
    %c0_116 = arith.constant 0 : index
    %c0_117 = arith.constant 0 : index
    %225 = vector.load %arg9[%c0_116, %c0_117] : memref<1x32xf32, #tpu.memory_space<vmem>>, vector<1x32xf32>
    %226 = vector.broadcast %225 : vector<1x32xf32> to vector<32x32xf32>
    %227 = arith.addf %224, %226 : vector<32x32xf32>
    %cst_118 = arith.constant 0.000000e+00 : f32
    %228 = vector.broadcast %cst_118 : f32 to vector<32x32xf32>
    %229 = arith.maximumf %227, %228 : vector<32x32xf32>
    %230 = tpu.transpose %229, [1, 0] : vector<32x32xf32> -> vector<32x32xf32>
    %231 = vector.extract_strided_slice %230 {offsets = [0, 0], sizes = [1, 16], strides = [1, 1]} : vector<32x32xf32> to vector<1x16xf32>
    %232 = vector.extract_strided_slice %230 {offsets = [1, 0], sizes = [1, 16], strides = [1, 1]} : vector<32x32xf32> to vector<1x16xf32>
    %233 = vector.extract_strided_slice %230 {offsets = [2, 0], sizes = [1, 16], strides = [1, 1]} : vector<32x32xf32> to vector<1x16xf32>
    %234 = vector.extract_strided_slice %230 {offsets = [3, 0], sizes = [1, 16], strides = [1, 1]} : vector<32x32xf32> to vector<1x16xf32>
    %235 = vector.extract_strided_slice %230 {offsets = [4, 0], sizes = [1, 16], strides = [1, 1]} : vector<32x32xf32> to vector<1x16xf32>
    %236 = vector.extract_strided_slice %230 {offsets = [5, 0], sizes = [1, 16], strides = [1, 1]} : vector<32x32xf32> to vector<1x16xf32>
    %237 = vector.extract_strided_slice %230 {offsets = [6, 0], sizes = [1, 16], strides = [1, 1]} : vector<32x32xf32> to vector<1x16xf32>
    %238 = vector.extract_strided_slice %230 {offsets = [7, 0], sizes = [1, 16], strides = [1, 1]} : vector<32x32xf32> to vector<1x16xf32>
    %239 = vector.extract_strided_slice %230 {offsets = [8, 0], sizes = [1, 16], strides = [1, 1]} : vector<32x32xf32> to vector<1x16xf32>
    %240 = vector.extract_strided_slice %230 {offsets = [9, 0], sizes = [1, 16], strides = [1, 1]} : vector<32x32xf32> to vector<1x16xf32>
    %241 = vector.extract_strided_slice %230 {offsets = [10, 0], sizes = [1, 16], strides = [1, 1]} : vector<32x32xf32> to vector<1x16xf32>
    %242 = vector.extract_strided_slice %230 {offsets = [11, 0], sizes = [1, 16], strides = [1, 1]} : vector<32x32xf32> to vector<1x16xf32>
    %243 = vector.extract_strided_slice %230 {offsets = [12, 0], sizes = [1, 16], strides = [1, 1]} : vector<32x32xf32> to vector<1x16xf32>
    %244 = vector.extract_strided_slice %230 {offsets = [13, 0], sizes = [1, 16], strides = [1, 1]} : vector<32x32xf32> to vector<1x16xf32>
    %245 = vector.extract_strided_slice %230 {offsets = [14, 0], sizes = [1, 16], strides = [1, 1]} : vector<32x32xf32> to vector<1x16xf32>
    %246 = vector.extract_strided_slice %230 {offsets = [15, 0], sizes = [1, 16], strides = [1, 1]} : vector<32x32xf32> to vector<1x16xf32>
    %247 = vector.extract_strided_slice %230 {offsets = [16, 0], sizes = [1, 16], strides = [1, 1]} : vector<32x32xf32> to vector<1x16xf32>
    %248 = vector.extract_strided_slice %230 {offsets = [17, 0], sizes = [1, 16], strides = [1, 1]} : vector<32x32xf32> to vector<1x16xf32>
    %249 = vector.extract_strided_slice %230 {offsets = [18, 0], sizes = [1, 16], strides = [1, 1]} : vector<32x32xf32> to vector<1x16xf32>
    %250 = vector.extract_strided_slice %230 {offsets = [19, 0], sizes = [1, 16], strides = [1, 1]} : vector<32x32xf32> to vector<1x16xf32>
    %251 = vector.extract_strided_slice %230 {offsets = [20, 0], sizes = [1, 16], strides = [1, 1]} : vector<32x32xf32> to vector<1x16xf32>
    %252 = vector.extract_strided_slice %230 {offsets = [21, 0], sizes = [1, 16], strides = [1, 1]} : vector<32x32xf32> to vector<1x16xf32>
    %253 = vector.extract_strided_slice %230 {offsets = [22, 0], sizes = [1, 16], strides = [1, 1]} : vector<32x32xf32> to vector<1x16xf32>
    %254 = vector.extract_strided_slice %230 {offsets = [23, 0], sizes = [1, 16], strides = [1, 1]} : vector<32x32xf32> to vector<1x16xf32>
    %255 = vector.extract_strided_slice %230 {offsets = [24, 0], sizes = [1, 16], strides = [1, 1]} : vector<32x32xf32> to vector<1x16xf32>
    %256 = vector.extract_strided_slice %230 {offsets = [25, 0], sizes = [1, 16], strides = [1, 1]} : vector<32x32xf32> to vector<1x16xf32>
    %257 = vector.extract_strided_slice %230 {offsets = [26, 0], sizes = [1, 16], strides = [1, 1]} : vector<32x32xf32> to vector<1x16xf32>
    %258 = vector.extract_strided_slice %230 {offsets = [27, 0], sizes = [1, 16], strides = [1, 1]} : vector<32x32xf32> to vector<1x16xf32>
    %259 = vector.extract_strided_slice %230 {offsets = [28, 0], sizes = [1, 16], strides = [1, 1]} : vector<32x32xf32> to vector<1x16xf32>
    %260 = vector.extract_strided_slice %230 {offsets = [29, 0], sizes = [1, 16], strides = [1, 1]} : vector<32x32xf32> to vector<1x16xf32>
    %261 = vector.extract_strided_slice %230 {offsets = [30, 0], sizes = [1, 16], strides = [1, 1]} : vector<32x32xf32> to vector<1x16xf32>
    %262 = vector.extract_strided_slice %230 {offsets = [31, 0], sizes = [1, 16], strides = [1, 1]} : vector<32x32xf32> to vector<1x16xf32>
    %263 = tpu.concatenate %231, %232, %233, %234, %235, %236, %237, %238, %239, %240, %241, %242, %243, %244, %245, %246 in 1 : vector<1x16xf32>, vector<1x16xf32>, vector<1x16xf32>, vector<1x16xf32>, vector<1x16xf32>, vector<1x16xf32>, vector<1x16xf32>, vector<1x16xf32>, vector<1x16xf32>, vector<1x16xf32>, vector<1x16xf32>, vector<1x16xf32>, vector<1x16xf32>, vector<1x16xf32>, vector<1x16xf32>, vector<1x16xf32> -> vector<1x256xf32>
    %264 = tpu.concatenate %247, %248, %249, %250, %251, %252, %253, %254, %255, %256, %257, %258, %259, %260, %261, %262 in 1 : vector<1x16xf32>, vector<1x16xf32>, vector<1x16xf32>, vector<1x16xf32>, vector<1x16xf32>, vector<1x16xf32>, vector<1x16xf32>, vector<1x16xf32>, vector<1x16xf32>, vector<1x16xf32>, vector<1x16xf32>, vector<1x16xf32>, vector<1x16xf32>, vector<1x16xf32>, vector<1x16xf32>, vector<1x16xf32> -> vector<1x256xf32>
    %265 = tpu.concatenate %263, %264 in 1 : vector<1x256xf32>, vector<1x256xf32> -> vector<1x512xf32>
    %266 = vector.extract_strided_slice %230 {offsets = [0, 16], sizes = [1, 16], strides = [1, 1]} : vector<32x32xf32> to vector<1x16xf32>
    %267 = vector.extract_strided_slice %230 {offsets = [1, 16], sizes = [1, 16], strides = [1, 1]} : vector<32x32xf32> to vector<1x16xf32>
    %268 = vector.extract_strided_slice %230 {offsets = [2, 16], sizes = [1, 16], strides = [1, 1]} : vector<32x32xf32> to vector<1x16xf32>
    %269 = vector.extract_strided_slice %230 {offsets = [3, 16], sizes = [1, 16], strides = [1, 1]} : vector<32x32xf32> to vector<1x16xf32>
    %270 = vector.extract_strided_slice %230 {offsets = [4, 16], sizes = [1, 16], strides = [1, 1]} : vector<32x32xf32> to vector<1x16xf32>
    %271 = vector.extract_strided_slice %230 {offsets = [5, 16], sizes = [1, 16], strides = [1, 1]} : vector<32x32xf32> to vector<1x16xf32>
    %272 = vector.extract_strided_slice %230 {offsets = [6, 16], sizes = [1, 16], strides = [1, 1]} : vector<32x32xf32> to vector<1x16xf32>
    %273 = vector.extract_strided_slice %230 {offsets = [7, 16], sizes = [1, 16], strides = [1, 1]} : vector<32x32xf32> to vector<1x16xf32>
    %274 = vector.extract_strided_slice %230 {offsets = [8, 16], sizes = [1, 16], strides = [1, 1]} : vector<32x32xf32> to vector<1x16xf32>
    %275 = vector.extract_strided_slice %230 {offsets = [9, 16], sizes = [1, 16], strides = [1, 1]} : vector<32x32xf32> to vector<1x16xf32>
    %276 = vector.extract_strided_slice %230 {offsets = [10, 16], sizes = [1, 16], strides = [1, 1]} : vector<32x32xf32> to vector<1x16xf32>
    %277 = vector.extract_strided_slice %230 {offsets = [11, 16], sizes = [1, 16], strides = [1, 1]} : vector<32x32xf32> to vector<1x16xf32>
    %278 = vector.extract_strided_slice %230 {offsets = [12, 16], sizes = [1, 16], strides = [1, 1]} : vector<32x32xf32> to vector<1x16xf32>
    %279 = vector.extract_strided_slice %230 {offsets = [13, 16], sizes = [1, 16], strides = [1, 1]} : vector<32x32xf32> to vector<1x16xf32>
    %280 = vector.extract_strided_slice %230 {offsets = [14, 16], sizes = [1, 16], strides = [1, 1]} : vector<32x32xf32> to vector<1x16xf32>
    %281 = vector.extract_strided_slice %230 {offsets = [15, 16], sizes = [1, 16], strides = [1, 1]} : vector<32x32xf32> to vector<1x16xf32>
    %282 = vector.extract_strided_slice %230 {offsets = [16, 16], sizes = [1, 16], strides = [1, 1]} : vector<32x32xf32> to vector<1x16xf32>
    %283 = vector.extract_strided_slice %230 {offsets = [17, 16], sizes = [1, 16], strides = [1, 1]} : vector<32x32xf32> to vector<1x16xf32>
    %284 = vector.extract_strided_slice %230 {offsets = [18, 16], sizes = [1, 16], strides = [1, 1]} : vector<32x32xf32> to vector<1x16xf32>
    %285 = vector.extract_strided_slice %230 {offsets = [19, 16], sizes = [1, 16], strides = [1, 1]} : vector<32x32xf32> to vector<1x16xf32>
    %286 = vector.extract_strided_slice %230 {offsets = [20, 16], sizes = [1, 16], strides = [1, 1]} : vector<32x32xf32> to vector<1x16xf32>
    %287 = vector.extract_strided_slice %230 {offsets = [21, 16], sizes = [1, 16], strides = [1, 1]} : vector<32x32xf32> to vector<1x16xf32>
    %288 = vector.extract_strided_slice %230 {offsets = [22, 16], sizes = [1, 16], strides = [1, 1]} : vector<32x32xf32> to vector<1x16xf32>
    %289 = vector.extract_strided_slice %230 {offsets = [23, 16], sizes = [1, 16], strides = [1, 1]} : vector<32x32xf32> to vector<1x16xf32>
    %290 = vector.extract_strided_slice %230 {offsets = [24, 16], sizes = [1, 16], strides = [1, 1]} : vector<32x32xf32> to vector<1x16xf32>
    %291 = vector.extract_strided_slice %230 {offsets = [25, 16], sizes = [1, 16], strides = [1, 1]} : vector<32x32xf32> to vector<1x16xf32>
    %292 = vector.extract_strided_slice %230 {offsets = [26, 16], sizes = [1, 16], strides = [1, 1]} : vector<32x32xf32> to vector<1x16xf32>
    %293 = vector.extract_strided_slice %230 {offsets = [27, 16], sizes = [1, 16], strides = [1, 1]} : vector<32x32xf32> to vector<1x16xf32>
    %294 = vector.extract_strided_slice %230 {offsets = [28, 16], sizes = [1, 16], strides = [1, 1]} : vector<32x32xf32> to vector<1x16xf32>
    %295 = vector.extract_strided_slice %230 {offsets = [29, 16], sizes = [1, 16], strides = [1, 1]} : vector<32x32xf32> to vector<1x16xf32>
    %296 = vector.extract_strided_slice %230 {offsets = [30, 16], sizes = [1, 16], strides = [1, 1]} : vector<32x32xf32> to vector<1x16xf32>
    %297 = vector.extract_strided_slice %230 {offsets = [31, 16], sizes = [1, 16], strides = [1, 1]} : vector<32x32xf32> to vector<1x16xf32>
    %298 = tpu.concatenate %266, %267, %268, %269, %270, %271, %272, %273, %274, %275, %276, %277, %278, %279, %280, %281 in 1 : vector<1x16xf32>, vector<1x16xf32>, vector<1x16xf32>, vector<1x16xf32>, vector<1x16xf32>, vector<1x16xf32>, vector<1x16xf32>, vector<1x16xf32>, vector<1x16xf32>, vector<1x16xf32>, vector<1x16xf32>, vector<1x16xf32>, vector<1x16xf32>, vector<1x16xf32>, vector<1x16xf32>, vector<1x16xf32> -> vector<1x256xf32>
    %299 = tpu.concatenate %282, %283, %284, %285, %286, %287, %288, %289, %290, %291, %292, %293, %294, %295, %296, %297 in 1 : vector<1x16xf32>, vector<1x16xf32>, vector<1x16xf32>, vector<1x16xf32>, vector<1x16xf32>, vector<1x16xf32>, vector<1x16xf32>, vector<1x16xf32>, vector<1x16xf32>, vector<1x16xf32>, vector<1x16xf32>, vector<1x16xf32>, vector<1x16xf32>, vector<1x16xf32>, vector<1x16xf32>, vector<1x16xf32> -> vector<1x256xf32>
    %300 = tpu.concatenate %298, %299 in 1 : vector<1x256xf32>, vector<1x256xf32> -> vector<1x512xf32>
    %301 = tpu.concatenate %265, %300 in 0 : vector<1x512xf32>, vector<1x512xf32> -> vector<2x512xf32>
    %c0_119 = arith.constant 0 : index
    %c0_120 = arith.constant 0 : index
    %302 = vector.load %arg22[%c0_119, %c0_120] : memref<2x512xf32, #tpu.memory_space<vmem>>, vector<2x512xf32>
    tpu.vector_store %arg22[%c0_119, %c0_120], %301 {strides = array<i32>} : memref<2x512xf32, #tpu.memory_space<vmem>>, vector<2x512xf32>,
    %303 = arith.truncf %301 : vector<2x512xf32> to vector<2x512xbf16>
    %c0_121 = arith.constant 0 : index
    %c0_122 = arith.constant 0 : index
    %304 = vector.load %arg10[%c0_121, %c0_122] : memref<512x64xbf16, #tpu.memory_space<vmem>>, vector<512x64xbf16>
    %cst_123 = arith.constant dense<0.000000e+00> : vector<2x64xf32>
    %305 = tpu.matmul %303, %304, %cst_123 {dimension_numbers = #tpu.dot_dimension_numbers<[1], [0], [0], [1], [0, 0, 1, 1], [], []>} : vector<2x512xbf16>, vector<512x64xbf16>, vector<2x64xf32> -> vector<2x64xf32>
    %c0_124 = arith.constant 0 : index
    %c0_125 = arith.constant 0 : index
    %306 = vector.load %arg11[%c0_124, %c0_125] : memref<1x64xf32, #tpu.memory_space<vmem>>, vector<1x64xf32>
    %307 = vector.broadcast %306 : vector<1x64xf32> to vector<2x64xf32>
    %308 = arith.addf %305, %307 : vector<2x64xf32>
    %c0_126 = arith.constant 0 : index
    %c0_127 = arith.constant 0 : index
    %309 = vector.load %arg21[%c0_126, %c0_127] : memref<2x64xf32, #tpu.memory_space<vmem>>, vector<2x64xf32>
    tpu.vector_store %arg21[%c0_126, %c0_127], %308 {strides = array<i32>} : memref<2x64xf32, #tpu.memory_space<vmem>>, vector<2x64xf32>,
    %c0_128 = arith.constant 0 : index
    %c0_129 = arith.constant 0 : index
    %310 = vector.load %arg12[%c0_128, %c0_129] : memref<512x512xbf16, #tpu.memory_space<vmem>>, vector<512x512xbf16>
    %cst_130 = arith.constant dense<0.000000e+00> : vector<2x512xf32>
    %311 = tpu.matmul %303, %310, %cst_130 {dimension_numbers = #tpu.dot_dimension_numbers<[1], [0], [0], [1], [0, 0, 1, 1], [], []>} : vector<2x512xbf16>, vector<512x512xbf16>, vector<2x512xf32> -> vector<2x512xf32>
    %c0_131 = arith.constant 0 : index
    %c0_132 = arith.constant 0 : index
    %312 = vector.load %arg13[%c0_131, %c0_132] : memref<1x512xf32, #tpu.memory_space<vmem>>, vector<1x512xf32>
    %313 = vector.broadcast %312 : vector<1x512xf32> to vector<2x512xf32>
    %314 = arith.mulf %311, %313 : vector<2x512xf32>
    %c0_133 = arith.constant 0 : index
    %c0_134 = arith.constant 0 : index
    %315 = vector.load %arg14[%c0_133, %c0_134] : memref<1x512xf32, #tpu.memory_space<vmem>>, vector<1x512xf32>
    %316 = vector.broadcast %315 : vector<1x512xf32> to vector<2x512xf32>
    %317 = arith.addf %314, %316 : vector<2x512xf32>
    %cst_135 = arith.constant 0.000000e+00 : f32
    %318 = vector.broadcast %cst_135 : f32 to vector<2x512xf32>
    %319 = arith.maximumf %317, %318 : vector<2x512xf32>
    %320 = arith.truncf %319 : vector<2x512xf32> to vector<2x512xbf16>
    %321 = vector.extract_strided_slice %320 {offsets = [0, 0], sizes = [2, 256], strides = [1, 1]} : vector<2x512xbf16> to vector<2x256xbf16>
    %c0_136 = arith.constant 0 : index
    %c0_137 = arith.constant 0 : index
    %322 = vector.load %arg15[%c0_136, %c0_137] : memref<256x8xbf16, #tpu.memory_space<vmem>>, vector<256x8xbf16>
    %cst_138 = arith.constant dense<0.000000e+00> : vector<2x8xf32>
    %323 = tpu.matmul %321, %322, %cst_138 {dimension_numbers = #tpu.dot_dimension_numbers<[1], [0], [0], [1], [0, 0, 1, 1], [], []>} : vector<2x256xbf16>, vector<256x8xbf16>, vector<2x8xf32> -> vector<2x8xf32>
    %c0_139 = arith.constant 0 : index
    %c0_140 = arith.constant 0 : index
    %324 = vector.load %arg16[%c0_139, %c0_140] : memref<1x8xf32, #tpu.memory_space<vmem>>, vector<1x8xf32>
    %325 = vector.broadcast %324 : vector<1x8xf32> to vector<2x8xf32>
    %326 = arith.addf %323, %325 : vector<2x8xf32>
    %c0_141 = arith.constant 0 : index
    %c0_142 = arith.constant 0 : index
    %327 = vector.load %arg19[%c0_141, %c0_142] : memref<2x8xf32, #tpu.memory_space<vmem>>, vector<2x8xf32>
    tpu.vector_store %arg19[%c0_141, %c0_142], %326 {strides = array<i32>} : memref<2x8xf32, #tpu.memory_space<vmem>>, vector<2x8xf32>,
    %328 = vector.extract_strided_slice %320 {offsets = [0, 256], sizes = [2, 256], strides = [1, 1]} : vector<2x512xbf16> to vector<2x256xbf16>
    %c0_143 = arith.constant 0 : index
    %c0_144 = arith.constant 0 : index
    %329 = vector.load %arg17[%c0_143, %c0_144] : memref<256x2xbf16, #tpu.memory_space<vmem>>, vector<256x2xbf16>
    %cst_145 = arith.constant dense<0.000000e+00> : vector<2x2xf32>
    %330 = tpu.matmul %328, %329, %cst_145 {dimension_numbers = #tpu.dot_dimension_numbers<[1], [0], [0], [1], [0, 0, 1, 1], [], []>} : vector<2x256xbf16>, vector<256x2xbf16>, vector<2x2xf32> -> vector<2x2xf32>
    %c0_146 = arith.constant 0 : index
    %c0_147 = arith.constant 0 : index
    %331 = vector.load %arg18[%c0_146, %c0_147] : memref<1x2xf32, #tpu.memory_space<vmem>>, vector<1x2xf32>
    %332 = vector.broadcast %331 : vector<1x2xf32> to vector<2x2xf32>
    %333 = arith.addf %330, %332 : vector<2x2xf32>
    %c0_148 = arith.constant 0 : index
    %c0_149 = arith.constant 0 : index
    %334 = vector.load %arg20[%c0_148, %c0_149] : memref<2x2xf32, #tpu.memory_space<vmem>>, vector<2x2xf32>
    tpu.vector_store %arg20[%c0_148, %c0_149], %333 {strides = array<i32>} : memref<2x2xf32, #tpu.memory_space<vmem>>, vector<2x2xf32>,
    return
  }
}

</mosaic_0001>

<bundles_post_ra>
// kernel: tempcnn_wp_forward.1
= control target key start
LH: loop header
LB: loop body
LE: loop exit
PB: predicated region body
PF: predicated region fallthrough
CT: control target
= control target key end

     0   :  { %s5934_s0 = inlined_call_operand.vmem [shape: f32[32,4], index: 0, kind: input, shape index: {}]   ;;  %s5935_s1 = inlined_call_operand.vmem [shape: bf16[20,32], index: 1, kind: input, shape index: {}]   ;;  %s5936_s2 = inlined_call_operand.vmem [shape: f32[1,32], index: 2, kind: input, shape index: {}]   ;;  %s5937_s3 = inlined_call_operand.vmem [shape: f32[1,32], index: 3, kind: input, shape index: {}]   ;;  %s5938_s4 = inlined_call_operand.vmem [shape: bf16[160,32], index: 4, kind: input, shape index: {}]   ;;  %s5939_s5 = inlined_call_operand.vmem [shape: f32[1,32], index: 5, kind: input, shape index: {}]   ;;  %s5940_s6 = inlined_call_operand.vmem [shape: f32[1,32], index: 6, kind: input, shape index: {}]   ;;  %s5941_s7 = inlined_call_operand.vmem [shape: bf16[160,32], index: 7, kind: input, shape index: {}]   ;;  %s5942_s8 = inlined_call_operand.vmem [shape: f32[1,32], index: 8, kind: input, shape index: {}]   ;;  %s5943_s9 = inlined_call_operand.vmem [shape: f32[1,32], index: 9, kind: input, shape index: {}]   ;;  %s5944_s10 = inlined_call_operand.vmem [shape: bf16[512,64], index: 10, kind: input, shape index: {}]   ;;  %s5945_s11 = inlined_call_operand.vmem [shape: f32[1,64], index: 11, kind: input, shape index: {}]   ;;  %s5946_s12 = inlined_call_operand.vmem [shape: bf16[512,512], index: 12, kind: input, shape index: {}]   ;;  %s5947_s13 = inlined_call_operand.vmem [shape: f32[1,512], index: 13, kind: input, shape index: {}]   ;;  %s5948_s14 = inlined_call_operand.vmem [shape: f32[1,512], index: 14, kind: input, shape index: {}]   ;;  %s5949_s15 = inlined_call_operand.vmem [shape: bf16[256,8], index: 15, kind: input, shape index: {}]   ;;  %s5950_s16 = inlined_call_operand.vmem [shape: f32[1,8], index: 16, kind: input, shape index: {}]   ;;  %s5951_s17 = inlined_call_operand.vmem [shape: bf16[256,2], index: 17, kind: input, shape index: {}]   ;;  %s5952_s18 = inlined_call_operand.vmem [shape: f32[1,2], index: 18, kind: input, shape index: {}]   ;;  %s5953_s19 = inlined_call_operand.hbm [shape: f32[2,8], index: 19, kind: output, shape index: {0}]   ;;  %s5954_s20 = inlined_call_operand.hbm [shape: f32[2,2], index: 20, kind: output, shape index: {1}]   ;;  %s5955_s21 = inlined_call_operand.vmem [shape: f32[2,64], index: 21, kind: output, shape index: {2}]   ;;  %s5956_s22 = inlined_call_operand.hbm [shape: f32[2,512], index: 22, kind: output, shape index: {3}]  }
   0x1   :  { %5960 = sst [smem:[#allocation10_spill]] %s5934_s0 }
   0x2   :  { %5961 = sst [smem:[#allocation11_spill]] %s5935_s1 }
   0x3   :  { %5962 = sst [smem:[#allocation12_spill]] %s5936_s2 }
   0x4   :  { %5963 = sst [smem:[#allocation13_spill]] %s5937_s3 }
   0x5   :  { %5964 = sst [smem:[#allocation14_spill]] %s5938_s4 }
   0x6   :  { %5965 = sst [smem:[#allocation15_spill]] %s5939_s5 }
   0x7   :  { %5966 = sst [smem:[#allocation16_spill]] %s5940_s6 }
   0x8   :  { %28 = vsyncpa [#allocation4], 0  ;;  %vm122_vm0 = vcmask 261120   ;;  %v4226_v0 = vmov 0.0   ;;  %vm127_vm1 = vcmask 257024   ;;  %v69_v1 = vlaneseq  ;;  %s5967_s29 = sld [smem:[#allocation10_spill]] }
   0x9   :  { %123 = vst.msk [vmem:[#allocation2] sm:$0xff] %vm122_vm0, %v4226_v0  ;;  %vm133_vm2 = vcmask 31744  }
   0xa   :  { %124 = vst.msk [vmem:[#allocation2 + $0x8] sm:$0xff] %vm122_vm0, %v4226_v0  ;;  %v4364_v4 = vshrl.u32 %v69_v1, 7 }
   0xb   :  { %125 = vst.msk [vmem:[#allocation2 + $0x10] sm:$0xff] %vm122_vm0, %v4226_v0 }
   0xc   :  { %128 = vst.msk [vmem:[#allocation2 + $0x20] sm:$0xf] %vm127_vm1, %v4226_v0  ;;  %v71_v5 = vadd.s32 8, %v4364_v4  ;;  %v4372_v7 = vadd.s32 16, %v4364_v4  ;;  %v78_v9 = vand.u32 15, %v4364_v4  ;;  %v73_v14 = vadd.s32 24, %v4364_v4 }
   0xd   :  { %126 = vst.msk [vmem:[#allocation2 + $0x18] sm:$0xff] %vm122_vm0, %v4226_v0 }
   0xe   :  { %v129_v2 = vld [vmem:[%s5967_s29] sm:$0xff]  ;;  %v130_v3 = vld [vmem:[%s5967_s29 + $0x8] sm:$0xff]  ;;  %v131_v6 = vld [vmem:[%s5967_s29 + $0x10] sm:$0xff]  ;;  %v85_v10 = vand.u32 15, %v71_v5  ;;  %v92_v12 = vand.u32 15, %v4372_v7  ;;  %v4387_v13 = vadd.s32 4294967295, %v78_v9 }
   0xf   :  { %134 = vst.msk [vmem:[#allocation2 + $0x2] sm:$0xff] %vm133_vm2, %v129_v2  ;;  %v132_v8 = vld [vmem:[%s5967_s29 + $0x18] sm:$0xff] }
  0x10   :  { %135 = vst.msk [vmem:[#allocation2 + $0xa] sm:$0xff] %vm133_vm2, %v130_v3  ;;  %v4381_v11 = vadd.s32 1, %v85_v10  ;;  %v4390_v15 = vadd.s32 2, %v85_v10 }
  0x11   :  { %136 = vst.msk [vmem:[#allocation2 + $0x12] sm:$0xff] %vm133_vm2, %v131_v6 }
  0x12   :  { %137 = vst.msk [vmem:[#allocation2 + $0x1a] sm:$0xff] %vm133_vm2, %v132_v8 }
  0x13   :  { %29 = vsyncpa [#allocation6], 0  ;;  %vm219_vm3 = vcmp.lt.s32.totalorder %v4381_v11, 16  ;;  %v4395_v18 = vadd.s32 4294967295, %v92_v12  ;;  %vm251_vm4 = vcmp.lt.s32.totalorder %v4390_v15, 16  ;;  %vm178_vm5 = vcmp.ge.s32.totalorder %v4387_v13, 0 }
  0x14   :  { %v99_v22 = vand.u32 15, %v73_v14  ;;  %s4227_s24 = smov 8   ;;  %s4228_s6 = smov 12   ;;  %vm374_vm9 = vcmask 1041408   ;;  %v4431_v57 = vadd.s32 4294967294, %v78_v9  ;;  %v4435_v58 = vadd.s32 4294967294, %v92_v12 }
  0x15   :  { %vm180_vm6 = vcmp.ge.s32.totalorder %v4395_v18, 0  ;;  %s4229_s25 = smov 16   ;;  %s4230_s26 = smov 4   ;;  %vm338_vm12 = vcmask 64512   ;;  %vm343_vm13 = vcmask 97280   ;;  %vm348_vm14 = vcmask 130048  }
  0x16   :  { %v202_v16 = vld [vmem:[#allocation2 + $0x2] sm:$0xff]  ;;  %v4407_v33 = vadd.s32 1, %v99_v22  ;;  %v4412_v39 = vadd.s32 2, %v99_v22  ;;  %s5968_s3 = sld [smem:[#allocation11_spill]]  ;;  %vm146_vm10 = vcmp.ge.s32.totalorder %v4431_v57, 0  ;;  %vm148_vm11 = vcmp.ge.s32.totalorder %v4435_v58, 0 }
  0x17   :  { %v203_v17 = vld [vmem:[#allocation2 + $0xa] sm:$0xff]  ;;  %v170_v21 = vld [vmem:[#allocation2 + $0x1] sm:$0xff]  ;;  %vm367_vm15 = vcmask 162816   ;;  %s5969_s0 = sld [smem:[#allocation14_spill]]  ;;  %s4232_s28 = smov 32   ;;  %vm509_vm1 = vcmask 523264  }
  0x18   :  { %v4041_v19 = vpack.i.bf16 %v203_v17, %v202_v16  ;;  %v206_v20 = vld [vmem:[#allocation2 + $0x3] sm:$0xff]  ;;  %v207_v24 = vld [vmem:[#allocation2 + $0xb] sm:$0xff]  ;;  %v198_v30 = vsel %vm178_vm5, %v170_v21, 0.0  ;;  %vm221_vm7 = vcmp.lt.s32.totalorder %v4407_v33, 16  ;;  %vm253_vm8 = vcmp.lt.s32.totalorder %v4412_v39, 16  ;;  %s5971_s27 = sld [smem:[#allocation13_spill]] }
  0x19   :  { %v238_v23 = vld [vmem:[#allocation2 + $0x4] sm:$0xff]  ;;  %v239_v25 = vld [vmem:[#allocation2 + $0xc] sm:$0xff]  ;;  %v235_v26 = vsel %vm219_vm3, %v207_v24, 0.0  ;;  %v173_v35 = vld [vmem:[#allocation2 + $0x19] sm:$0xff]  ;;  %s4233_s29 = smov 96   ;;  %s5973_s23 = sld [smem:[#allocation16_spill]] }
  0x1a   :  { %4042 = vrot.lane.b32.xlu0 %v4041_v19, %s4227_s24  ;;  %v267_v27 = vsel %vm251_vm4, %v239_v25, 0.0  ;;  %v4051_v28 = vpack.i.bf16 %v235_v26, %v206_v20  ;;  %v171_v29 = vld [vmem:[#allocation2 + $0x9] sm:$0xff]  ;;  %v172_v31 = vld [vmem:[#allocation2 + $0x11] sm:$0xff]  ;;  %v205_v38 = vld [vmem:[#allocation2 + $0x1a] sm:$0xff] }
  0x1b   :  { %v4061_v32 = vpack.i.bf16 %v267_v27, %v238_v23  ;;  %v4046_v34 = vpack.i.bf16 %v171_v29, %v198_v30  ;;  %v200_v36 = vsel %vm180_vm6, %v172_v31, 0.0  ;;  %v204_v37 = vld [vmem:[#allocation2 + $0x12] sm:$0xff]  ;;  %v209_v40 = vld [vmem:[#allocation2 + $0x1b] sm:$0xff]  ;;  %v139_v63 = vld [vmem:[#allocation2 + $0x8] sm:$0xff] }
  0x1c   :  { %4052 = vrot.lane.b32.xlu1 %v4051_v28, %s4228_s6  ;;  %v4056_v41 = vpack.i.bf16 %v173_v35, %v200_v36  ;;  %v4066_v42 = vpack.i.bf16 %v205_v38, %v204_v37  ;;  %v208_v43 = vld [vmem:[#allocation2 + $0x13] sm:$0xff]  ;;  %v237_v44 = vsel %vm221_vm7, %v209_v40, 0.0  ;;  %v241_v45 = vld [vmem:[#allocation2 + $0x1c] sm:$0xff]  ;;  %v357_v50 = vld [vmem:[%s5968_s3 + $0x8] sm:$0x3] }
  0x1d   :  { %4062 = vrot.lane.b32.xlu2 %v4061_v32, %s4229_s25  ;;  %v4071_v46 = vpack.i.bf16 %v237_v44, %v208_v43  ;;  %v240_v47 = vld [vmem:[#allocation2 + $0x14] sm:$0xff]  ;;  %v269_v48 = vsel %vm253_vm8, %v241_v45, 0.0  ;;  %v363_v51 = vunpack.c.l.b16 %v357_v50  ;;  %v3812_v54 = vld [vmem:[%s5968_s3] sm:$0xff]  ;;  %s4231_s3 = smov 64  }
  0x1e   :  { %v4076_v49 = vpack.i.bf16 %v269_v48, %v240_v47  ;;  %v138_v60 = vld [vmem:[#allocation2] sm:$0xff]  ;;  %v140_v61 = vld [vmem:[#allocation2 + $0x10] sm:$0xff]  ;;  %v141_v20 = vld [vmem:[#allocation2 + $0x18] sm:$0xff] }
  0x1f   :  { %v365_v52 = vpack.c.b16 %v363_v51, %v363_v51  ;;  %v166_v1 = vsel %vm146_vm10, %v138_v60, 0.0  ;;  %v168_v5 = vsel %vm148_vm11, %v140_v61, 0.0  ;;  %v3822_v47 = vld [vmem:[%s5969_s0 + $0x48] sm:$0xff]  ;;  %v3821_v48 = vld [vmem:[%s5969_s0 + $0x40] sm:$0xff]  ;;  %v3830_v33 = vld [vmem:[%s5941_s7 + $0x38] sm:$0xff] }
  0x20   :  { %v4142_v50 = vld [vmem:[%s5971_s27] ss:$0 sm:$0xff]  ;;  %s5972_s27 = sld [smem:[#allocation15_spill]]  ;;  %857 = vmatpush.bf16.msra.mxu3 %v3830_v33 }
  0x21   :  { %v376_v53 = vsel %vm374_vm9, %v365_v52, 0  ;;  %v3827_v39 = vld [vmem:[%s5941_s7 + $0x20] sm:$0xff] }
  0x22   :  { %4047 = vrot.lane.b32.xlu0 %v4046_v34, %s4230_s26  ;;  %384 = vmatpush.bf16.msra.mxu0 %v376_v53  ;;  %v4145_v58 = vld [vmem:[%s5942_s8] ss:$0 sm:$0xff]  ;;  %s4234_s8 = smov 112  }
  0x23   :  { %4025 = vmatpush.bf16.msra.mxu2 %v376_v53 }
  0x24   :  { %4057 = vrot.lane.b32.xlu1 %v4056_v41, %s4230_s26  ;;  %s2910_s26 = sshll.u32 %s5953_s19, 4  ;;  %s2921_s19 = sshll.u32 %s5954_s20, 4  ;;  %s2911_s26 = int_to_ptr.hbm [resolvable:$true] %s2910_s26  ;;  %s2922_s19 = int_to_ptr.hbm [resolvable:$true] %s2921_s19 }
  0x25   :  { %4067 = vrot.lane.b32.xlu2 %v4066_v42, %s4227_s24 }
  0x26   :  { %385 = vmatpush.bf16.msra.mxu0 %v3812_v54 }
  0x27   :  { %4026 = vmatpush.bf16.msra.mxu2 %v3812_v54 }
  0x2a   :  { %4072 = vrot.lane.b32.xlu0 %v4071_v46, %s4228_s6  ;;  %s5970_s6 = sld [smem:[#allocation12_spill]] }
  0x2b   :  { %634 = vmatpush.bf16.msrb.mxu2 %v3822_v47  ;;  %v3814_v47 = vld [vmem:[%s5969_s0 + $0x8] sm:$0xff] }
  0x2c   :  { %4077 = vrot.lane.b32.xlu1 %v4076_v49, %s4229_s25 }
  0x2f   :  { %635 = vmatpush.bf16.msrb.mxu2 %v3821_v48  ;;  %v3813_v48 = vld [vmem:[%s5969_s0] sm:$0xff] }
  0x30   :  { %v4141_v49 = vld [vmem:[%s5970_s6] ss:$0 sm:$0xff] }
  0x77   :  { %v4063_v56 = vpop.permute.xlu2 %4062 }
  0x78   :  { %v4065_v62 = vunpack.i.h.bf16 %v4063_v56  ;;  %v4064_v2 = vunpack.i.l.bf16 %v4063_v56 }
  0x7f   :  { %v4068_v16 = vpop.permute.xlu2 %4067 }
  0x80   :  { %v4070_v25 = vunpack.i.h.bf16 %v4068_v16  ;;  %v4069_v26 = vunpack.i.l.bf16 %v4068_v16 }
  0x8c   :  { %v4043_v55 = vpop.permute.xlu0 %4042 }
  0x8d   :  { %v4045_v6 = vunpack.i.h.bf16 %v4043_v55  ;;  %v4044_v7 = vunpack.i.l.bf16 %v4043_v55 }
  0x8e   :  { %v4053_v59 = vpop.permute.xlu1 %4052 }
  0x8f   :  { %v4055_v8 = vunpack.i.h.bf16 %v4053_v59  ;;  %v4054_v9 = vunpack.i.l.bf16 %v4053_v59 }
  0x94   :  { %v4048_v0 = vpop.permute.xlu0 %4047 }
  0x95   :  { %v4050_v3 = vunpack.i.h.bf16 %v4048_v0  ;;  %v4049_v4 = vunpack.i.l.bf16 %v4048_v0 }
  0x96   :  { %v4058_v14 = vpop.permute.xlu1 %4057 }
  0x97   :  { %v335_v10 = vsel %vm133_vm2, %v139_v63, %v4050_v3  ;;  %v334_v12 = vsel %vm133_vm2, %v166_v1, %v4049_v4  ;;  %v4060_v21 = vunpack.i.h.bf16 %v4058_v14  ;;  %v4059_v22 = vunpack.i.l.bf16 %v4058_v14 }
  0x98   :  { %v340_v17 = vsel %vm338_vm12, %v335_v10, %v4045_v6  ;;  %v339_v19 = vsel %vm338_vm12, %v334_v12, %v4044_v7 }
  0x99   :  { %v344_v23 = vsel %vm343_vm13, %v339_v19, %v4054_v9  ;;  %v345_v24 = vsel %vm343_vm13, %v340_v17, %v4055_v8  ;;  %v337_v29 = vsel %vm133_vm2, %v141_v20, %v4060_v21  ;;  %v336_v30 = vsel %vm133_vm2, %v168_v5, %v4059_v22 }
  0x9a   :  { %v349_v27 = vsel %vm348_vm14, %v344_v23, %v4064_v2  ;;  %v350_v28 = vsel %vm348_vm14, %v345_v24, %v4065_v62  ;;  %v341_v36 = vsel %vm338_vm12, %v336_v30, %v4069_v26  ;;  %v342_v37 = vsel %vm338_vm12, %v337_v29, %v4070_v25 }
  0x9b   :  { %v353_v31 = vpack.c.bf16 %v350_v28, %v349_v27  ;;  %vm514_vm2 = vcmask 785408  }
  0x9c   :  { %v4073_v32 = vpop.permute.xlu0 %4072 }
  0x9d   :  { %v4075_v34 = vunpack.i.h.bf16 %v4073_v32  ;;  %v4074_v35 = vunpack.i.l.bf16 %v4073_v32  ;;  %2958 = vmatmul.msk.bf16.vlgmr.msra.gmra.mxu0 %vm367_vm15, %v353_v31 }
  0x9e   :  { %v4078_v41 = vpop.permute.xlu1 %4077 }
  0x9f   :  { %v346_v38 = vsel %vm343_vm13, %v341_v36, %v4074_v35  ;;  %v347_v40 = vsel %vm343_vm13, %v342_v37, %v4075_v34  ;;  %v4080_v42 = vunpack.i.h.bf16 %v4078_v41  ;;  %v4079_v43 = vunpack.i.l.bf16 %v4078_v41  ;;  %v3820_v41 = vld [vmem:[%s5969_s0 + $0x38] sm:$0xff] }
  0xa0   :  { %609 = vmatpush.bf16.msra.mxu1 %v3820_v41 }
  0xa1   :  { %v351_v44 = vsel %vm348_vm14, %v346_v38, %v4079_v43  ;;  %v352_v45 = vsel %vm348_vm14, %v347_v40, %v4080_v42  ;;  %v3819_v42 = vld [vmem:[%s5969_s0 + $0x30] sm:$0xff]  ;;  %v3818_v43 = vld [vmem:[%s5969_s0 + $0x28] sm:$0xff] }
  0xa2   :  { %v354_v46 = vpack.c.bf16 %v352_v45, %v351_v44  ;;  %v3817_v44 = vld [vmem:[%s5969_s0 + $0x20] sm:$0xff]  ;;  %v3816_v45 = vld [vmem:[%s5969_s0 + $0x18] sm:$0xff] }
  0xa4   :  { %2959 = vmatmul.msk.bf16.vlgmr.msra.gmra.mxu2 %vm367_vm15, %v354_v46  ;;  %610 = vmatpush.bf16.msra.mxu1 %v3819_v42  ;;  %v3815_v46 = vld [vmem:[%s5969_s0 + $0x10] sm:$0xff]  ;;  %s4237_s0 = smov [#allocation3]  }
  0xa5   :  { %s2908_s6 = sshll.u32 %s4237_s0, 4  ;;  %s2909_s6 = int_to_ptr.vmem [resolvable:$true] %s2908_s6 }
  0xa8   :  { %611 = vmatpush.bf16.msra.mxu1 %v3818_v43 }
  0xac   :  { %612 = vmatpush.bf16.msra.mxu1 %v3817_v44 }
  0xb0   :  { %613 = vmatpush.bf16.msra.mxu1 %v3816_v45 }
  0xb4   :  { %614 = vmatpush.bf16.msra.mxu1 %v3815_v46 }
  0xb8   :  { %615 = vmatpush.bf16.msra.mxu1 %v3814_v47 }
  0xbc   :  { %616 = vmatpush.bf16.msra.mxu1 %v3813_v48 }
 0x11a   :  { %v387_v51 = vpop.f32.mrf.mxu0 }
 0x11b   :  { %v401_v52 = vmul.f32 %v4141_v49, %v387_v51 }
 0x11d   :  { %v409_v53 = vadd.f32 %v4142_v50, %v401_v52 }
 0x11f   :  { %v413_v54 = vmax.f32 %v409_v53, 0.0 }
 0x121   :  { %417 = vst.msk [vmem:[#allocation2 + $0x2] sm:$0xff] %vm122_vm0, %v413_v54 }
 0x122   :  { %v389_v55 = vpop.f32.mrf.mxu0 }
 0x123   :  { %v402_v56 = vmul.f32 %v4141_v49, %v389_v55 }
 0x125   :  { %v410_v59 = vadd.f32 %v4142_v50, %v402_v56 }
 0x127   :  { %v414_v60 = vmax.f32 %v410_v59, 0.0  ;;  %v392_v61 = vpop.f32.mrf.mxu2 }
 0x128   :  { %v403_v62 = vmul.f32 %v4141_v49, %v392_v61  ;;  %v429_v1 = vld [vmem:[#allocation2 + $0x1] sm:$0xff] }
 0x129   :  { %418 = vst.msk [vmem:[#allocation2 + $0xa] sm:$0xff] %vm122_vm0, %v414_v60  ;;  %v437_v3 = vld [vmem:[#allocation2 + $0x2] sm:$0xff]  ;;  %v433_v6 = vsel %vm178_vm5, %v429_v1, 0.0 }
 0x12a   :  { %v411_v63 = vadd.f32 %v4142_v50, %v403_v62  ;;  %v421_v51 = vld [vmem:[#allocation2] sm:$0xff] }
 0x12b   :  { %v425_v56 = vsel %vm146_vm10, %v421_v51, 0.0 }
 0x12c   :  { %v415_v0 = vmax.f32 %v411_v63, 0.0 }
 0x12e   :  { %419 = vst.msk [vmem:[#allocation2 + $0x12] sm:$0xff] %vm122_vm0, %v415_v0 }
 0x12f   :  { %v394_v2 = vpop.f32.mrf.mxu2 }
 0x130   :  { %v438_v4 = vld [vmem:[#allocation2 + $0xa] sm:$0xff]  ;;  %v404_v7 = vmul.f32 %v4141_v49, %v394_v2 }
 0x131   :  { %v430_v5 = vld [vmem:[#allocation2 + $0x9] sm:$0xff]  ;;  %v4086_v8 = vpack.i.bf16 %v438_v4, %v437_v3 }
 0x132   :  { %v4081_v9 = vpack.i.bf16 %v430_v5, %v433_v6  ;;  %v412_v10 = vadd.f32 %v4142_v50, %v404_v7  ;;  %v449_v17 = vld [vmem:[#allocation2 + $0x4] sm:$0xff] }
 0x133   :  { %4087 = vrot.lane.b32.xlu0 %v4086_v8, %s4231_s3  ;;  %v441_v20 = vld [vmem:[#allocation2 + $0x3] sm:$0xff] }
 0x134   :  { %4082 = vrot.lane.b32.xlu2 %v4081_v9, %s4232_s28  ;;  %v416_v12 = vmax.f32 %v412_v10, 0.0  ;;  %v422_v59 = vld [vmem:[#allocation2 + $0x8] sm:$0xff] }
 0x135   :  { %v450_v14 = vld [vmem:[#allocation2 + $0xc] sm:$0xff] }
 0x136   :  { %v442_v16 = vld [vmem:[#allocation2 + $0xb] sm:$0xff]  ;;  %420 = vst.msk [vmem:[#allocation2 + $0x1a] sm:$0xff] %vm122_vm0, %v416_v12  ;;  %v454_v19 = vsel %vm251_vm4, %v450_v14, 0.0 }
 0x137   :  { %v446_v21 = vsel %vm219_vm3, %v442_v16, 0.0  ;;  %v520_v22 = vpack.c.bf16 %v454_v19, %v449_v17  ;;  %v431_v24 = vld [vmem:[#allocation2 + $0x11] sm:$0xff] }
 0x138   :  { %v4091_v23 = vpack.i.bf16 %v446_v21, %v441_v20  ;;  %v439_v25 = vld [vmem:[#allocation2 + $0x12] sm:$0xff]  ;;  %v435_v28 = vsel %vm180_vm6, %v431_v24, 0.0 }
 0x139   :  { %3000 = vmatmul.msk.bf16.vlgmr.msrb.gmra.mxu2 %vm122_vm0, %v520_v22  ;;  %v423_v10 = vld [vmem:[#allocation2 + $0x10] sm:$0xff] }
 0x13a   :  { %4092 = vrot.lane.b32.xlu1 %v4091_v23, %s4233_s29  ;;  %v427_v19 = vsel %vm148_vm11, %v423_v10, 0.0 }
 0x13d   :  { %v440_v26 = vld [vmem:[#allocation2 + $0x1a] sm:$0xff] }
 0x13e   :  { %v432_v27 = vld [vmem:[#allocation2 + $0x19] sm:$0xff]  ;;  %v4101_v30 = vpack.i.bf16 %v440_v26, %v439_v25 }
 0x13f   :  { %v443_v29 = vld [vmem:[#allocation2 + $0x13] sm:$0xff]  ;;  %v4096_v31 = vpack.i.bf16 %v432_v27, %v435_v28  ;;  %v444_v32 = vld [vmem:[#allocation2 + $0x1b] sm:$0xff] }
 0x140   :  { %v448_v34 = vsel %vm221_vm7, %v444_v32, 0.0  ;;  %4102 = vrot.lane.b32.xlu0 %v4101_v30, %s4231_s3  ;;  %v452_v36 = vld [vmem:[#allocation2 + $0x1c] sm:$0xff]  ;;  %v451_v37 = vld [vmem:[#allocation2 + $0x14] sm:$0xff]  ;;  %v3832_v30 = vld [vmem:[%s5941_s7 + $0x48] sm:$0xff] }
 0x141   :  { %4097 = vrot.lane.b32.xlu2 %v4096_v31, %s4232_s28  ;;  %v4106_v35 = vpack.i.bf16 %v448_v34, %v443_v29  ;;  %v456_v38 = vsel %vm253_vm8, %v452_v36, 0.0  ;;  %v424_v17 = vld [vmem:[#allocation2 + $0x18] sm:$0xff]  ;;  %v4143_v31 = vld [vmem:[%s5972_s27] ss:$0 sm:$0xff]  ;;  %882 = vmatpush.bf16.msrb.mxu0 %v3832_v30  ;;  %v3825_v30 = vld [vmem:[%s5941_s7 + $0x10] sm:$0xff] }
 0x142   :  { %v522_v40 = vpack.c.bf16 %v456_v38, %v451_v37  ;;  %v3831_v36 = vld [vmem:[%s5941_s7 + $0x40] sm:$0xff] }
 0x143   :  { %4107 = vrot.lane.b32.xlu1 %v4106_v35, %s4233_s29  ;;  %v4144_v35 = vld [vmem:[%s5973_s23] ss:$0 sm:$0xff]  ;;  %s4236_s23 = smov 48  }
 0x145   :  { %883 = vmatpush.bf16.msrb.mxu0 %v3831_v36 }
 0x149   :  { %3001 = vmatmul.msk.bf16.gmra.mxu2 %vm122_vm0, %v522_v40 }
 0x18e   :  { %v4083_v49 = vpop.permute.xlu2 %4082 }
 0x18f   :  { %v4085_v52 = vunpack.i.h.bf16 %v4083_v49  ;;  %v4084_v53 = vunpack.i.l.bf16 %v4083_v49 }
 0x191   :  { %v505_v61 = vsel %vm122_vm0, %v425_v56, %v4084_v53  ;;  %v506_v62 = vsel %vm122_vm0, %v422_v59, %v4085_v52 }
 0x19b   :  { %v4098_v6 = vpop.permute.xlu2 %4097 }
 0x19c   :  { %v4100_v8 = vunpack.i.h.bf16 %v4098_v6  ;;  %v4099_v9 = vunpack.i.l.bf16 %v4098_v6 }
 0x19e   :  { %v508_v20 = vsel %vm122_vm0, %v424_v17, %v4100_v8  ;;  %v507_v21 = vsel %vm122_vm0, %v427_v19, %v4099_v9 }
 0x1a5   :  { %v4088_v50 = vpop.permute.xlu0 %4087 }
 0x1a6   :  { %v4090_v54 = vunpack.i.h.bf16 %v4088_v50  ;;  %v4089_v55 = vunpack.i.l.bf16 %v4088_v50 }
 0x1a8   :  { %v510_v1 = vsel %vm509_vm1, %v505_v61, %v4089_v55  ;;  %v511_v2 = vsel %vm509_vm1, %v506_v62, %v4090_v54 }
 0x1ac   :  { %v4093_v60 = vpop.permute.xlu1 %4092 }
 0x1ad   :  { %v4095_v63 = vunpack.i.h.bf16 %v4093_v60  ;;  %v4094_v0 = vunpack.i.l.bf16 %v4093_v60 }
 0x1af   :  { %v515_v3 = vsel %vm514_vm2, %v510_v1, %v4094_v0  ;;  %v516_v4 = vsel %vm514_vm2, %v511_v2, %v4095_v63 }
 0x1b0   :  { %v519_v5 = vpack.c.bf16 %v516_v4, %v515_v3 }
 0x1b2   :  { %617 = vmatmul.bf16.vlgmr.msra.gmra.mxu1 %v519_v5  ;;  %v4103_v7 = vpop.permute.xlu0 %4102 }
 0x1b3   :  { %v4105_v12 = vunpack.i.h.bf16 %v4103_v7  ;;  %v4104_v14 = vunpack.i.l.bf16 %v4103_v7 }
 0x1b5   :  { %v4108_v16 = vpop.permute.xlu1 %4107  ;;  %v512_v24 = vsel %vm509_vm1, %v507_v21, %v4104_v14  ;;  %v513_v25 = vsel %vm509_vm1, %v508_v20, %v4105_v12 }
 0x1b6   :  { %v4110_v22 = vunpack.i.h.bf16 %v4108_v16  ;;  %v4109_v23 = vunpack.i.l.bf16 %v4108_v16 }
 0x1b8   :  { %v517_v26 = vsel %vm514_vm2, %v512_v24, %v4109_v23  ;;  %v518_v27 = vsel %vm514_vm2, %v513_v25, %v4110_v22 }
 0x1b9   :  { %v521_v28 = vpack.c.bf16 %v518_v27, %v517_v26  ;;  %v3829_v27 = vld [vmem:[%s5941_s7 + $0x30] sm:$0xff] }
 0x1ba   :  { %858 = vmatpush.bf16.msra.mxu3 %v3829_v27 }
 0x1bc   :  { %v637_v29 = vpop.f32.mrf.mxu2 }
 0x1c2   :  { %622 = vmatmul.bf16.gmra.mxu1 %v521_v28  ;;  %v3828_v28 = vld [vmem:[%s5941_s7 + $0x28] sm:$0xff] }
 0x1c3   :  { %859 = vmatpush.bf16.msra.mxu3 %v3828_v28 }
 0x1c4   :  { %v639_v38 = vpop.f32.mrf.mxu2 }
 0x1c7   :  { %860 = vmatpush.bf16.msra.mxu3 %v3827_v39 }
 0x1cc   :  { %v642_v46 = vpop.f32.mrf.mxu2 }
 0x1d4   :  { %v644_v54 = vpop.f32.mrf.mxu2 }
 0x22f   :  { %v618_v32 = vpop.f32.mrf.mxu1 }
 0x230   :  { %v638_v34 = vadd.f32 %v637_v29, %v618_v32  ;;  %v3826_v29 = vld [vmem:[%s5941_s7 + $0x18] sm:$0xff]  ;;  %v3823_v32 = vld [vmem:[%s5941_s7] sm:$0xff] }
 0x231   :  { %861 = vmatpush.bf16.msra.mxu3 %v3826_v29 }
 0x232   :  { %v651_v37 = vmul.f32 %v4143_v31, %v638_v34 }
 0x234   :  { %v659_v40 = vadd.f32 %v4144_v35, %v651_v37 }
 0x235   :  { %862 = vmatpush.bf16.msra.mxu3 %v3825_v30 }
 0x236   :  { %v663_v41 = vmax.f32 %v659_v40, 0.0 }
 0x237   :  { %v620_v42 = vpop.f32.mrf.mxu1 }
 0x238   :  { %667 = vst.msk [vmem:[#allocation2 + $0x2] sm:$0xff] %vm122_vm0, %v663_v41  ;;  %v640_v43 = vadd.f32 %v639_v38, %v620_v42 }
 0x23a   :  { %v652_v44 = vmul.f32 %v4143_v31, %v640_v43 }
 0x23c   :  { %v660_v45 = vadd.f32 %v4144_v35, %v652_v44 }
 0x23e   :  { %v664_v47 = vmax.f32 %v660_v45, 0.0 }
 0x23f   :  { %v623_v48 = vpop.f32.mrf.mxu1  ;;  %v679_v52 = vld [vmem:[#allocation2 + $0x1] sm:$0xff] }
 0x240   :  { %668 = vst.msk [vmem:[#allocation2 + $0xa] sm:$0xff] %vm122_vm0, %v664_v47  ;;  %v643_v49 = vadd.f32 %v642_v46, %v623_v48  ;;  %v687_v56 = vld [vmem:[#allocation2 + $0x2] sm:$0xff]  ;;  %v683_v61 = vsel %vm178_vm5, %v679_v52, 0.0  ;;  %vm1013_vm5 = vcmask 916480  }
 0x241   :  { %v671_v36 = vld [vmem:[#allocation2] sm:$0xff] }
 0x242   :  { %v653_v50 = vmul.f32 %v4143_v31, %v643_v49  ;;  %v675_v42 = vsel %vm146_vm10, %v671_v36, 0.0  ;;  %vm2901_vm10 = vcmask 9216  }
 0x244   :  { %v661_v51 = vadd.f32 %v4144_v35, %v653_v50 }
 0x246   :  { %v665_v53 = vmax.f32 %v661_v51, 0.0 }
 0x247   :  { %v625_v55 = vpop.f32.mrf.mxu1  ;;  %v688_v59 = vld [vmem:[#allocation2 + $0xa] sm:$0xff] }
 0x248   :  { %v680_v60 = vld [vmem:[#allocation2 + $0x9] sm:$0xff]  ;;  %669 = vst.msk [vmem:[#allocation2 + $0x12] sm:$0xff] %vm122_vm0, %v665_v53  ;;  %v645_v62 = vadd.f32 %v644_v54, %v625_v55  ;;  %v4116_v63 = vpack.i.bf16 %v688_v59, %v687_v56 }
 0x249   :  { %v4111_v0 = vpack.i.bf16 %v680_v60, %v683_v61  ;;  %v699_v6 = vld [vmem:[#allocation2 + $0x4] sm:$0xff] }
 0x24a   :  { %v654_v1 = vmul.f32 %v4143_v31, %v645_v62  ;;  %4117 = vrot.lane.b32.xlu0 %v4116_v63, %s4231_s3  ;;  %v691_v7 = vld [vmem:[#allocation2 + $0x3] sm:$0xff] }
 0x24b   :  { %4112 = vrot.lane.b32.xlu2 %v4111_v0, %s4232_s28  ;;  %v3824_v31 = vld [vmem:[%s5941_s7 + $0x8] sm:$0xff]  ;;  %s4239_s7 = smov [#allocation7]  }
 0x24c   :  { %v662_v2 = vadd.f32 %v4144_v35, %v654_v1  ;;  %863 = vmatpush.bf16.msra.mxu3 %v3824_v31  ;;  %v672_v43 = vld [vmem:[#allocation2 + $0x8] sm:$0xff]  ;;  %s2932_s27 = sshll.u32 %s4239_s7, 4  ;;  %s2933_s27 = int_to_ptr.vmem [resolvable:$true] %s2932_s27 }
 0x24e   :  { %v666_v3 = vmax.f32 %v662_v2, 0.0 }
 0x24f   :  { %v700_v4 = vld [vmem:[#allocation2 + $0xc] sm:$0xff] }
 0x250   :  { %v692_v5 = vld [vmem:[#allocation2 + $0xb] sm:$0xff]  ;;  %670 = vst.msk [vmem:[#allocation2 + $0x1a] sm:$0xff] %vm122_vm0, %v666_v3  ;;  %v704_v13 = vsel %vm251_vm4, %v700_v4, 0.0  ;;  %864 = vmatpush.bf16.msra.mxu3 %v3823_v32  ;;  %vm1010_vm4 = vcmask 654336  }
 0x251   :  { %v696_v8 = vsel %vm219_vm3, %v692_v5, 0.0  ;;  %v768_v9 = vpack.c.bf16 %v704_v13, %v699_v6  ;;  %v681_v12 = vld [vmem:[#allocation2 + $0x11] sm:$0xff]  ;;  %vm1007_vm3 = vcmask 392192  }
 0x252   :  { %v4121_v10 = vpack.i.bf16 %v696_v8, %v691_v7  ;;  %v689_v14 = vld [vmem:[#allocation2 + $0x12] sm:$0xff]  ;;  %v685_v19 = vsel %vm180_vm6, %v681_v12, 0.0  ;;  %vm1222_vm6 = vcmask 1040384  }
 0x253   :  { %3042 = vmatmul.msk.bf16.vlgmr.msrb.gmra.mxu0 %vm122_vm0, %v768_v9  ;;  %v673_v55 = vld [vmem:[#allocation2 + $0x10] sm:$0xff] }
 0x254   :  { %4122 = vrot.lane.b32.xlu1 %v4121_v10, %s4233_s29  ;;  %v677_v63 = vsel %vm148_vm11, %v673_v55, 0.0  ;;  %v3839_v55 = vld [vmem:[%s5944_s10 + $0x30] sm:$0xff] }
 0x257   :  { %v690_v16 = vld [vmem:[#allocation2 + $0x1a] sm:$0xff] }
 0x258   :  { %v682_v17 = vld [vmem:[#allocation2 + $0x19] sm:$0xff]  ;;  %v4131_v15 = vpack.i.bf16 %v690_v16, %v689_v14 }
 0x259   :  { %v693_v20 = vld [vmem:[#allocation2 + $0x13] sm:$0xff]  ;;  %v4126_v21 = vpack.i.bf16 %v682_v17, %v685_v19  ;;  %v694_v22 = vld [vmem:[#allocation2 + $0x1b] sm:$0xff] }
 0x25a   :  { %v698_v11 = vsel %vm221_vm7, %v694_v22, 0.0  ;;  %4132 = vrot.lane.b32.xlu0 %v4131_v15, %s4231_s3  ;;  %v702_v24 = vld [vmem:[#allocation2 + $0x1c] sm:$0xff]  ;;  %v701_v25 = vld [vmem:[#allocation2 + $0x14] sm:$0xff]  ;;  %vm1237_vm7 = vcmask 1043456  }
 0x25b   :  { %4127 = vrot.lane.b32.xlu2 %v4126_v21, %s4232_s28  ;;  %v4136_v23 = vpack.i.bf16 %v698_v11, %v693_v20  ;;  %v706_v18 = vsel %vm253_vm8, %v702_v24, 0.0  ;;  %v674_v0 = vld [vmem:[#allocation2 + $0x18] sm:$0xff]  ;;  %v4146_v14 = vld [vmem:[%s5943_s9] ss:$0 sm:$0xff]  ;;  %s4235_s9 = smov 80   ;;  %vm1557_vm8 = vcmask 517120  }
 0x25c   :  { %v770_v26 = vpack.c.bf16 %v706_v18, %v701_v25 }
 0x25d   :  { %4137 = vrot.lane.b32.xlu1 %v4136_v23, %s4233_s29 }
 0x263   :  { %3043 = vmatmul.msk.bf16.gmra.mxu0 %vm122_vm0, %v770_v26 }
 0x2a5   :  { %v4113_v34 = vpop.permute.xlu2 %4112 }
 0x2a6   :  { %v4115_v37 = vunpack.i.h.bf16 %v4113_v34  ;;  %v4114_v38 = vunpack.i.l.bf16 %v4113_v34 }
 0x2a8   :  { %v755_v45 = vsel %vm122_vm0, %v675_v42, %v4114_v38  ;;  %v756_v46 = vsel %vm122_vm0, %v672_v43, %v4115_v37 }
 0x2b5   :  { %v4128_v54 = vpop.permute.xlu2 %4127 }
 0x2b6   :  { %v4130_v56 = vunpack.i.h.bf16 %v4128_v54  ;;  %v4129_v59 = vunpack.i.l.bf16 %v4128_v54  ;;  %v3840_v54 = vld [vmem:[%s5944_s10 + $0x38] sm:$0xff] }
 0x2b7   :  { %1505 = vmatpush.bf16.msra.mxu2 %v3840_v54 }
 0x2b8   :  { %v757_v1 = vsel %vm122_vm0, %v677_v63, %v4129_v59  ;;  %v758_v2 = vsel %vm122_vm0, %v674_v0, %v4130_v56  ;;  %v3838_v56 = vld [vmem:[%s5944_s10 + $0x28] sm:$0xff]  ;;  %v3835_v63 = vld [vmem:[%s5944_s10 + $0x10] sm:$0xff] }
 0x2b9   :  { %v3834_v0 = vld [vmem:[%s5944_s10 + $0x8] sm:$0xff] }
 0x2bb   :  { %1506 = vmatpush.bf16.msra.mxu2 %v3839_v55 }
 0x2bc   :  { %v4118_v35 = vpop.permute.xlu0 %4117 }
 0x2bd   :  { %v4120_v40 = vunpack.i.h.bf16 %v4118_v35  ;;  %v4119_v41 = vunpack.i.l.bf16 %v4118_v35 }
 0x2bf   :  { %v759_v49 = vsel %vm509_vm1, %v755_v45, %v4119_v41  ;;  %v760_v50 = vsel %vm509_vm1, %v756_v46, %v4120_v40  ;;  %1507 = vmatpush.bf16.msra.mxu2 %v3838_v56  ;;  %v3842_v56 = vld [vmem:[%s5944_s10 + $0x48] sm:$0xff] }
 0x2c6   :  { %v4123_v44 = vpop.permute.xlu1 %4122 }
 0x2c7   :  { %v4125_v47 = vunpack.i.h.bf16 %v4123_v44  ;;  %v4124_v48 = vunpack.i.l.bf16 %v4123_v44 }
 0x2c9   :  { %v763_v51 = vsel %vm514_vm2, %v759_v49, %v4124_v48  ;;  %v764_v52 = vsel %vm514_vm2, %v760_v50, %v4125_v47 }
 0x2ca   :  { %v767_v53 = vpack.c.bf16 %v764_v52, %v763_v51 }
 0x2cc   :  { %865 = vmatmul.bf16.vlgmr.msra.gmra.mxu3 %v767_v53  ;;  %v4133_v57 = vpop.permute.xlu0 %4132 }
 0x2cd   :  { %v4135_v60 = vunpack.i.h.bf16 %v4133_v57  ;;  %v4134_v61 = vunpack.i.l.bf16 %v4133_v57 }
 0x2cf   :  { %v4138_v62 = vpop.permute.xlu1 %4137  ;;  %v761_v5 = vsel %vm509_vm1, %v757_v1, %v4134_v61  ;;  %v762_v6 = vsel %vm509_vm1, %v758_v2, %v4135_v60  ;;  %v3837_v60 = vld [vmem:[%s5944_s10 + $0x20] sm:$0xff]  ;;  %v3836_v61 = vld [vmem:[%s5944_s10 + $0x18] sm:$0xff] }
 0x2d0   :  { %v4140_v3 = vunpack.i.h.bf16 %v4138_v62  ;;  %v4139_v4 = vunpack.i.l.bf16 %v4138_v62  ;;  %v885_v9 = vpop.f32.mrf.mxu0  ;;  %1508 = vmatpush.bf16.msra.mxu2 %v3837_v60  ;;  %v3833_v1 = vld [vmem:[%s5944_s10] sm:$0xff] }
 0x2d1   :  { %v3286_v2 = vld [vmem:[%s5946_s12 + $0xe0] sm:$0xf] }
 0x2d2   :  { %v765_v13 = vsel %vm514_vm2, %v761_v5, %v4139_v4  ;;  %v766_v7 = vsel %vm514_vm2, %v762_v6, %v4140_v3  ;;  %v3895_v3 = vld [vmem:[%s5946_s12 + $0xec] sm:$0xf0] }
 0x2d3   :  { %v769_v8 = vpack.c.bf16 %v766_v7, %v765_v13  ;;  %v3287_v4 = vor.u32 %v3895_v3, %v3286_v2  ;;  %v3270_v7 = vld [vmem:[%s5946_s12 + $0xc0] sm:$0xf] }
 0x2d4   :  { %1509 = vmatpush.bf16.msra.mxu2 %v3836_v61 }
 0x2d8   :  { %v887_v17 = vpop.f32.mrf.mxu0  ;;  %1510 = vmatpush.bf16.msra.mxu2 %v3835_v63 }
 0x2dc   :  { %870 = vmatmul.bf16.gmra.mxu3 %v769_v8  ;;  %1511 = vmatpush.bf16.msra.mxu2 %v3834_v0  ;;  %v3891_v8 = vld [vmem:[%s5946_s12 + $0xcc] sm:$0xf0] }
 0x2e0   :  { %v890_v23 = vpop.f32.mrf.mxu0  ;;  %1512 = vmatpush.bf16.msra.mxu2 %v3833_v1 }
 0x2e4   :  { %2327 = vmatpush.bf16.msrb.mxu2 %v3287_v4  ;;  %v3841_v4 = vld [vmem:[%s5944_s10 + $0x40] sm:$0xff] }
 0x2e8   :  { %v892_v28 = vpop.f32.mrf.mxu0 }
 0x34f   :  { %v866_v10 = vpop.f32.mrf.mxu3 }
 0x350   :  { %v886_v12 = vadd.f32 %v885_v9, %v866_v10 }
 0x352   :  { %v899_v16 = vmul.f32 %v4145_v58, %v886_v12  ;;  %v3254_v12 = vld [vmem:[%s5946_s12 + $0xa0] sm:$0xf] }
 0x354   :  { %v907_v19 = vadd.f32 %v4146_v14, %v899_v16 }
 0x356   :  { %v911_v20 = vmax.f32 %v907_v19, 0.0 }
 0x357   :  { %v868_v15 = vpop.f32.mrf.mxu3 }
 0x358   :  { %v888_v21 = vadd.f32 %v887_v17, %v868_v15  ;;  %915 = vxpose.xlu2.b32.start [1/4] (short) (narrow) %v911_v20, 32  ;;  %v3238_v15 = vld [vmem:[%s5946_s12 + $0x80] sm:$0xf] }
 0x35a   :  { %v900_v22 = vmul.f32 %v4145_v58, %v888_v21  ;;  %v3883_v21 = vld [vmem:[%s5946_s12 + $0x8c] sm:$0xf0] }
 0x35c   :  { %v908_v11 = vadd.f32 %v4146_v14, %v900_v22  ;;  %v3239_v22 = vor.u32 %v3883_v21, %v3238_v15  ;;  %v3893_v15 = vld [vmem:[%s5946_s12 + $0xe4] sm:$0xf]  ;;  %v3288_v21 = vld [vmem:[%s5946_s12 + $0xf0] sm:$0xf0] }
 0x35e   :  { %v912_v24 = vmax.f32 %v908_v11, 0.0  ;;  %v3222_v11 = vld [vmem:[%s5946_s12 + $0x60] sm:$0xf] }
 0x35f   :  { %v871_v25 = vpop.f32.mrf.mxu3 }
 0x360   :  { %v891_v18 = vadd.f32 %v890_v23, %v871_v25  ;;  %916 = vxpose.xlu2.b32.cont [2/4] (short) (narrow) %v912_v24, 32  ;;  %v3879_v23 = vld [vmem:[%s5946_s12 + $0x6c] sm:$0xf0] }
 0x361   :  { %v3223_v24 = vor.u32 %v3879_v23, %v3222_v11 }
 0x362   :  { %v901_v26 = vmul.f32 %v4145_v58, %v891_v18 }
 0x364   :  { %v909_v33 = vadd.f32 %v4146_v14, %v901_v26  ;;  %v3206_v26 = vld [vmem:[%s5946_s12 + $0x40] sm:$0xf] }
 0x366   :  { %v913_v27 = vmax.f32 %v909_v33, 0.0  ;;  %v3875_v33 = vld [vmem:[%s5946_s12 + $0x4c] sm:$0xf0] }
 0x367   :  { %v873_v39 = vpop.f32.mrf.mxu3 }
 0x368   :  { %v893_v29 = vadd.f32 %v892_v28, %v873_v39  ;;  %917 = vxpose.xlu2.b32.cont [3/4] (short) (narrow) %v913_v27, 32  ;;  %v3848_v27 = vld [vmem:[%s5944_s10 + $0x78] sm:$0xff]  ;;  %v3207_v28 = vor.u32 %v3875_v33, %v3206_v26 }
 0x369   :  { %1518 = vmatpush.bf16.msrb.mxu1 %v3848_v27  ;;  %v3291_v27 = vor.u32 %v3893_v15, %v3288_v21  ;;  %v3853_v15 = vld [vmem:[%s5944_s10 + $0xa0] sm:$0xff] }
 0x36a   :  { %v902_v30 = vmul.f32 %v4145_v58, %v893_v29  ;;  %v3271_v58 = vor.u32 %v3891_v8, %v3270_v7  ;;  %v3190_v29 = vld [vmem:[%s5946_s12 + $0x20] sm:$0xf] }
 0x36c   :  { %v910_v31 = vadd.f32 %v4146_v14, %v902_v30  ;;  %2328 = vmatpush.bf16.msrb.mxu2 %v3271_v58  ;;  %v3887_v14 = vld [vmem:[%s5946_s12 + $0xac] sm:$0xf0] }
 0x36d   :  { %v3255_v16 = vor.u32 %v3887_v14, %v3254_v12  ;;  %v3871_v30 = vld [vmem:[%s5946_s12 + $0x2c] sm:$0xf0]  ;;  %v3398_v14 = vld [vmem:[%s5946_s12 + $0x1c0] sm:$0xf] }
 0x36e   :  { %v914_v32 = vmax.f32 %v910_v31, 0.0  ;;  %v3191_v31 = vor.u32 %v3871_v30, %v3190_v29  ;;  %v3272_v29 = vld [vmem:[%s5946_s12 + $0xd0] sm:$0xf0]  ;;  %v3366_v30 = vld [vmem:[%s5946_s12 + $0x180] sm:$0xf] }
 0x370   :  { %918 = vxpose.xlu2.b32.end [4/4] (short) (narrow) %v914_v32, 32  ;;  %2329 = vmatpush.bf16.msrb.mxu2 %v3255_v16  ;;  %v3923_v16 = vld [vmem:[%s5946_s12 + $0x1cc] sm:$0xf0] }
 0x374   :  { %2330 = vmatpush.bf16.msrb.mxu2 %v3239_v22 }
 0x378   :  { %2331 = vmatpush.bf16.msrb.mxu2 %v3223_v24 }
 0x37c   :  { %2332 = vmatpush.bf16.msrb.mxu2 %v3207_v28 }
 0x380   :  { %2333 = vmatpush.bf16.msrb.mxu2 %v3191_v31  ;;  %v3915_v31 = vld [vmem:[%s5946_s12 + $0x18c] sm:$0xf0] }
 0x3f1   :  { %v4619_v34 = vpop.trf.xlu2 }
 0x3f2   :  { %1094 = vrot.lane.b32.xlu0 %v4619_v34, %s4234_s8  ;;  %v968_v35 = vrot.slane %v4619_v34, 6  ;;  %v952_v36 = vrot.slane %v4619_v34, 2  ;;  %v948_v37 = vrot.slane %v4619_v34, 1  ;;  %v956_v40 = vrot.slane %v4619_v34, 3 }
 0x3f3   :  { %v960_v42 = vrot.slane %v4619_v34, 4  ;;  %v964_v45 = vrot.slane %v4619_v34, 5  ;;  %v972_v48 = vrot.slane %v4619_v34, 7 }
 0x3f4   :  { %1110 = vrot.lane.b32.xlu2 %v968_v35, %s4235_s9  ;;  %1098 = vrot.lane.b32.xlu1 %v952_v36, %s4229_s25 }
 0x3f9   :  { %v4628_v38 = vpop.trf.xlu2 }
 0x3fa   :  { %949 = vrot.lane.b32.xlu0 %v948_v37, %s4229_s25  ;;  %v997_v41 = vrot.slane %v4628_v38, 6  ;;  %v1001_v43 = vrot.slane %v4628_v38, 7  ;;  %v977_v49 = vrot.slane %v4628_v38, 1  ;;  %v985_v50 = vrot.slane %v4628_v38, 3 }
 0x3fb   :  { %v981_v51 = vrot.slane %v4628_v38, 2  ;;  %v989_v52 = vrot.slane %v4628_v38, 4  ;;  %v993_v53 = vrot.slane %v4628_v38, 5 }
 0x3fc   :  { %1101 = vrot.lane.b32.xlu1 %v956_v40, %s4232_s28  ;;  %998 = vrot.lane.b32.xlu2 %v997_v41, %s4233_s29 }
 0x401   :  { %v4642_v44 = vpop.trf.xlu2 }
 0x402   :  { %1104 = vrot.lane.b32.xlu0 %v960_v42, %s4236_s23  ;;  %v1027_v57 = vrot.slane %v4642_v44, 2  ;;  %v1023_v59 = vrot.slane %v4642_v44, 1  ;;  %v1031_v62 = vrot.slane %v4642_v44, 3  ;;  %v1035_v9 = vrot.slane %v4642_v44, 4 }
 0x403   :  { %v1039_v10 = vrot.slane %v4642_v44, 5  ;;  %v1043_v39 = vrot.slane %v4642_v44, 6 }
 0x404   :  { %953 = vrot.lane.b32.xlu1 %v952_v36, %s4232_s28  ;;  %1002 = vrot.lane.b32.xlu2 %v1001_v43, %s4234_s8 }
 0x409   :  { %v4647_v46 = vpop.trf.xlu2 }
 0x40a   :  { %957 = vrot.lane.b32.xlu0 %v956_v40, %s4236_s23  ;;  %v1052_v47 = vrot.slane %v4647_v46, 1  ;;  %v1064_v13 = vrot.slane %v4647_v46, 4  ;;  %v1076_v20 = vrot.slane %v4647_v46, 7  ;;  %v3174_v40 = vld [vmem:[%s5946_s12] sm:$0xf]  ;;  %v1056_v61 = vrot.slane %v4647_v46, 2 }
 0x40b   :  { %v1060_v63 = vrot.slane %v4647_v46, 3 }
 0x40c   :  { %965 = vrot.lane.b32.xlu1 %v964_v45, %s4235_s9  ;;  %1053 = vrot.lane.b32.xlu2 %v1052_v47, %s4229_s25 }
 0x412   :  { %1107 = vrot.lane.b32.xlu0 %v964_v45, %s4231_s3  ;;  %v3846_v45 = vld [vmem:[%s5944_s10 + $0x68] sm:$0xff] }
 0x414   :  { %1113 = vrot.lane.b32.xlu1 %v972_v48, %s4233_s29  ;;  %1065 = vrot.lane.b32.xlu2 %v1064_v13, %s4231_s3 }
 0x41a   :  { %961 = vrot.lane.b32.xlu0 %v960_v42, %s4231_s3  ;;  %v1047_v42 = vrot.slane %v4642_v44, 7 }
 0x41c   :  { %978 = vrot.lane.b32.xlu1 %v977_v49, %s4229_s25  ;;  %1193 = vrot.lane.b32.xlu2 %v1076_v20, %s4233_s29 }
 0x422   :  { %969 = vrot.lane.b32.xlu0 %v968_v35, %s4233_s29  ;;  %v3847_v35 = vld [vmem:[%s5944_s10 + $0x70] sm:$0xff] }
 0x423   :  { %1519 = vmatpush.bf16.msrb.mxu1 %v3847_v35 }
 0x424   :  { %1123 = vrot.lane.b32.xlu1 %v985_v50, %s4232_s28 }
 0x427   :  { %1520 = vmatpush.bf16.msrb.mxu1 %v3846_v45  ;;  %v3911_v45 = vld [vmem:[%s5946_s12 + $0x16c] sm:$0xf0] }
 0x42a   :  { %973 = vrot.lane.b32.xlu0 %v972_v48, %s4234_s8 }
 0x42c   :  { %982 = vrot.lane.b32.xlu1 %v981_v51, %s4232_s28 }
 0x432   :  { %1116 = vrot.lane.b32.xlu0 %v4628_v38, %s4234_s8 }
 0x434   :  { %1126 = vrot.lane.b32.xlu1 %v989_v52, %s4236_s23 }
 0x43a   :  { %1120 = vrot.lane.b32.xlu0 %v981_v51, %s4229_s25 }
 0x43c   :  { %1132 = vrot.lane.b32.xlu1 %v997_v41, %s4235_s9  ;;  %v3867_v41 = vld [vmem:[%s5946_s12 + $0xc] sm:$0xf0] }
 0x442   :  { %986 = vrot.lane.b32.xlu0 %v985_v50, %s4236_s23  ;;  %v3845_v50 = vld [vmem:[%s5944_s10 + $0x60] sm:$0xff] }
 0x443   :  { %1521 = vmatpush.bf16.msrb.mxu1 %v3845_v50 }
 0x444   :  { %994 = vrot.lane.b32.xlu1 %v993_v53, %s4235_s9 }
 0x44a   :  { %1129 = vrot.lane.b32.xlu0 %v993_v53, %s4231_s3 }
 0x44c   :  { %1156 = vrot.lane.b32.xlu1 %v1027_v57, %s4229_s25 }
 0x44e   :  { %v1111_v2 = vpop.permute.xlu2 %1110 }
 0x452   :  { %990 = vrot.lane.b32.xlu0 %v989_v52, %s4231_s3  ;;  %v3844_v52 = vld [vmem:[%s5944_s10 + $0x58] sm:$0xff] }
 0x453   :  { %1522 = vmatpush.bf16.msrb.mxu1 %v3844_v52  ;;  %v3881_v52 = vld [vmem:[%s5946_s12 + $0x84] sm:$0xf] }
 0x454   :  { %1024 = vrot.lane.b32.xlu1 %v1023_v59, %s4229_s25 }
 0x45a   :  { %1135 = vrot.lane.b32.xlu0 %v1001_v43, %s4233_s29  ;;  %v3175_v43 = vor.u32 %v3867_v41, %v3174_v40  ;;  %v3885_v40 = vld [vmem:[%s5946_s12 + $0xa4] sm:$0xf]  ;;  %v3256_v41 = vld [vmem:[%s5946_s12 + $0xb0] sm:$0xf0] }
 0x45b   :  { %v3259_v50 = vor.u32 %v3885_v40, %v3256_v41  ;;  %v3850_v40 = vld [vmem:[%s5944_s10 + $0x88] sm:$0xff] }
 0x45c   :  { %1159 = vrot.lane.b32.xlu1 %v1031_v62, %s4232_s28  ;;  %2334 = vmatpush.bf16.msrb.mxu2 %v3175_v43  ;;  %v3350_v43 = vld [vmem:[%s5946_s12 + $0x160] sm:$0xf] }
 0x462   :  { %1152 = vrot.lane.b32.xlu0 %v4642_v44, %s4234_s8 }
 0x464   :  { %v4719_v5 = vpop.permute.xlu0 %1094  ;;  %1028 = vrot.lane.b32.xlu1 %v1027_v57, %s4232_s28  ;;  %v3843_v57 = vld [vmem:[%s5944_s10 + $0x50] sm:$0xff] }
 0x465   :  { %v1138_v54 = vsel %vm348_vm14, %v4719_v5, %v948_v37  ;;  %1523 = vmatpush.bf16.msrb.mxu1 %v3843_v57  ;;  %v3414_v5 = vld [vmem:[%s5946_s12 + $0x1e0] sm:$0xf]  ;;  %v3856_v57 = vld [vmem:[%s5944_s10 + $0xb8] sm:$0xff] }
 0x466   :  { %v4722_v6 = vpop.permute.xlu1 %1098  ;;  %1531 = vmatpush.bf16.msrb.mxu3 %v3856_v57 }
 0x467   :  { %v1139_v60 = vsel %vm122_vm0, %v1138_v54, %v4722_v6  ;;  %v3927_v6 = vld [vmem:[%s5946_s12 + $0x1ec] sm:$0xf0]  ;;  %v1072_v54 = vrot.slane %v4647_v46, 6 }
 0x469   :  { %1524 = vmatpush.bf16.msrb.mxu1 %v3842_v56  ;;  %v3334_v56 = vld [vmem:[%s5946_s12 + $0x140] sm:$0xf] }
 0x46a   :  { %1162 = vrot.lane.b32.xlu0 %v1035_v9, %s4236_s23 }
 0x46c   :  { %v4743_v17 = vpop.permute.xlu0 %949  ;;  %1165 = vrot.lane.b32.xlu1 %v1039_v10, %s4231_s3 }
 0x46d   :  { %v1005_v3 = vsel %vm348_vm14, %v4619_v34, %v4743_v17  ;;  %v3415_v34 = vor.u32 %v3927_v6, %v3414_v5  ;;  %1525 = vmatpush.bf16.msrb.mxu1 %v3841_v4  ;;  %v3399_v17 = vor.u32 %v3923_v16, %v3398_v14  ;;  %v3869_v16 = vld [vmem:[%s5946_s12 + $0x24] sm:$0xf] }
 0x46e   :  { %v1102_v19 = vpop.permute.xlu1 %1101 }
 0x46f   :  { %v1140_v37 = vsel %vm1007_vm3, %v1139_v60, %v1102_v19  ;;  %v3907_v60 = vld [vmem:[%s5946_s12 + $0x14c] sm:$0xf0] }
 0x471   :  { %2340 = vmatpush.bf16.msra.mxu1 %v3415_v34  ;;  %v3854_v34 = vld [vmem:[%s5944_s10 + $0xa8] sm:$0xff] }
 0x472   :  { %1032 = vrot.lane.b32.xlu0 %v1031_v62, %s4236_s23 }
 0x474   :  { %v1105_v25 = vpop.permute.xlu0 %1104  ;;  %1036 = vrot.lane.b32.xlu1 %v1035_v9, %s4231_s3 }
 0x475   :  { %v1141_v62 = vsel %vm509_vm1, %v1140_v37, %v1105_v25  ;;  %2341 = vmatpush.bf16.msra.mxu1 %v3399_v17  ;;  %v3382_v25 = vld [vmem:[%s5946_s12 + $0x1a0] sm:$0xf]  ;;  %v3192_v17 = vld [vmem:[%s5946_s12 + $0x30] sm:$0xf0] }
 0x476   :  { %v954_v18 = vpop.permute.xlu1 %953 }
 0x477   :  { %v1006_v7 = vsel %vm122_vm0, %v1005_v3, %v954_v18  ;;  %v3919_v18 = vld [vmem:[%s5946_s12 + $0x1ac] sm:$0xf0] }
 0x478   :  { %v3383_v28 = vor.u32 %v3919_v18, %v3382_v25  ;;  %v3903_v3 = vld [vmem:[%s5946_s12 + $0x12c] sm:$0xf0]  ;;  %v3852_v25 = vld [vmem:[%s5944_s10 + $0x98] sm:$0xff] }
 0x47a   :  { %1040 = vrot.lane.b32.xlu0 %v1039_v10, %s4235_s9  ;;  %2342 = vmatpush.bf16.msra.mxu1 %v3383_v28 }
 0x47c   :  { %v958_v32 = vpop.permute.xlu0 %957  ;;  %1168 = vrot.lane.b32.xlu1 %v1043_v39, %s4235_s9 }
 0x47d   :  { %v1008_v58 = vsel %vm1007_vm3, %v1006_v7, %v958_v32  ;;  %v1068_v32 = vrot.slane %v4647_v46, 5  ;;  %v3873_v7 = vld [vmem:[%s5946_s12 + $0x44] sm:$0xf] }
 0x47e   :  { %v966_v36 = vpop.permute.xlu1 %965 }
 0x482   :  { %1171 = vrot.lane.b32.xlu0 %v1047_v42, %s4233_s29 }
 0x484   :  { %v1108_v48 = vpop.permute.xlu0 %1107  ;;  %1048 = vrot.lane.b32.xlu1 %v1047_v42, %s4234_s8 }
 0x485   :  { %v1142_v0 = vsel %vm1010_vm4, %v1141_v62, %v1108_v48  ;;  %v3877_v62 = vld [vmem:[%s5946_s12 + $0x64] sm:$0xf] }
 0x486   :  { %v1114_v51 = vpop.permute.xlu1 %1113  ;;  %v1143_v8 = vsel %vm514_vm2, %v1142_v0, %v1111_v2  ;;  %v3855_v0 = vld [vmem:[%s5944_s10 + $0xb0] sm:$0xff]  ;;  %v3318_v2 = vld [vmem:[%s5946_s12 + $0x120] sm:$0xf] }
 0x487   :  { %v1144_v12 = vsel %vm1013_vm5, %v1143_v8, %v1114_v51  ;;  %v3351_v51 = vor.u32 %v3911_v45, %v3350_v43  ;;  %v3319_v6 = vor.u32 %v3903_v3, %v3318_v2  ;;  %v3208_v8 = vld [vmem:[%s5946_s12 + $0x50] sm:$0xf0]  ;;  %1532 = vmatpush.bf16.msrb.mxu3 %v3855_v0  ;;  %v3526_v0 = vld [vmem:[%s5946_s12 + $0x2c0] sm:$0xf] }
 0x488   :  { %v1214_v22 = vrot.slane %v1144_v12, 7  ;;  %v3211_v12 = vor.u32 %v3873_v7, %v3208_v8 }
 0x48a   :  { %1044 = vrot.lane.b32.xlu0 %v1043_v39, %s4233_s29  ;;  %v3889_v39 = vld [vmem:[%s5946_s12 + $0xc4] sm:$0xf] }
 0x48b   :  { %v3275_v35 = vor.u32 %v3889_v39, %v3272_v29  ;;  %1533 = vmatpush.bf16.msrb.mxu3 %v3854_v34  ;;  %v3278_v39 = vld [vmem:[%s5946_s12 + $0xc8] sm:$0xf]  ;;  %v3892_v29 = vld [vmem:[%s5946_s12 + $0xd4] sm:$0xf0] }
 0x48c   :  { %v962_v53 = vpop.permute.xlu0 %961  ;;  %1174 = vrot.lane.b32.xlu1 %v4647_v46, %s4234_s8 }
 0x48d   :  { %v1009_v10 = vsel %vm509_vm1, %v1008_v58, %v962_v53  ;;  %v3240_v53 = vld [vmem:[%s5946_s12 + $0x90] sm:$0xf0]  ;;  %v3302_v58 = vld [vmem:[%s5946_s12 + $0x100] sm:$0xf] }
 0x48e   :  { %v4813_v55 = vpop.permute.xlu1 %978  ;;  %v1011_v19 = vsel %vm1010_vm4, %v1009_v10, %v966_v36  ;;  %v3367_v36 = vor.u32 %v3915_v31, %v3366_v30  ;;  %v3243_v37 = vor.u32 %v3881_v52, %v3240_v53  ;;  %v3899_v10 = vld [vmem:[%s5946_s12 + $0x10c] sm:$0xf0]  ;;  %v3884_v52 = vld [vmem:[%s5946_s12 + $0x94] sm:$0xf0] }
 0x48f   :  { %v3303_v14 = vor.u32 %v3899_v10, %v3302_v58  ;;  %1534 = vmatpush.bf16.msrb.mxu3 %v3853_v15  ;;  %v3851_v30 = vld [vmem:[%s5944_s10 + $0x90] sm:$0xff]  ;;  %v1015_v45 = vsel %vm348_vm14, %v4628_v38, %v4813_v55  ;;  %v3849_v38 = vld [vmem:[%s5944_s10 + $0x80] sm:$0xff]  ;;  %v3876_v58 = vld [vmem:[%s5946_s12 + $0x54] sm:$0xf0] }
 0x490   :  { %2343 = vmatpush.bf16.msra.mxu1 %v3367_v36  ;;  %v3888_v36 = vld [vmem:[%s5946_s12 + $0xb4] sm:$0xf0]  ;;  %v3542_v55 = vld [vmem:[%s5946_s12 + $0x2e0] sm:$0xf] }
 0x491   :  { %v3510_v10 = vld [vmem:[%s5946_s12 + $0x2a0] sm:$0xf] }
 0x492   :  { %1178 = vrot.lane.b32.xlu0 %v1056_v61, %s4229_s25 }
 0x493   :  { %1535 = vmatpush.bf16.msrb.mxu3 %v3852_v25  ;;  %v3872_v25 = vld [vmem:[%s5946_s12 + $0x34] sm:$0xf0] }
 0x494   :  { %v970_v1 = vpop.permute.xlu0 %969  ;;  %1181 = vrot.lane.b32.xlu1 %v1060_v63, %s4232_s28  ;;  %2344 = vmatpush.bf16.msra.mxu1 %v3351_v51  ;;  %v3246_v51 = vld [vmem:[%s5946_s12 + $0x88] sm:$0xf] }
 0x495   :  { %v1012_v11 = vsel %vm514_vm2, %v1011_v19, %v970_v1 }
 0x496   :  { %v4841_v9 = vpop.permute.xlu1 %1123 }
 0x497   :  { %1536 = vmatpush.bf16.msrb.mxu3 %v3851_v30  ;;  %v3400_v30 = vld [vmem:[%s5946_s12 + $0x1d0] sm:$0xf0] }
 0x49a   :  { %1057 = vrot.lane.b32.xlu0 %v1056_v61, %s4232_s28  ;;  %v3335_v61 = vor.u32 %v3907_v60, %v3334_v56 }
 0x49b   :  { %1537 = vmatpush.bf16.msrb.mxu3 %v3850_v40  ;;  %v3182_v40 = vld [vmem:[%s5946_s12 + $0x8] sm:$0xf] }
 0x49c   :  { %v974_v23 = vpop.permute.xlu0 %973  ;;  %1184 = vrot.lane.b32.xlu1 %v1064_v13, %s4236_s23  ;;  %2345 = vmatpush.bf16.msra.mxu1 %v3335_v61 }
 0x49d   :  { %v1014_v24 = vsel %vm1013_vm5, %v1012_v11, %v974_v23  ;;  %v3865_v11 = vld [vmem:[%s5946_s12 + $0x4] sm:$0xf]  ;;  %v3176_v23 = vld [vmem:[%s5946_s12 + $0x10] sm:$0xf0] }
 0x49e   :  { %v4872_v26 = vsel %vm1222_vm6, %v1014_v24, %v1214_v22  ;;  %v4874_v33 = vpop.permute.xlu1 %982  ;;  %v3195_v22 = vor.u32 %v3869_v16, %v3192_v17  ;;  %v3896_v24 = vld [vmem:[%s5946_s12 + $0xf4] sm:$0xf0]  ;;  %v3179_v18 = vor.u32 %v3865_v11, %v3176_v23  ;;  %v3416_v16 = vld [vmem:[%s5946_s12 + $0x1f0] sm:$0xf0]  ;;  %v3198_v23 = vld [vmem:[%s5946_s12 + $0x28] sm:$0xf] }
 0x49f   :  { %v4878_v13 = vpack.c.bf16 %v4872_v26, %v4872_v26  ;;  %1538 = vmatpush.bf16.msrb.mxu3 %v3849_v38  ;;  %v3863_v38 = vld [vmem:[%s5944_s10 + $0xf0] sm:$0xff] }
 0x4a0   :  { %2346 = vmatpush.bf16.msra.mxu1 %v3319_v6  ;;  %v3214_v6 = vld [vmem:[%s5946_s12 + $0x48] sm:$0xf] }
 0x4a1   :  { %1513 = vmatmul.bf16.vlgmr.msra.gmra.mxu2 %v4878_v13  ;;  %v3215_v11 = vor.u32 %v3876_v58, %v3214_v6  ;;  %v3886_v58 = vld [vmem:[%s5946_s12 + $0xac] sm:$0xf] }
 0x4a2   :  { %2379 = vmatpush.bf16.msra.mxu2 %v3291_v27  ;;  %1061 = vrot.lane.b32.xlu0 %v1060_v63, %s4236_s23  ;;  %v3224_v63 = vld [vmem:[%s5946_s12 + $0x70] sm:$0xf0] }
 0x4a3   :  { %v3227_v5 = vor.u32 %v3877_v62, %v3224_v63  ;;  %v3230_v62 = vld [vmem:[%s5946_s12 + $0x68] sm:$0xf] }
 0x4a4   :  { %v4901_v42 = vpop.permute.xlu0 %1116  ;;  %1187 = vrot.lane.b32.xlu1 %v1068_v32, %s4231_s3  ;;  %2347 = vmatpush.bf16.msra.mxu1 %v3303_v14 }
 0x4a5   :  { %v1145_v41 = vsel %vm348_vm14, %v4901_v42, %v977_v49  ;;  %v999_v49 = vpop.permute.xlu2 %998  ;;  %v1016_v42 = vsel %vm122_vm0, %v1015_v45, %v4874_v33 }
 0x4a6   :  { %2380 = vmatpush.bf16.msra.mxu2 %v3275_v35  ;;  %v4910_v48 = vpop.permute.xlu1 %1126  ;;  %v3262_v35 = vld [vmem:[%s5946_s12 + $0xa8] sm:$0xf] }
 0x4aa   :  { %2381 = vmatpush.bf16.msra.mxu2 %v3259_v50  ;;  %1190 = vrot.lane.b32.xlu0 %v1072_v54, %s4235_s9  ;;  %v3263_v50 = vor.u32 %v3888_v36, %v3262_v35  ;;  %v3199_v36 = vor.u32 %v3872_v25, %v3198_v23  ;;  %v3882_v23 = vld [vmem:[%s5946_s12 + $0x8c] sm:$0xf] }
 0x4ac   :  { %v1121_v1 = vpop.permute.xlu0 %1120  ;;  %1069 = vrot.lane.b32.xlu1 %v1068_v32, %s4235_s9  ;;  %v3279_v32 = vor.u32 %v3892_v29, %v3278_v39  ;;  %v3921_v29 = vld [vmem:[%s5946_s12 + $0x1c4] sm:$0xf] }
 0x4ad   :  { %v1146_v43 = vsel %vm122_vm0, %v1145_v41, %v1121_v1  ;;  %v3955_v1 = vld [vmem:[%s5946_s12 + $0x2cc] sm:$0xf0]  ;;  %v3868_v41 = vld [vmem:[%s5946_s12 + $0x14] sm:$0xf0] }
 0x4ae   :  { %2382 = vmatpush.bf16.msra.mxu2 %v3243_v37  ;;  %v4945_v4 = vpop.permute.xlu1 %1132  ;;  %v1147_v57 = vsel %vm1007_vm3, %v1146_v43, %v4841_v9  ;;  %v3247_v37 = vor.u32 %v3884_v52, %v3246_v51  ;;  %v3880_v9 = vld [vmem:[%s5946_s12 + $0x74] sm:$0xf0]  ;;  %v3917_v43 = vld [vmem:[%s5946_s12 + $0x1a4] sm:$0xf]  ;;  %v3403_v51 = vor.u32 %v3921_v29, %v3400_v30  ;;  %v3384_v52 = vld [vmem:[%s5946_s12 + $0x1b0] sm:$0xf0] }
 0x4af   :  { %v1148_v63 = vsel %vm509_vm1, %v1147_v57, %v4910_v48  ;;  %v3231_v48 = vor.u32 %v3880_v9, %v3230_v62  ;;  %v3183_v57 = vor.u32 %v3868_v41, %v3182_v40  ;;  %v3462_v62 = vld [vmem:[%s5946_s12 + $0x240] sm:$0xf]  ;;  %v3890_v9 = vld [vmem:[%s5946_s12 + $0xcc] sm:$0xf]  ;;  %v3901_v29 = vld [vmem:[%s5946_s12 + $0x124] sm:$0xf] }
 0x4b0   :  { %v3320_v30 = vld [vmem:[%s5946_s12 + $0x130] sm:$0xf0] }
 0x4b1   :  { %2335 = vmatmul.bf16.vlgmr.msrb.gmra.mxu2 %v4878_v13  ;;  %v3323_v41 = vor.u32 %v3901_v29, %v3320_v30  ;;  %v3622_v29 = vld [vmem:[%s5946_s12 + $0x380] sm:$0xf]  ;;  %v3979_v30 = vld [vmem:[%s5946_s12 + $0x38c] sm:$0xf0] }
 0x4b2   :  { %2383 = vmatpush.bf16.msra.mxu2 %v3227_v5  ;;  %1073 = vrot.lane.b32.xlu0 %v1072_v54, %s4233_s29  ;;  %v3959_v54 = vld [vmem:[%s5946_s12 + $0x2ec] sm:$0xf0]  ;;  %v3527_v5 = vor.u32 %v3955_v1, %v3526_v0  ;;  %v3280_v0 = vld [vmem:[%s5946_s12 + $0xd8] sm:$0xf0]  ;;  %v3862_v1 = vld [vmem:[%s5944_s10 + $0xe8] sm:$0xff] }
 0x4b3   :  { %v3543_v60 = vor.u32 %v3959_v54, %v3542_v55  ;;  %v3283_v6 = vor.u32 %v3890_v9, %v3280_v0  ;;  %v3991_v9 = vld [vmem:[%s5946_s12 + $0x3ec] sm:$0xf0] }
 0x4b4   :  { %v987_v19 = vpop.permute.xlu0 %986  ;;  %1077 = vrot.lane.b32.xlu1 %v1076_v20, %s4234_s8  ;;  %v3294_v20 = vld [vmem:[%s5946_s12 + $0xe8] sm:$0xf]  ;;  %s2934_s8 = sshll.u32 %s5956_s22, 4  ;;  %s2935_s8 = int_to_ptr.hbm [resolvable:$true] %s2934_s8 }
 0x4b5   :  { %v3295_v27 = vor.u32 %v3896_v24, %v3294_v20  ;;  %v1017_v56 = vsel %vm1007_vm3, %v1016_v42, %v987_v19  ;;  %2353 = vmatpush.bf16.msra.mxu3 %v3543_v60  ;;  %v1003_v19 = vpop.permute.xlu2 %1002  ;;  %v3943_v42 = vld [vmem:[%s5946_s12 + $0x26c] sm:$0xf0]  ;;  %v3387_v60 = vor.u32 %v3917_v43, %v3384_v52  ;;  %v3304_v52 = vld [vmem:[%s5946_s12 + $0x110] sm:$0xf0] }
 0x4b6   :  { %2384 = vmatpush.bf16.msra.mxu2 %v3211_v12  ;;  %v995_v21 = vpop.permute.xlu1 %994  ;;  %v3951_v12 = vld [vmem:[%s5946_s12 + $0x2ac] sm:$0xf0] }
 0x4b7   :  { %v3511_v17 = vor.u32 %v3951_v12, %v3510_v10  ;;  %v3264_v10 = vld [vmem:[%s5946_s12 + $0xb8] sm:$0xf0]  ;;  %v3861_v12 = vld [vmem:[%s5944_s10 + $0xe0] sm:$0xff] }
 0x4b9   :  { %2354 = vmatpush.bf16.msra.mxu3 %v3527_v5 }
 0x4ba   :  { %2385 = vmatpush.bf16.msra.mxu2 %v3195_v22 }
 0x4bc   :  { %v1130_v28 = vpop.permute.xlu0 %1129 }
 0x4bd   :  { %v1149_v2 = vsel %vm1010_vm4, %v1148_v63, %v1130_v28  ;;  %2355 = vmatpush.bf16.msra.mxu3 %v3511_v17  ;;  %v3939_v63 = vld [vmem:[%s5946_s12 + $0x24c] sm:$0xf0] }
 0x4be   :  { %2386 = vmatpush.bf16.msra.mxu2 %v3179_v18  ;;  %v5000_v31 = vpop.permute.xlu1 %1156  ;;  %v1150_v8 = vsel %vm514_vm2, %v1149_v2, %v4945_v4  ;;  %v3925_v4 = vld [vmem:[%s5946_s12 + $0x1e4] sm:$0xf]  ;;  %v3494_v18 = vld [vmem:[%s5946_s12 + $0x280] sm:$0xf]  ;;  %v3463_v2 = vor.u32 %v3939_v63, %v3462_v62 }
 0x4bf   :  { %v3419_v24 = vor.u32 %v3925_v4, %v3416_v16  ;;  %v3905_v16 = vld [vmem:[%s5946_s12 + $0x144] sm:$0xf]  ;;  %v3670_v63 = vld [vmem:[%s5946_s12 + $0x3e0] sm:$0xf] }
 0x4c0   :  { %v3857_v62 = vld [vmem:[%s5944_s10 + $0xc0] sm:$0xff] }
 0x4c1   :  { %2387 = vmatmul.bf16.vlgmr.msra.gmra.mxu2 %v4878_v13 }
 0x4c2   :  { %2431 = vmatpush.bf16.msrb.mxu2 %v3295_v27  ;;  %v3947_v27 = vld [vmem:[%s5946_s12 + $0x28c] sm:$0xf0] }
 0x4c3   :  { %v3495_v35 = vor.u32 %v3947_v27, %v3494_v18 }
 0x4c4   :  { %v991_v53 = vpop.permute.xlu0 %990 }
 0x4c5   :  { %v1018_v33 = vsel %vm509_vm1, %v1017_v56, %v991_v53  ;;  %v3296_v53 = vld [vmem:[%s5946_s12 + $0xf8] sm:$0xf0]  ;;  %2356 = vmatpush.bf16.msra.mxu3 %v3495_v35  ;;  %v3913_v56 = vld [vmem:[%s5946_s12 + $0x184] sm:$0xf] }
 0x4c6   :  { %2432 = vmatpush.bf16.msrb.mxu2 %v3279_v32  ;;  %v5041_v61 = vpop.permute.xlu1 %1024  ;;  %v1019_v3 = vsel %vm1010_vm4, %v1018_v33, %v995_v21  ;;  %v3864_v32 = vld [vmem:[%s5944_s10 + $0xf8] sm:$0xff] }
 0x4c7   :  { %v1020_v7 = vsel %vm514_vm2, %v1019_v3, %v999_v49  ;;  %1544 = vmatpush.bf16.msra.mxu0 %v3864_v32  ;;  %v3478_v49 = vld [vmem:[%s5946_s12 + $0x260] sm:$0xf]  ;;  %v3909_v3 = vld [vmem:[%s5946_s12 + $0x164] sm:$0xf]  ;;  %v3878_v32 = vld [vmem:[%s5946_s12 + $0x6c] sm:$0xf] }
 0x4c8   :  { %v1021_v22 = vsel %vm1013_vm5, %v1020_v7, %v1003_v19  ;;  %v3479_v55 = vor.u32 %v3943_v42, %v3478_v49  ;;  %v3352_v7 = vld [vmem:[%s5946_s12 + $0x170] sm:$0xf0]  ;;  %v3267_v19 = vor.u32 %v3886_v58, %v3264_v10  ;;  %v3232_v35 = vld [vmem:[%s5946_s12 + $0x78] sm:$0xf0]  ;;  %v3874_v49 = vld [vmem:[%s5946_s12 + $0x4c] sm:$0xf] }
 0x4c9   :  { %v3355_v17 = vor.u32 %v3909_v3, %v3352_v7  ;;  %v3235_v43 = vor.u32 %v3878_v32, %v3232_v35  ;;  %v3216_v42 = vld [vmem:[%s5946_s12 + $0x58] sm:$0xf0]  ;;  %v3924_v3 = vld [vmem:[%s5946_s12 + $0x1d4] sm:$0xf0]  ;;  %v3866_v7 = vld [vmem:[%s5946_s12 + $0xc] sm:$0xf]  ;;  %v3623_v32 = vor.u32 %v3979_v30, %v3622_v29 }
 0x4ca   :  { %2433 = vmatpush.bf16.msrb.mxu2 %v3263_v50  ;;  %2357 = vmatpush.bf16.msra.mxu3 %v3479_v55  ;;  %v3987_v58 = vld [vmem:[%s5946_s12 + $0x3cc] sm:$0xf0]  ;;  %v3390_v10 = vld [vmem:[%s5946_s12 + $0x1a8] sm:$0xf] }
 0x4cb   :  { %1545 = vmatpush.bf16.msra.mxu0 %v3863_v38  ;;  %v3928_v38 = vld [vmem:[%s5946_s12 + $0x1f4] sm:$0xf0] }
 0x4cc   :  { %v1136_v34 = vpop.permute.xlu0 %1135 }
 0x4cd   :  { %v1151_v14 = vsel %vm1013_vm5, %v1150_v8, %v1136_v34  ;;  %v3446_v8 = vld [vmem:[%s5946_s12 + $0x220] sm:$0xf]  ;;  %v3935_v34 = vld [vmem:[%s5946_s12 + $0x22c] sm:$0xf0] }
 0x4ce   :  { %2434 = vmatpush.bf16.msrb.mxu2 %v3247_v37  ;;  %v1215_v15 = vrot.slane %v1151_v14, 7  ;;  %v5081_v21 = vpop.permute.xlu1 %1159  ;;  %v3368_v37 = vld [vmem:[%s5946_s12 + $0x190] sm:$0xf0]  ;;  %2358 = vmatpush.bf16.msra.mxu3 %v3463_v2  ;;  %v3447_v14 = vor.u32 %v3935_v34, %v3446_v8  ;;  %v3406_v2 = vld [vmem:[%s5946_s12 + $0x1c8] sm:$0xf] }
 0x4cf   :  { %1546 = vmatpush.bf16.msra.mxu0 %v3862_v1  ;;  %v3184_v8 = vld [vmem:[%s5946_s12 + $0x18] sm:$0xf0]  ;;  %v3654_v34 = vld [vmem:[%s5946_s12 + $0x3c0] sm:$0xf] }
 0x4d0   :  { %v1224_v20 = vsel %vm1222_vm6, %v1021_v22, %v1215_v15  ;;  %v3336_v15 = vld [vmem:[%s5946_s12 + $0x150] sm:$0xf0]  ;;  %v3430_v22 = vld [vmem:[%s5946_s12 + $0x200] sm:$0xf] }
 0x4d1   :  { %v1231_v28 = vrot.slane %v1224_v20, 6  ;;  %v5097_v39 = vpack.c.bf16 %v1224_v20, %v1224_v20  ;;  %v3248_v20 = vld [vmem:[%s5946_s12 + $0x98] sm:$0xf0]  ;;  %v3339_v27 = vor.u32 %v3905_v16, %v3336_v15 }
 0x4d2   :  { %2435 = vmatpush.bf16.msrb.mxu2 %v3231_v48  ;;  %v3371_v48 = vor.u32 %v3913_v56, %v3368_v37  ;;  %2359 = vmatpush.bf16.msra.mxu3 %v3447_v14  ;;  %v3219_v56 = vor.u32 %v3874_v49, %v3216_v42 }
 0x4d3   :  { %1526 = vmatmul.bf16.vlgmr.msrb.gmra.mxu1 %v5097_v39  ;;  %v5120_v45 = vsel %vm374_vm9, %v4872_v26, %v1231_v28  ;;  %v3894_v26 = vld [vmem:[%s5946_s12 + $0xec] sm:$0xf]  ;;  %1547 = vmatpush.bf16.msra.mxu0 %v3861_v12  ;;  %v3251_v28 = vor.u32 %v3882_v23, %v3248_v20  ;;  %v3655_v12 = vor.u32 %v3987_v58, %v3654_v34  ;;  %v3374_v20 = vld [vmem:[%s5946_s12 + $0x188] sm:$0xf]  ;;  %v3967_v34 = vld [vmem:[%s5946_s12 + $0x32c] sm:$0xf0] }
 0x4d4   :  { %2392 = vmatpush.bf16.msrb.mxu1 %v3419_v24  ;;  %v5122_v50 = vpop.permute.xlu0 %1152  ;;  %v3299_v33 = vor.u32 %v3894_v26, %v3296_v53  ;;  %v3860_v24 = vld [vmem:[%s5944_s10 + $0xd8] sm:$0xff]  ;;  %v3858_v26 = vld [vmem:[%s5944_s10 + $0xc8] sm:$0xff]  ;;  %vm2734_vm9 = vcmask 58368  }
 0x4d5   :  { %v3422_v53 = vld [vmem:[%s5946_s12 + $0x1e8] sm:$0xf]  ;;  %v1196_v0 = vsel %vm348_vm14, %v5122_v50, %v1023_v59  ;;  %v3407_v50 = vor.u32 %v3924_v3, %v3406_v2  ;;  %v3904_v2 = vld [vmem:[%s5946_s12 + $0x134] sm:$0xf0] }
 0x4d6   :  { %2436 = vmatpush.bf16.msrb.mxu2 %v3215_v11  ;;  %v5142_v54 = vpop.permute.xlu1 %1028  ;;  %v3931_v11 = vld [vmem:[%s5946_s12 + $0x20c] sm:$0xf0]  ;;  %v3423_v37 = vor.u32 %v3928_v38, %v3422_v53  ;;  %v1197_v59 = vsel %vm122_vm0, %v1196_v0, %v5000_v31  ;;  %v3920_v31 = vld [vmem:[%s5946_s12 + $0x1b4] sm:$0xf0]  ;;  %v3342_v38 = vld [vmem:[%s5946_s12 + $0x148] sm:$0xf] }
 0x4d7   :  { %v3431_v25 = vor.u32 %v3931_v11, %v3430_v22  ;;  %1548 = vmatpush.bf16.msra.mxu0 %v3860_v24  ;;  %v1198_v14 = vsel %vm1007_vm3, %v1197_v59, %v5081_v21  ;;  %v3391_v15 = vor.u32 %v3920_v31, %v3390_v10  ;;  %v3638_v22 = vld [vmem:[%s5946_s12 + $0x3a0] sm:$0xf]  ;;  %v3983_v11 = vld [vmem:[%s5946_s12 + $0x3ac] sm:$0xf0]  ;;  %v1080_v21 = vsel %vm348_vm14, %v4642_v44, %v5041_v61  ;;  %v3512_v59 = vld [vmem:[%s5946_s12 + $0x2b0] sm:$0xf0] }
 0x4d8   :  { %2393 = vmatpush.bf16.msrb.mxu1 %v3403_v51  ;;  %v3897_v51 = vld [vmem:[%s5946_s12 + $0x104] sm:$0xf]  ;;  %v3639_v24 = vor.u32 %v3983_v11, %v3638_v22  ;;  %v3971_v0 = vld [vmem:[%s5946_s12 + $0x34c] sm:$0xf0]  ;;  %v3310_v10 = vld [vmem:[%s5946_s12 + $0x108] sm:$0xf] }
 0x4d9   :  { %2360 = vmatpush.bf16.msra.mxu3 %v3431_v25  ;;  %v1081_v25 = vsel %vm122_vm0, %v1080_v21, %v5142_v54  ;;  %v3900_v31 = vld [vmem:[%s5946_s12 + $0x114] sm:$0xf0]  ;;  %v3558_v11 = vld [vmem:[%s5946_s12 + $0x300] sm:$0xf]  ;;  %v3963_v21 = vld [vmem:[%s5946_s12 + $0x30c] sm:$0xf0] }
 0x4da   :  { %2437 = vmatpush.bf16.msrb.mxu2 %v3199_v36  ;;  %v3859_v36 = vld [vmem:[%s5944_s10 + $0xd0] sm:$0xff]  ;;  %v3311_v22 = vor.u32 %v3900_v31, %v3310_v10 }
 0x4db   :  { %1549 = vmatpush.bf16.msra.mxu0 %v3859_v36 }
 0x4dc   :  { %2394 = vmatpush.bf16.msrb.mxu1 %v3387_v60  ;;  %v5168_v5 = vpop.permute.xlu0 %1162  ;;  %v3870_v60 = vld [vmem:[%s5946_s12 + $0x2c] sm:$0xf] }
 0x4de   :  { %2438 = vmatpush.bf16.msrb.mxu2 %v3183_v57  ;;  %v5189_v4 = vpop.permute.xlu1 %1165  ;;  %v3307_v57 = vor.u32 %v3897_v51, %v3304_v52  ;;  %v3544_v51 = vld [vmem:[%s5946_s12 + $0x2f0] sm:$0xf0] }
 0x4df   :  { %1550 = vmatpush.bf16.msra.mxu0 %v3858_v26 }
 0x4e0   :  { %2395 = vmatpush.bf16.msrb.mxu1 %v3371_v48  ;;  %v3671_v48 = vor.u32 %v3991_v9, %v3670_v63  ;;  %v3590_v9 = vld [vmem:[%s5946_s12 + $0x340] sm:$0xf] }
 0x4e1   :  { %2439 = vmatmul.bf16.vlgmr.msrb.gmra.mxu2 %v4878_v13  ;;  %v3591_v3 = vor.u32 %v3971_v0, %v3590_v9  ;;  %v3960_v9 = vld [vmem:[%s5946_s12 + $0x2f4] sm:$0xf0] }
 0x4e2   :  { %2483 = vmatpush.bf16.msra.mxu2 %v3299_v33  ;;  %v3200_v33 = vld [vmem:[%s5946_s12 + $0x38] sm:$0xf0] }
 0x4e3   :  { %2348 = vmatmul.bf16.vlgmr.msra.gmra.mxu1 %v5097_v39  ;;  %1551 = vmatpush.bf16.msra.mxu0 %v3857_v62  ;;  %v3528_v62 = vld [vmem:[%s5946_s12 + $0x2d0] sm:$0xf0] }
 0x4e4   :  { %2396 = vmatpush.bf16.msrb.mxu1 %v3355_v17  ;;  %v5213_v18 = vpop.permute.xlu0 %1032  ;;  %v3187_v17 = vor.u32 %v3866_v7, %v3184_v8  ;;  %v3949_v7 = vld [vmem:[%s5946_s12 + $0x2a4] sm:$0xf]  ;;  %v3574_v8 = vld [vmem:[%s5946_s12 + $0x320] sm:$0xf] }
 0x4e5   :  { %v1082_v44 = vsel %vm1007_vm3, %v1081_v25, %v5213_v18  ;;  %v3912_v18 = vld [vmem:[%s5946_s12 + $0x174] sm:$0xf0]  ;;  %v3408_v25 = vld [vmem:[%s5946_s12 + $0x1d8] sm:$0xf0] }
 0x4e6   :  { %2484 = vmatpush.bf16.msra.mxu2 %v3283_v6  ;;  %v5230_v40 = vpop.permute.xlu1 %1036  ;;  %v3203_v6 = vor.u32 %v3870_v60, %v3200_v33 }
 0x4e7   :  { %2366 = vmatpush.bf16.msrb.mxu0 %v3671_v48  ;;  %v1083_v35 = vsel %vm509_vm1, %v1082_v44, %v5230_v40  ;;  %v3975_v40 = vld [vmem:[%s5946_s12 + $0x36c] sm:$0xf0]  ;;  %v3941_v44 = vld [vmem:[%s5946_s12 + $0x264] sm:$0xf] }
 0x4e8   :  { %2397 = vmatpush.bf16.msrb.mxu1 %v3339_v27 }
 0x4ea   :  { %2485 = vmatpush.bf16.msra.mxu2 %v3267_v19  ;;  %v1199_v19 = vsel %vm509_vm1, %v1198_v14, %v5168_v5  ;;  %v3916_v5 = vld [vmem:[%s5946_s12 + $0x194] sm:$0xf0]  ;;  %v3515_v14 = vor.u32 %v3949_v7, %v3512_v59 }
 0x4eb   :  { %2367 = vmatpush.bf16.msrb.mxu0 %v3655_v12  ;;  %v1200_v27 = vsel %vm1010_vm4, %v1199_v19, %v5189_v4  ;;  %v3358_v4 = vld [vmem:[%s5946_s12 + $0x168] sm:$0xf]  ;;  %v3575_v12 = vor.u32 %v3967_v34, %v3574_v8  ;;  %v3945_v19 = vld [vmem:[%s5946_s12 + $0x284] sm:$0xf]  ;;  %v3956_v59 = vld [vmem:[%s5946_s12 + $0x2d4] sm:$0xf0] }
 0x4ec   :  { %2398 = vmatpush.bf16.msrb.mxu1 %v3323_v41  ;;  %v5253_v55 = vpop.permute.xlu0 %1040  ;;  %v3359_v42 = vor.u32 %v3912_v18, %v3358_v4  ;;  %v3392_v4 = vld [vmem:[%s5946_s12 + $0x1b8] sm:$0xf0]  ;;  %v1054_v18 = vpop.permute.xlu2 %1053 }
 0x4ed   :  { %v1084_v36 = vsel %vm1010_vm4, %v1083_v35, %v5253_v55  ;;  %v3908_v55 = vld [vmem:[%s5946_s12 + $0x154] sm:$0xf0]  ;;  %v3464_v35 = vld [vmem:[%s5946_s12 + $0x250] sm:$0xf0] }
 0x4ee   :  { %2486 = vmatpush.bf16.msra.mxu2 %v3251_v28  ;;  %v1169_v1 = vpop.permute.xlu1 %1168  ;;  %v3375_v28 = vor.u32 %v3916_v5, %v3374_v20  ;;  %v3343_v63 = vor.u32 %v3908_v55, %v3342_v38  ;;  %v3559_v20 = vor.u32 %v3963_v21, %v3558_v11  ;;  %v3910_v38 = vld [vmem:[%s5946_s12 + $0x16c] sm:$0xf]  ;;  %v3360_v55 = vld [vmem:[%s5946_s12 + $0x178] sm:$0xf0] }
 0x4ef   :  { %v1201_v61 = vsel %vm514_vm2, %v1200_v27, %v1169_v1  ;;  %2368 = vmatpush.bf16.msrb.mxu0 %v3639_v24  ;;  %v3326_v1 = vld [vmem:[%s5946_s12 + $0x128] sm:$0xf]  ;;  %v3922_v24 = vld [vmem:[%s5946_s12 + $0x1cc] sm:$0xf] }
 0x4f0   :  { %2399 = vmatpush.bf16.msrb.mxu1 %v3307_v57  ;;  %v3411_v29 = vor.u32 %v3922_v24, %v3408_v25 }
 0x4f2   :  { %2487 = vmatpush.bf16.msra.mxu2 %v3235_v43  ;;  %v3957_v43 = vld [vmem:[%s5946_s12 + $0x2e4] sm:$0xf] }
 0x4f3   :  { %2400 = vmatmul.bf16.vlgmr.msrb.gmra.mxu1 %v5097_v39  ;;  %2369 = vmatpush.bf16.msrb.mxu0 %v3623_v32  ;;  %v3547_v60 = vor.u32 %v3957_v43, %v3544_v51  ;;  %v3937_v32 = vld [vmem:[%s5946_s12 + $0x244] sm:$0xf]  ;;  %v3914_v43 = vld [vmem:[%s5946_s12 + $0x18c] sm:$0xf]  ;;  %v3376_v51 = vld [vmem:[%s5946_s12 + $0x198] sm:$0xf0] }
 0x4f4   :  { %2444 = vmatpush.bf16.msra.mxu1 %v3423_v37  ;;  %v1172_v16 = vpop.permute.xlu0 %1171  ;;  %v3953_v37 = vld [vmem:[%s5946_s12 + $0x2c4] sm:$0xf] }
 0x4f5   :  { %v1202_v54 = vsel %vm1013_vm5, %v1201_v61, %v1172_v16  ;;  %v3531_v48 = vor.u32 %v3953_v37, %v3528_v62  ;;  %v3926_v16 = vld [vmem:[%s5946_s12 + $0x1ec] sm:$0xf]  ;;  %v3480_v61 = vld [vmem:[%s5946_s12 + $0x270] sm:$0xf0] }
 0x4f6   :  { %2488 = vmatpush.bf16.msra.mxu2 %v3219_v56  ;;  %v1049_v23 = vpop.permute.xlu1 %1048  ;;  %v1216_v52 = vrot.slane %v1202_v54, 7  ;;  %v3483_v30 = vor.u32 %v3941_v44, %v3480_v61  ;;  %v3918_v54 = vld [vmem:[%s5946_s12 + $0x1ac] sm:$0xf]  ;;  %v3432_v37 = vld [vmem:[%s5946_s12 + $0x210] sm:$0xf0] }
 0x4f7   :  { %v3989_v61 = vld [vmem:[%s5946_s12 + $0x3e4] sm:$0xf] }
 0x4f8   :  { %2445 = vmatpush.bf16.msra.mxu1 %v3407_v50  ;;  %v3327_v50 = vor.u32 %v3904_v2, %v3326_v1  ;;  %v3363_v1 = vor.u32 %v3910_v38, %v3360_v55 }
 0x4fa   :  { %2489 = vmatpush.bf16.msra.mxu2 %v3203_v6 }
 0x4fc   :  { %2446 = vmatpush.bf16.msra.mxu1 %v3391_v15  ;;  %v1045_v41 = vpop.permute.xlu0 %1044  ;;  %v3496_v15 = vld [vmem:[%s5946_s12 + $0x290] sm:$0xf0] }
 0x4fd   :  { %v1085_v49 = vsel %vm514_vm2, %v1084_v36, %v1045_v41  ;;  %v3499_v5 = vor.u32 %v3945_v19, %v3496_v15  ;;  %v3395_v36 = vor.u32 %v3918_v54, %v3392_v4  ;;  %v3467_v41 = vor.u32 %v3937_v32, %v3464_v35  ;;  %v3518_v19 = vld [vmem:[%s5946_s12 + $0x2a8] sm:$0xf]  ;;  %v3952_v15 = vld [vmem:[%s5946_s12 + $0x2b4] sm:$0xf0] }
 0x4fe   :  { %2490 = vmatpush.bf16.msra.mxu2 %v3187_v17  ;;  %v1086_v26 = vsel %vm1013_vm5, %v1085_v49, %v1049_v23  ;;  %v5359_v53 = vpop.permute.xlu1 %1174  ;;  %v3424_v17 = vld [vmem:[%s5946_s12 + $0x1f8] sm:$0xf0]  ;;  %v3933_v49 = vld [vmem:[%s5946_s12 + $0x224] sm:$0xf]  ;;  %v3519_v44 = vor.u32 %v3952_v15, %v3518_v19  ;;  %v3948_v54 = vld [vmem:[%s5946_s12 + $0x294] sm:$0xf0] }
 0x4ff   :  { %v5368_v56 = vsel %vm1222_vm6, %v1086_v26, %v1216_v52  ;;  %v3427_v23 = vor.u32 %v3926_v16, %v3424_v17  ;;  %v1203_v62 = vsel %vm348_vm14, %v5359_v53, %v1052_v47  ;;  %v3344_v47 = vld [vmem:[%s5946_s12 + $0x158] sm:$0xf0] }
 0x500   :  { %2447 = vmatpush.bf16.msra.mxu1 %v3375_v28  ;;  %v5372_v33 = vpack.c.bf16 %v5368_v56, %v5368_v56  ;;  %v1232_v35 = vrot.slane %v5368_v56, 4  ;;  %v3486_v56 = vld [vmem:[%s5946_s12 + $0x268] sm:$0xf] }
 0x501   :  { %2491 = vmatmul.bf16.vlgmr.msra.gmra.mxu2 %v4878_v13  ;;  %v3606_v13 = vld [vmem:[%s5946_s12 + $0x360] sm:$0xf] }
 0x502   :  { %v3607_v57 = vor.u32 %v3975_v40, %v3606_v13  ;;  %1539 = vmatmul.bf16.vlgmr.msrb.gmra.mxu3 %v5372_v33  ;;  %v3379_v40 = vor.u32 %v3914_v43, %v3376_v51 }
 0x503   :  { %2405 = vmatpush.bf16.msrb.mxu3 %v3547_v60  ;;  %v3929_v60 = vld [vmem:[%s5946_s12 + $0x204] sm:$0xf] }
 0x504   :  { %2448 = vmatpush.bf16.msra.mxu1 %v3359_v42  ;;  %2370 = vmatpush.bf16.msrb.mxu0 %v3607_v57  ;;  %v5393_v6 = vpop.permute.xlu0 %1178  ;;  %v3448_v42 = vld [vmem:[%s5946_s12 + $0x230] sm:$0xf0]  ;;  %v1066_v57 = vpop.permute.xlu2 %1065  ;;  %v3435_v2 = vor.u32 %v3929_v60, %v3432_v37  ;;  %v3981_v60 = vld [vmem:[%s5946_s12 + $0x3a4] sm:$0xf] }
 0x505   :  { %v3451_v26 = vor.u32 %v3933_v49, %v3448_v42  ;;  %v1204_v0 = vsel %vm122_vm0, %v1203_v62, %v5393_v6  ;;  %v3534_v6 = vld [vmem:[%s5946_s12 + $0x2c8] sm:$0xf]  ;;  %v3656_v49 = vld [vmem:[%s5946_s12 + $0x3d0] sm:$0xf0] }
 0x506   :  { %v5407_v58 = vpop.permute.xlu1 %1181  ;;  %v3535_v17 = vor.u32 %v3956_v59, %v3534_v6  ;;  %v3640_v37 = vld [vmem:[%s5946_s12 + $0x3b0] sm:$0xf0]  ;;  %v3438_v59 = vld [vmem:[%s5946_s12 + $0x208] sm:$0xf] }
 0x507   :  { %2406 = vmatpush.bf16.msrb.mxu3 %v3531_v48  ;;  %v1205_v7 = vsel %vm1007_vm3, %v1204_v0, %v5407_v58  ;;  %v3643_v0 = vor.u32 %v3981_v60, %v3640_v37  ;;  %v3608_v6 = vld [vmem:[%s5946_s12 + $0x370] sm:$0xf0]  ;;  %v3980_v60 = vld [vmem:[%s5946_s12 + $0x394] sm:$0xf0]  ;;  %v3934_v37 = vld [vmem:[%s5946_s12 + $0x22c] sm:$0xf] }
 0x508   :  { %2449 = vmatpush.bf16.msra.mxu1 %v3343_v63  ;;  %2371 = vmatpush.bf16.msrb.mxu0 %v3591_v3  ;;  %v3550_v63 = vld [vmem:[%s5946_s12 + $0x2e8] sm:$0xf]  ;;  %v3906_v3 = vld [vmem:[%s5946_s12 + $0x14c] sm:$0xf] }
 0x509   :  { %v3551_v48 = vor.u32 %v3960_v9, %v3550_v63  ;;  %v3347_v10 = vor.u32 %v3906_v3, %v3344_v47  ;;  %v3470_v63 = vld [vmem:[%s5946_s12 + $0x248] sm:$0xf]  ;;  %v3940_v9 = vld [vmem:[%s5946_s12 + $0x254] sm:$0xf0] }
 0x50a   :  { %v3936_v3 = vld [vmem:[%s5946_s12 + $0x234] sm:$0xf0] }
 0x50b   :  { %2407 = vmatpush.bf16.msrb.mxu3 %v3515_v14  ;;  %v3328_v14 = vld [vmem:[%s5946_s12 + $0x138] sm:$0xf0] }
 0x50c   :  { %2450 = vmatpush.bf16.msra.mxu1 %v3327_v50  ;;  %2372 = vmatpush.bf16.msrb.mxu0 %v3575_v12  ;;  %v1058_v27 = vpop.permute.xlu0 %1057  ;;  %v1087_v50 = vsel %vm348_vm14, %v4647_v46, %v1054_v18  ;;  %v3902_v12 = vld [vmem:[%s5946_s12 + $0x12c] sm:$0xf] }
 0x50d   :  { %v1088_v31 = vsel %vm122_vm0, %v1087_v50, %v1058_v27  ;;  %v3331_v11 = vor.u32 %v3902_v12, %v3328_v14  ;;  %vm1235_vm0 = vcmask 1045508   ;;  %v3932_v50 = vld [vmem:[%s5946_s12 + $0x214] sm:$0xf0]  ;;  %v3969_v12 = vld [vmem:[%s5946_s12 + $0x344] sm:$0xf] }
 0x50e   :  { %v1185_v28 = vpop.permute.xlu1 %1184  ;;  %v3592_v14 = vld [vmem:[%s5946_s12 + $0x350] sm:$0xf0] }
 0x50f   :  { %2408 = vmatpush.bf16.msrb.mxu3 %v3499_v5  ;;  %v1206_v8 = vsel %vm509_vm1, %v1205_v7, %v1185_v28  ;;  %v3312_v5 = vld [vmem:[%s5946_s12 + $0x118] sm:$0xf0]  ;;  %v3973_v7 = vld [vmem:[%s5946_s12 + $0x364] sm:$0xf]  ;;  %v3595_v19 = vor.u32 %v3969_v12, %v3592_v14  ;;  %v3990_v12 = vld [vmem:[%s5946_s12 + $0x3ec] sm:$0xf] }
 0x510   :  { %2451 = vmatpush.bf16.msra.mxu1 %v3311_v22  ;;  %2373 = vmatpush.bf16.msrb.mxu0 %v3559_v20  ;;  %v1194_v22 = vpop.permute.xlu2 %1193  ;;  %v3898_v20 = vld [vmem:[%s5946_s12 + $0x10c] sm:$0xf]  ;;  %v3680_v14 = vld [vmem:[%s5946_s12 + $0x3f8] sm:$0xf0] }
 0x511   :  { %v3315_v32 = vor.u32 %v3898_v20, %v3312_v5 }
 0x512   :  { %2361 = vmatmul.bf16.vlgmr.msra.gmra.mxu3 %v5372_v33 }
 0x513   :  { %2452 = vmatmul.bf16.vlgmr.msra.gmra.mxu1 %v5097_v39  ;;  %2409 = vmatpush.bf16.msrb.mxu3 %v3483_v30  ;;  %v3502_v30 = vld [vmem:[%s5946_s12 + $0x288] sm:$0xf] }
 0x514   :  { %2496 = vmatpush.bf16.msrb.mxu1 %v3427_v23  ;;  %v1062_v52 = vpop.permute.xlu0 %1061  ;;  %v3503_v51 = vor.u32 %v3948_v54, %v3502_v30 }
 0x515   :  { %v1089_v46 = vsel %vm1007_vm3, %v1088_v31, %v1062_v52  ;;  %v3985_v52 = vld [vmem:[%s5946_s12 + $0x3c4] sm:$0xf]  ;;  %v3439_v31 = vor.u32 %v3932_v50, %v3438_v59 }
 0x516   :  { %v1188_v13 = vpop.permute.xlu1 %1187  ;;  %v1090_v23 = vsel %vm509_vm1, %v1089_v46, %v1066_v57  ;;  %v3659_v55 = vor.u32 %v3985_v52, %v3656_v49  ;;  %v3954_v46 = vld [vmem:[%s5946_s12 + $0x2cc] sm:$0xf]  ;;  %v3646_v52 = vld [vmem:[%s5946_s12 + $0x3a8] sm:$0xf]  ;;  %v3984_v49 = vld [vmem:[%s5946_s12 + $0x3b4] sm:$0xf0] }
 0x517   :  { %2410 = vmatpush.bf16.msrb.mxu3 %v3467_v41  ;;  %v1207_v58 = vsel %vm1010_vm4, %v1206_v8, %v1188_v13  ;;  %v3958_v8 = vld [vmem:[%s5946_s12 + $0x2ec] sm:$0xf] }
 0x518   :  { %2497 = vmatpush.bf16.msrb.mxu1 %v3411_v29  ;;  %v3672_v29 = vld [vmem:[%s5946_s12 + $0x3f0] sm:$0xf0] }
 0x519   :  { %v3675_v43 = vor.u32 %v3989_v61, %v3672_v29  ;;  %v3992_v61 = vld [vmem:[%s5946_s12 + $0x3f4] sm:$0xf0]  ;;  %v3504_v29 = vld [vmem:[%s5946_s12 + $0x298] sm:$0xf0] }
 0x51b   :  { %2411 = vmatpush.bf16.msrb.mxu3 %v3451_v26 }
 0x51c   :  { %2498 = vmatpush.bf16.msrb.mxu1 %v3395_v36  ;;  %v1191_v53 = vpop.permute.xlu0 %1190 }
 0x51d   :  { %v1208_v16 = vsel %vm514_vm2, %v1207_v58, %v1191_v53 }
 0x51e   :  { %v1070_v34 = vpop.permute.xlu1 %1069  ;;  %v1209_v21 = vsel %vm1013_vm5, %v1208_v16, %v1194_v22  ;;  %v3536_v16 = vld [vmem:[%s5946_s12 + $0x2d8] sm:$0xf0]  ;;  %v3965_v22 = vld [vmem:[%s5946_s12 + $0x324] sm:$0xf] }
 0x51f   :  { %2412 = vmatpush.bf16.msrb.mxu3 %v3435_v2  ;;  %v1091_v24 = vsel %vm1010_vm4, %v1090_v23, %v1070_v34  ;;  %v1217_v4 = vrot.slane %v1209_v21, 7  ;;  %v3977_v2 = vld [vmem:[%s5946_s12 + $0x384] sm:$0xf]  ;;  %v3552_v34 = vld [vmem:[%s5946_s12 + $0x2f8] sm:$0xf0]  ;;  %v3539_v15 = vor.u32 %v3954_v46, %v3536_v16 }
 0x520   :  { %2499 = vmatpush.bf16.msrb.mxu1 %v3379_v40  ;;  %v3944_v40 = vld [vmem:[%s5946_s12 + $0x274] sm:$0xf0]  ;;  %v3555_v58 = vor.u32 %v3958_v8, %v3552_v34  ;;  %v3950_v21 = vld [vmem:[%s5946_s12 + $0x2ac] sm:$0xf]  ;;  %v3520_v23 = vld [vmem:[%s5946_s12 + $0x2b8] sm:$0xf0] }
 0x521   :  { %v3487_v57 = vor.u32 %v3944_v40, %v3486_v56  ;;  %v3523_v5 = vor.u32 %v3950_v21, %v3520_v23  ;;  %v3472_v56 = vld [vmem:[%s5946_s12 + $0x258] sm:$0xf0]  ;;  %v4147_v40 = vld [vmem:[%s5945_s11] ss:$0 sm:$0xff]  ;;  %v3582_v8 = vld [vmem:[%s5946_s12 + $0x328] sm:$0xf] }
 0x522   :  { %2413 = vmatmul.bf16.vlgmr.msrb.gmra.mxu3 %v5372_v33  ;;  %v3968_v34 = vld [vmem:[%s5946_s12 + $0x334] sm:$0xf0]  ;;  %v3648_v21 = vld [vmem:[%s5946_s12 + $0x3b8] sm:$0xf0] }
 0x523   :  { %2457 = vmatpush.bf16.msra.mxu3 %v3551_v48 }
 0x524   :  { %2500 = vmatpush.bf16.msrb.mxu1 %v3363_v1  ;;  %v1074_v25 = vpop.permute.xlu0 %1073  ;;  %v5538_v27 = vpop.f32.mrf.mxu2  ;;  %v3471_v1 = vor.u32 %v3940_v9, %v3470_v63 }
 0x525   :  { %v1092_v28 = vsel %vm514_vm2, %v1091_v24, %v1074_v25  ;;  %v3961_v24 = vld [vmem:[%s5946_s12 + $0x304] sm:$0xf]  ;;  %v3560_v25 = vld [vmem:[%s5946_s12 + $0x310] sm:$0xf0]  ;;  %v1515_v63 = vadd.f32 %v4147_v40, %v5538_v27  ;;  %v3440_v27 = vld [vmem:[%s5946_s12 + $0x218] sm:$0xf0] }
 0x526   :  { %v1078_v18 = vpop.permute.xlu1 %1077  ;;  %v3563_v54 = vor.u32 %v3961_v24, %v3560_v25  ;;  %v3978_v24 = vld [vmem:[%s5946_s12 + $0x38c] sm:$0xf]  ;;  %v3632_v25 = vld [vmem:[%s5946_s12 + $0x398] sm:$0xf0] }
 0x527   :  { %2458 = vmatpush.bf16.msra.mxu3 %v3535_v17  ;;  %v1093_v36 = vsel %vm1013_vm5, %v1092_v28, %v1078_v18  ;;  %v3946_v28 = vld [vmem:[%s5946_s12 + $0x28c] sm:$0xf] }
 0x528   :  { %2501 = vmatpush.bf16.msrb.mxu1 %v3347_v10  ;;  %v1226_v41 = vsel %vm1222_vm6, %v1093_v36, %v1217_v4  ;;  %v3611_v10 = vor.u32 %v3973_v7, %v3608_v6  ;;  %v3507_v18 = vor.u32 %v3946_v28, %v3504_v29  ;;  %v3942_v36 = vld [vmem:[%s5946_s12 + $0x26c] sm:$0xf]  ;;  %v3598_v7 = vld [vmem:[%s5946_s12 + $0x348] sm:$0xf]  ;;  %v3972_v6 = vld [vmem:[%s5946_s12 + $0x354] sm:$0xf0] }
 0x529   :  { %v1233_v42 = vrot.slane %v1226_v41, 2  ;;  %v5562_v13 = vpack.c.bf16 %v1226_v41, %v1226_v41  ;;  %v3488_v41 = vld [vmem:[%s5946_s12 + $0x278] sm:$0xf0]  ;;  %v3599_v50 = vor.u32 %v3972_v6, %v3598_v7 }
 0x52a   :  { %v3616_v28 = vld [vmem:[%s5946_s12 + $0x378] sm:$0xf0] }
 0x52b   :  { %2459 = vmatpush.bf16.msra.mxu3 %v3519_v44  ;;  %1552 = vmatmul.bf16.vlgmr.msra.gmra.mxu0 %v5562_v13  ;;  %v1236_v26 = vsel %vm1235_vm0, %v1232_v35, %v1233_v42  ;;  %v3678_v44 = vld [vmem:[%s5946_s12 + $0x3e8] sm:$0xf]  ;;  %v3988_v35 = vld [vmem:[%s5946_s12 + $0x3d4] sm:$0xf0]  ;;  %v3938_v42 = vld [vmem:[%s5946_s12 + $0x24c] sm:$0xf] }
 0x52c   :  { %2502 = vmatpush.bf16.msrb.mxu1 %v3331_v11  ;;  %2418 = vmatpush.bf16.msra.mxu0 %v3675_v43  ;;  %v1516_v38 = vpop.f32.mrf.mxu2  ;;  %v1238_v62 = vsel %vm1237_vm7, %v5120_v45, %v1236_v26  ;;  %v3454_v45 = vld [vmem:[%s5946_s12 + $0x228] sm:$0xf]  ;;  %v3576_v11 = vld [vmem:[%s5946_s12 + $0x330] sm:$0xf0]  ;;  %v3679_v4 = vor.u32 %v3992_v61, %v3678_v44  ;;  %v3635_v44 = vor.u32 %v3978_v24, %v3632_v25  ;;  %v3974_v61 = vld [vmem:[%s5946_s12 + $0x36c] sm:$0xf] }
 0x52d   :  { %1240 = vst [vmem:[#allocation7] sm:$0xff] %v1238_v62  ;;  %v3455_v48 = vor.u32 %v3936_v3, %v3454_v45  ;;  %v3579_v20 = vor.u32 %v3965_v22, %v3576_v11  ;;  %v3647_v38 = vor.u32 %v3984_v49, %v3646_v52  ;;  %v3456_v62 = vld [vmem:[%s5946_s12 + $0x238] sm:$0xf0]  ;;  %v3976_v45 = vld [vmem:[%s5946_s12 + $0x374] sm:$0xf0] }
 0x52e   :  { %v3930_v3 = vld [vmem:[%s5946_s12 + $0x20c] sm:$0xf]  ;;  %v3664_v22 = vld [vmem:[%s5946_s12 + $0x3d8] sm:$0xf0] }
 0x52f   :  { %2460 = vmatpush.bf16.msra.mxu3 %v3503_v51  ;;  %v3491_v51 = vor.u32 %v3942_v36, %v3488_v41  ;;  %v3966_v36 = vld [vmem:[%s5946_s12 + $0x32c] sm:$0xf]  ;;  %v3568_v52 = vld [vmem:[%s5946_s12 + $0x318] sm:$0xf0] }
 0x530   :  { %2503 = vmatpush.bf16.msrb.mxu1 %v3315_v32  ;;  %2419 = vmatpush.bf16.msra.mxu0 %v3659_v55  ;;  %v3662_v32 = vld [vmem:[%s5946_s12 + $0x3c8] sm:$0xf]  ;;  %v3475_v55 = vor.u32 %v3938_v42, %v3472_v56  ;;  %v4004_v7 = vld [vmem:[%s5949_s15 + $0x58] sm:$0xff] }
 0x531   :  { %v3663_v43 = vor.u32 %v3988_v35, %v3662_v32  ;;  %v3600_v32 = vld [vmem:[%s5946_s12 + $0x358] sm:$0xf0] }
 0x533   :  { %2504 = vmatmul.bf16.vlgmr.msrb.gmra.mxu1 %v5097_v39  ;;  %2461 = vmatpush.bf16.msra.mxu3 %v3487_v57  ;;  %v3624_v39 = vld [vmem:[%s5946_s12 + $0x390] sm:$0xf0]  ;;  %v3630_v57 = vld [vmem:[%s5946_s12 + $0x388] sm:$0xf] }
 0x534   :  { %2420 = vmatpush.bf16.msra.mxu0 %v3643_v0  ;;  %v5597_v47 = vpop.f32.mrf.mxu2  ;;  %v3627_v53 = vor.u32 %v3977_v2, %v3624_v39  ;;  %v3459_v2 = vor.u32 %v3934_v37, %v3456_v62  ;;  %v3614_v39 = vld [vmem:[%s5946_s12 + $0x368] sm:$0xf]  ;;  %v4000_v37 = vld [vmem:[%s5949_s15 + $0x38] sm:$0xff] }
 0x535   :  { %v4008_v62 = vld [vmem:[%s5949_s15 + $0x78] sm:$0xff]  ;;  %2708 = vmatpush.bf16.msrb.mxu2 %v4000_v37 }
 0x536   :  { %2721 = vmatpush.bf16.msra.mxu1 %v4008_v62  ;;  %v4020_v37 = vld [vmem:[%s5951_s17 + $0x58] sm:$0xff] }
 0x537   :  { %2462 = vmatpush.bf16.msra.mxu3 %v3471_v1  ;;  %v3631_v1 = vor.u32 %v3980_v60, %v3630_v57 }
 0x538   :  { %2421 = vmatpush.bf16.msra.mxu0 %v3627_v53  ;;  %v3615_v53 = vor.u32 %v3976_v45, %v3614_v39  ;;  %v3997_v39 = vld [vmem:[%s5949_s15 + $0x20] sm:$0xff] }
 0x539   :  { %v4005_v45 = vld [vmem:[%s5949_s15 + $0x60] sm:$0xff] }
 0x53b   :  { %2463 = vmatpush.bf16.msra.mxu3 %v3455_v48  ;;  %2374 = vmatmul.bf16.vlgmr.msrb.gmra.mxu0 %v5562_v13  ;;  %v3443_v48 = vor.u32 %v3930_v3, %v3440_v27 }
 0x53c   :  { %2422 = vmatpush.bf16.msra.mxu0 %v3611_v10  ;;  %v2338_v17 = vpop.f32.mrf.mxu2  ;;  %v3583_v10 = vor.u32 %v3968_v34, %v3582_v8  ;;  %v4003_v8 = vld [vmem:[%s5949_s15 + $0x50] sm:$0xff] }
 0x53f   :  { %2464 = vmatpush.bf16.msra.mxu3 %v3439_v31  ;;  %v3566_v31 = vld [vmem:[%s5946_s12 + $0x308] sm:$0xf] }
 0x540   :  { %2423 = vmatpush.bf16.msra.mxu0 %v3595_v19  ;;  %v3683_v19 = vor.u32 %v3990_v12, %v3680_v14  ;;  %v3993_v14 = vld [vmem:[%s5949_s15] sm:$0xff] }
 0x542   :  { %2465 = vmatmul.bf16.vlgmr.msra.gmra.mxu3 %v5372_v33 }
 0x543   :  { %2509 = vmatpush.bf16.msrb.mxu3 %v3555_v58  ;;  %v3964_v58 = vld [vmem:[%s5946_s12 + $0x314] sm:$0xf0] }
 0x544   :  { %2424 = vmatpush.bf16.msra.mxu0 %v3579_v20  ;;  %v5661_v30 = vpop.f32.mrf.mxu2  ;;  %v3567_v17 = vor.u32 %v3964_v58, %v3566_v31  ;;  %v3994_v31 = vld [vmem:[%s5949_s15 + $0x8] sm:$0xff] }
 0x545   :  { %v4002_v58 = vld [vmem:[%s5949_s15 + $0x48] sm:$0xff] }
 0x547   :  { %2510 = vmatpush.bf16.msrb.mxu3 %v3539_v15  ;;  %v3986_v15 = vld [vmem:[%s5946_s12 + $0x3cc] sm:$0xf] }
 0x548   :  { %2425 = vmatpush.bf16.msra.mxu0 %v3563_v54  ;;  %v3667_v11 = vor.u32 %v3986_v15, %v3664_v22 }
 0x54b   :  { %2511 = vmatpush.bf16.msrb.mxu3 %v3523_v5  ;;  %2426 = vmatmul.bf16.vlgmr.msra.gmra.mxu0 %v5562_v13 }
 0x54c   :  { %2470 = vmatpush.bf16.msrb.mxu0 %v3679_v4  ;;  %v2390_v26 = vpop.f32.mrf.mxu2  ;;  %v3619_v4 = vor.u32 %v3974_v61, %v3616_v28 }
 0x54f   :  { %2512 = vmatpush.bf16.msrb.mxu3 %v3507_v18  ;;  %v3970_v18 = vld [vmem:[%s5946_s12 + $0x34c] sm:$0xf] }
 0x550   :  { %2471 = vmatpush.bf16.msrb.mxu0 %v3663_v43  ;;  %v1527_v9 = vpop.f32.mrf.mxu1  ;;  %v3603_v35 = vor.u32 %v3970_v18, %v3600_v32  ;;  %v4016_v18 = vld [vmem:[%s5951_s17 + $0x38] sm:$0xff] }
 0x551   :  { %v5704_v0 = vadd.f32 %v1527_v9, %v1515_v63  ;;  %v4007_v63 = vld [vmem:[%s5949_s15 + $0x70] sm:$0xff] }
 0x552   :  { %2722 = vmatpush.bf16.msra.mxu1 %v4007_v63  ;;  %v4019_v63 = vld [vmem:[%s5951_s17 + $0x50] sm:$0xff] }
 0x553   :  { %2513 = vmatpush.bf16.msrb.mxu3 %v3491_v51  ;;  %v3962_v51 = vld [vmem:[%s5946_s12 + $0x30c] sm:$0xf] }
 0x554   :  { %2472 = vmatpush.bf16.msrb.mxu0 %v3647_v38  ;;  %v3571_v42 = vor.u32 %v3962_v51, %v3568_v52 }
 0x557   :  { %2514 = vmatpush.bf16.msrb.mxu3 %v3475_v55 }
 0x558   :  { %2473 = vmatpush.bf16.msrb.mxu0 %v3631_v1  ;;  %v1529_v59 = vpop.f32.mrf.mxu1  ;;  %v3998_v1 = vld [vmem:[%s5949_s15 + $0x28] sm:$0xff] }
 0x55b   :  { %2515 = vmatpush.bf16.msrb.mxu3 %v3459_v2  ;;  %v4006_v2 = vld [vmem:[%s5949_s15 + $0x68] sm:$0xff] }
 0x55c   :  { %2474 = vmatpush.bf16.msrb.mxu0 %v3615_v53  ;;  %2723 = vmatpush.bf16.msra.mxu1 %v4006_v2  ;;  %v4018_v2 = vld [vmem:[%s5951_s17 + $0x48] sm:$0xff] }
 0x55f   :  { %2516 = vmatpush.bf16.msrb.mxu3 %v3443_v48  ;;  %v3996_v48 = vld [vmem:[%s5949_s15 + $0x18] sm:$0xff] }
 0x560   :  { %2475 = vmatpush.bf16.msrb.mxu0 %v3599_v50  ;;  %v2349_v46 = vpop.f32.mrf.mxu1  ;;  %2724 = vmatpush.bf16.msra.mxu1 %v4005_v45  ;;  %v4017_v45 = vld [vmem:[%s5951_s17 + $0x40] sm:$0xff] }
 0x562   :  { %2517 = vmatmul.bf16.vlgmr.msrb.gmra.mxu3 %v5372_v33  ;;  %v5744_v33 = vadd.f32 %v2349_v46, %v5597_v47  ;;  %v3982_v47 = vld [vmem:[%s5946_s12 + $0x3ac] sm:$0xf]  ;;  %v4001_v46 = vld [vmem:[%s5949_s15 + $0x40] sm:$0xff] }
 0x563   :  { %v3651_v5 = vor.u32 %v3982_v47, %v3648_v21  ;;  %v5859_v21 = vld [vmem:[%s5948_s14] sm:$0xf]  ;;  %2875 = vmatpush.bf16.msra.mxu3 %v4016_v18 }
 0x564   :  { %v2440_v16 = vpop.f32.mrf.mxu2  ;;  %2476 = vmatpush.bf16.msrb.mxu0 %v3583_v10  ;;  %2725 = vmatpush.bf16.msra.mxu1 %v4004_v7 }
 0x568   :  { %2477 = vmatpush.bf16.msrb.mxu0 %v3567_v17  ;;  %v2351_v23 = vpop.f32.mrf.mxu1  ;;  %2726 = vmatpush.bf16.msra.mxu1 %v4003_v8  ;;  %v5852_v17 = vld [vmem:[%s5947_s13] sm:$0xf] }
 0x569   :  { %v2537_v47 = vperm.slane %v5852_v17, 0  ;;  %v2538_v24 = vperm.slane %v5852_v17, 1 }
 0x56b   :  { %2478 = vmatmul.bf16.vlgmr.msrb.gmra.mxu0 %v5562_v13 }
 0x56c   :  { %2522 = vmatpush.bf16.msra.mxu0 %v3683_v19  ;;  %v2442_v20 = vpop.f32.mrf.mxu2  ;;  %2727 = vmatpush.bf16.msra.mxu1 %v4002_v58 }
 0x570   :  { %2523 = vmatpush.bf16.msra.mxu0 %v3667_v11  ;;  %v2401_v29 = vpop.f32.mrf.mxu1  ;;  %2728 = vmatpush.bf16.msra.mxu1 %v4001_v46 }
 0x571   :  { %v5772_v54 = vadd.f32 %v2401_v29, %v5661_v30  ;;  %v3584_v30 = vld [vmem:[%s5946_s12 + $0x338] sm:$0xf0] }
 0x572   :  { %v3587_v43 = vor.u32 %v3966_v36, %v3584_v30  ;;  %v4015_v36 = vld [vmem:[%s5951_s17 + $0x30] sm:$0xff] }
 0x573   :  { %v4023_v30 = vld [vmem:[%s5951_s17 + $0x70] sm:$0xff]  ;;  %2876 = vmatpush.bf16.msra.mxu3 %v4015_v36 }
 0x574   :  { %2524 = vmatpush.bf16.msra.mxu0 %v3651_v5  ;;  %v2551_v5 = vperm.slane %v5859_v21, 0 }
 0x578   :  { %2525 = vmatpush.bf16.msra.mxu0 %v3635_v44  ;;  %v2403_v41 = vpop.f32.mrf.mxu1 }
 0x57c   :  { %2526 = vmatpush.bf16.msra.mxu0 %v3619_v4 }
 0x580   :  { %2527 = vmatpush.bf16.msra.mxu0 %v3603_v35 }
 0x584   :  { %v2492_v49 = vpop.f32.mrf.mxu2  ;;  %2528 = vmatpush.bf16.msra.mxu0 %v3587_v43 }
 0x585   :  { %v1540_v56 = vpop.f32.mrf.mxu3 }
 0x586   :  { %v1541_v27 = vadd.f32 %v1540_v56, %v5704_v0  ;;  %v3995_v0 = vld [vmem:[%s5949_s15 + $0x10] sm:$0xff] }
 0x588   :  { %2529 = vmatpush.bf16.msra.mxu0 %v3571_v42  ;;  %v4022_v42 = vld [vmem:[%s5951_s17 + $0x68] sm:$0xff] }
 0x58b   :  { %2530 = vmatmul.bf16.vlgmr.msra.gmra.mxu0 %v5562_v13  ;;  %v3999_v13 = vld [vmem:[%s5949_s15 + $0x30] sm:$0xff] }
 0x58c   :  { %v2494_v40 = vpop.f32.mrf.mxu2  ;;  %2709 = vmatpush.bf16.msrb.mxu2 %v3999_v13  ;;  %v4011_v13 = vld [vmem:[%s5951_s17 + $0x10] sm:$0xff] }
 0x58d   :  { %v1542_v38 = vpop.f32.mrf.mxu3 }
 0x58e   :  { %v4021_v38 = vld [vmem:[%s5951_s17 + $0x60] sm:$0xff] }
 0x590   :  { %v2453_v26 = vpop.f32.mrf.mxu1  ;;  %2710 = vmatpush.bf16.msrb.mxu2 %v3998_v1  ;;  %v4010_v1 = vld [vmem:[%s5951_s17 + $0x8] sm:$0xff] }
 0x591   :  { %v5793_v55 = vadd.f32 %v2453_v26, %v2440_v16  ;;  %v4013_v26 = vld [vmem:[%s5951_s17 + $0x20] sm:$0xff] }
 0x594   :  { %2711 = vmatpush.bf16.msrb.mxu2 %v3997_v39  ;;  %v4009_v39 = vld [vmem:[%s5951_s17] sm:$0xff] }
 0x595   :  { %v2362_v60 = vpop.f32.mrf.mxu3 }
 0x596   :  { %v2363_v15 = vadd.f32 %v2362_v60, %v5744_v33  ;;  %v2552_v33 = vperm.slane %v5859_v21, 1  ;;  %v4012_v60 = vld [vmem:[%s5951_s17 + $0x18] sm:$0xff] }
 0x598   :  { %v2455_v57 = vpop.f32.mrf.mxu1  ;;  %2712 = vmatpush.bf16.msrb.mxu2 %v3996_v48  ;;  %v2539_v48 = vperm.slane %v5852_v17, 2 }
 0x59c   :  { %2713 = vmatpush.bf16.msrb.mxu2 %v3995_v0  ;;  %v2540_v0 = vperm.slane %v5852_v17, 3  ;;  %v4148_v17 = vld [vmem:[%s5950_s16] ss:$0 sm:$0xff]  ;;  %s4238_s16 = smov [#allocation5]  }
 0x59d   :  { %v2364_v9 = vpop.f32.mrf.mxu3  ;;  %s2919_s11 = sshll.u32 %s4238_s16, 4  ;;  %s2920_s11 = int_to_ptr.vmem [resolvable:$true] %s2919_s11 }
 0x5a0   :  { %2714 = vmatpush.bf16.msrb.mxu2 %v3994_v31 }
 0x5a4   :  { %2715 = vmatpush.bf16.msrb.mxu2 %v3993_v14 }
 0x5a5   :  { %v2414_v3 = vpop.f32.mrf.mxu3 }
 0x5a6   :  { %v2415_v23 = vadd.f32 %v2414_v3, %v5772_v54  ;;  %v4024_v54 = vld [vmem:[%s5951_s17 + $0x78] sm:$0xff] }
 0x5a7   :  { %2888 = vmatpush.bf16.msrb.mxu0 %v4024_v54 }
 0x5a8   :  { %v1553_v53 = vpop.f32.mrf.mxu0 }
 0x5a9   :  { %v1554_v6 = vadd.f32 %v1553_v53, %v1541_v27 }
 0x5ab   :  { %1558 = vst.msk [vmem:[%s5955_s21] sm:$0x3] %vm1557_vm8, %v1554_v6  ;;  %2889 = vmatpush.bf16.msrb.mxu0 %v4023_v30 }
 0x5ad   :  { %v2416_v34 = vpop.f32.mrf.mxu3 }
 0x5af   :  { %2890 = vmatpush.bf16.msrb.mxu0 %v4022_v42 }
 0x5b0   :  { %v2505_v59 = vpop.f32.mrf.mxu1  ;;  %v1555_v10 = vpop.f32.mrf.mxu0 }
 0x5b1   :  { %v5829_v50 = vadd.f32 %v2505_v59, %v2492_v49  ;;  %v4014_v49 = vld [vmem:[%s5951_s17 + $0x28] sm:$0xff]  ;;  %v2553_v59 = vperm.slane %v5859_v21, 2  ;;  %v2554_v10 = vperm.slane %v5859_v21, 3 }
 0x5b2   :  { %2877 = vmatpush.bf16.msra.mxu3 %v4014_v49 }
 0x5b3   :  { %2891 = vmatpush.bf16.msrb.mxu0 %v4021_v38 }
 0x5b6   :  { %2878 = vmatpush.bf16.msra.mxu3 %v4013_v26 }
 0x5b7   :  { %2892 = vmatpush.bf16.msrb.mxu0 %v4020_v37 }
 0x5b8   :  { %v2507_v12 = vpop.f32.mrf.mxu1  ;;  %v2375_v16 = vpop.f32.mrf.mxu0 }
 0x5b9   :  { %v2376_v11 = vadd.f32 %v2375_v16, %v2363_v15 }
 0x5ba   :  { %2879 = vmatpush.bf16.msra.mxu3 %v4012_v60 }
 0x5bb   :  { %v2545_v20 = vmul.f32 %v2537_v47, %v2376_v11  ;;  %2893 = vmatpush.bf16.msrb.mxu0 %v4019_v63 }
 0x5bd   :  { %v2559_v28 = vadd.f32 %v2551_v5, %v2545_v20 }
 0x5be   :  { %2880 = vmatpush.bf16.msra.mxu3 %v4011_v13 }
 0x5bf   :  { %v2563_v32 = vmax.f32 %v2559_v28, 0.0  ;;  %2894 = vmatpush.bf16.msrb.mxu0 %v4018_v2 }
 0x5c0   :  { %v2377_v19 = vpop.f32.mrf.mxu0 }
 0x5c2   :  { %2881 = vmatpush.bf16.msra.mxu3 %v4010_v1 }
 0x5c3   :  { %2895 = vmatpush.bf16.msrb.mxu0 %v4017_v45 }
 0x5c5   :  { %v2466_v22 = vpop.f32.mrf.mxu3 }
 0x5c6   :  { %2882 = vmatpush.bf16.msra.mxu3 %v4009_v39  ;;  %v2467_v27 = vadd.f32 %v2466_v22, %v5793_v55 }
 0x5c8   :  { %v2427_v25 = vpop.f32.mrf.mxu0 }
 0x5c9   :  { %v2428_v44 = vadd.f32 %v2427_v25, %v2415_v23  ;;  %v4149_v25 = vld [vmem:[%s5952_s18] ss:$0 sm:$0xff] }
 0x5cb   :  { %v2546_v29 = vmul.f32 %v2538_v24, %v2428_v44 }
 0x5cd   :  { %v2468_v61 = vpop.f32.mrf.mxu3  ;;  %v2560_v4 = vadd.f32 %v2552_v33, %v2546_v29 }
 0x5cf   :  { %v2564_v35 = vmax.f32 %v2560_v4, 0.0 }
 0x5d0   :  { %v2429_v41 = vpop.f32.mrf.mxu0 }
 0x5d1   :  { %v2567_v43 = vpack.c.bf16 %v2564_v35, %v2563_v32 }
 0x5d3   :  { %v2606_v51 = vunpack.c.l.b16 %v2567_v43  ;;  %v2607_v52 = vunpack.c.h.b16 %v2567_v43 }
 0x5d5   :  { %v2608_v56 = vpack.c.b16 %v2606_v51, %v2606_v51  ;;  %v2609_v40 = vpack.c.b16 %v2607_v52, %v2607_v52 }
 0x5d7   :  { %2716 = vmatmul.bf16.vlgmr.msrb.gmra.mxu2 %v2608_v56  ;;  %2729 = vmatmul.bf16.vlgmr.msra.gmra.mxu1 %v2609_v40 }
 0x5e5   :  { %v2518_v57 = vpop.f32.mrf.mxu3 }
 0x5e6   :  { %v2519_v7 = vadd.f32 %v2518_v57, %v5829_v50 }
 0x5e8   :  { %v2479_v62 = vpop.f32.mrf.mxu0 }
 0x5e9   :  { %v2480_v53 = vadd.f32 %v2479_v62, %v2467_v27 }
 0x5eb   :  { %v2547_v6 = vmul.f32 %v2539_v48, %v2480_v53 }
 0x5ed   :  { %v2520_v9 = vpop.f32.mrf.mxu3  ;;  %v2561_v31 = vadd.f32 %v2553_v59, %v2547_v6 }
 0x5ef   :  { %v2565_v14 = vmax.f32 %v2561_v31, 0.0 }
 0x5f0   :  { %v2481_v3 = vpop.f32.mrf.mxu0 }
 0x608   :  { %v2531_v8 = vpop.f32.mrf.mxu0 }
 0x609   :  { %v2532_v34 = vadd.f32 %v2531_v8, %v2519_v7 }
 0x60b   :  { %v2548_v58 = vmul.f32 %v2540_v0, %v2532_v34 }
 0x60d   :  { %v2562_v12 = vadd.f32 %v2554_v10, %v2548_v58 }
 0x60f   :  { %v2566_v46 = vmax.f32 %v2562_v12, 0.0 }
 0x610   :  { %v2533_v55 = vpop.f32.mrf.mxu0 }
 0x611   :  { %v2568_v16 = vpack.c.bf16 %v2566_v46, %v2565_v14 }
 0x613   :  { %v2773_v19 = vunpack.c.l.b16 %v2568_v16  ;;  %v2774_v15 = vunpack.c.h.b16 %v2568_v16 }
 0x615   :  { %v2775_v22 = vpack.c.b16 %v2773_v19, %v2773_v19  ;;  %v2776_v50 = vpack.c.b16 %v2774_v15, %v2774_v15 }
 0x617   :  { %2883 = vmatmul.bf16.vlgmr.msra.gmra.mxu3 %v2775_v22  ;;  %2896 = vmatmul.bf16.vlgmr.msrb.gmra.mxu0 %v2776_v50 }
 0x654   :  { %v2730_v11 = vpop.f32.mrf.mxu1 }
 0x65a   :  { %v2717_v47 = vpop.f32.mrf.mxu2 }
 0x65b   :  { %v2718_v21 = vadd.f32 %v4148_v17, %v2717_v47 }
 0x65c   :  { %v2732_v23 = vpop.f32.mrf.mxu1 }
 0x65d   :  { %v2731_v20 = vadd.f32 %v2730_v11, %v2718_v21 }
 0x65f   :  { %2735 = vst.msk [vmem:[#allocation3] sm:$0x3] %vm2734_vm9, %v2731_v20 }
 0x660   :  { %2913 = dma.vmem_to_hbm [thread:$0]  %s2909_s6, 32, %s2911_s26, [#allocation4]  }
 0x662   :  { %v2719_v5 = vpop.f32.mrf.mxu2 }
 0x694   :  { %v2897_v24 = vpop.f32.mrf.mxu0 }
 0x69a   :  { %v2884_v44 = vpop.f32.mrf.mxu3 }
 0x69b   :  { %v2885_v33 = vadd.f32 %v4149_v25, %v2884_v44 }
 0x69c   :  { %v2899_v61 = vpop.f32.mrf.mxu0 }
 0x69d   :  { %v2898_v28 = vadd.f32 %v2897_v24, %v2885_v33 }
 0x69f   :  { %2902 = vst.msk [vmem:[#allocation5] sm:$0x3] %vm2901_vm10, %v2898_v28 }
 0x6a0   :  { %2924 = dma.vmem_to_hbm [thread:$0]  %s2920_s11, 32, %s2922_s19, [#allocation6]  }
 0x6a1   :  { %2937 = dma.vmem_to_hbm [thread:$0]  %s2933_s27, 128, %s2935_s8, [#allocation6]  }
 0x6a2   :  { %v2886_v29 = vpop.f32.mrf.mxu3 }
 0x6a3   :  { %4222 = dma.done.wait [#allocation4], 32  }
 0x6a4   :  { %4223 = vsyncadd [#allocation4], 4294967264 }
 0x6a5   :  { %4224 = dma.done.wait [#allocation6], 160  }
 0x6a6   :  { %4225 = vsyncadd [#allocation6], 4294967136 }
 0x6a7   :  { %2952 = vsyncpa [#allocation4], 1 }
 0x6a8   :  { %2953 = vsyncpa [#allocation6], 1 }

</bundles_post_ra>
